<compile_context>
chip_gen: v5e
topology: v5e:2x2
jax: 0.10.0
libtpu: 0.0.40
codegen_flags: <defaults>
</compile_context>

<pallas_src>
import jax
import jax.numpy as jnp
from jax.experimental import pallas as pl
from jax.experimental.pallas import tpu as pltpu

IN_FEATURES = 1024
OUT_FEATURES = 2048


def linear_kernel(x_ref, w_ref, b_ref, o_ref):
    """One N-tile of  out = x @ W + b  (full K resident, bias resident)."""
    tn = o_ref.shape[1]
    col0 = pl.multiple_of(pl.program_id(0) * tn, tn)
    b_tile = b_ref[:, pl.ds(col0, tn)]            # (1, tn), broadcasts over bs
    o_ref[...] = (
        jnp.dot(x_ref[...], w_ref[...], preferred_element_type=jnp.float32)
        + b_tile
    ).astype(o_ref.dtype)


def prepare_weight(w, *, tn=1024):
    """One-time parameter transform: [K, N] -> [N//tn, K, tn] (contiguous tiles).

    Note: PyTorch's nn.Linear stores weight as [out, in]; pass its transpose
    ([in, out] = [1024, 2048]) here.
    """
    k_dim, n_dim = w.shape
    assert n_dim % tn == 0, "output features must divide the N tile"
    return jnp.transpose(w.reshape(k_dim, n_dim // tn, tn), (1, 0, 2))


def upscale34_forward(x, w_blocked, b):
    """x: [bs, 1024], w_blocked: [N//tn, 1024, tn], b: [1, 2048] -> [bs, 2048]."""
    bs, k_dim = x.shape
    n_blocks, k_w, tn = w_blocked.shape
    n_dim = n_blocks * tn
    assert k_w == k_dim

    # Pad batch up to the f32 sublane multiple (8) instead of asserting.
    pad = (-bs) % 8
    if pad:
        x = jnp.pad(x, ((0, pad), (0, 0)))
    bs_p = bs + pad

    cost = pl.CostEstimate(
        flops=2 * bs_p * k_dim * n_dim,
        transcendentals=0,
        bytes_accessed=(
            x.size * x.dtype.itemsize
            + w_blocked.size * w_blocked.dtype.itemsize
            + b.size * b.dtype.itemsize
            + bs_p * n_dim * x.dtype.itemsize
        ),
    )

    out = pl.pallas_call(
        linear_kernel,
        out_shape=jax.ShapeDtypeStruct((bs_p, n_dim), x.dtype),
        grid_spec=pltpu.PrefetchScalarGridSpec(
            num_scalar_prefetch=0,
            grid=(n_blocks,),
            in_specs=[
                # x: full [bs, K], same block every step -> stays resident.
                pl.BlockSpec((bs_p, k_dim), lambda j: (0, 0)),
                # W tile j: one contiguous [K, tn] slab (leading dim squeezed).
                pl.BlockSpec((pl.Squeezed(), k_dim, tn), lambda j: (j, 0, 0)),
                # bias: whole row, same block every step -> resident, no per-step DMA.
                pl.BlockSpec((1, n_dim), lambda j: (0, 0)),
            ],
            out_specs=pl.BlockSpec((bs_p, tn), lambda j: (0, j)),
        ),
        compiler_params=pltpu.CompilerParams(
            dimension_semantics=("parallel",),
            # Double-buffered 4 MiB weight tiles + x/out/bias fit comfortably;
            # 32 MiB stays within v7x's 64 MiB physical VMEM with headroom.
            vmem_limit_bytes=32 * 1024 * 1024,
        ),
        cost_estimate=cost,
    )(x, w_blocked, b)

    return out[:bs] if pad else out


if __name__ == "__main__":
    key = jax.random.PRNGKey(0)
    k_x, k_w, k_b = jax.random.split(key, 3)

    # Small batch; feature dims are fixed by the module (1024 -> 2048).
    bs = 8
    x = jax.random.normal(k_x, (bs, IN_FEATURES), dtype=jnp.float32)

    # Deterministic parameter init (mimics nn.Linear's uniform(-1/sqrt(in), 1/sqrt(in))).
    bound = 1.0 / jnp.sqrt(jnp.float32(IN_FEATURES))
    w = jax.random.uniform(
        k_w, (IN_FEATURES, OUT_FEATURES), dtype=jnp.float32, minval=-bound, maxval=bound
    )
    b = jax.random.uniform(
        k_b, (1, OUT_FEATURES), dtype=jnp.float32, minval=-bound, maxval=bound
    )

    # One-time weight blocking (outside the hot path).
    w_blocked = jax.block_until_ready(prepare_weight(w, tn=1024))

    out = upscale34_forward(x, w_blocked, b)
    out = jax.block_until_ready(out)

    # Reference check in plain JAX.
    ref = x @ w + b
    assert out.shape == (bs, OUT_FEATURES)
    assert jnp.allclose(out, ref, atol=1e-4, rtol=1e-4)

    print("KERNEL_OK")
</pallas_src>

<mosaic_0001>
module attributes {stable_mosaic.version = 11 : i64} {
  func.func @linear_kernel(%arg0: i32, %arg1: memref<8x1024xf32, #tpu.memory_space<vmem>>, %arg2: memref<1x1024x1024xf32, #tpu.memory_space<vmem>>, %arg3: memref<1x2048xf32, #tpu.memory_space<vmem>>, %arg4: memref<8x1024xf32, #tpu.memory_space<vmem>>) attributes {dimension_semantics = [#tpu.dimension_semantics<parallel>], iteration_bounds = array<i64: 2>, scalar_prefetch = 0 : i64, scratch_operands = 0 : i64, tpu.core_type = #tpu.core_type<tc>, window_params = [{pipeline_mode = #tpu.pipeline_mode<synchronous>, transform_indices = @transform_0, window_bounds = array<i64: 8, 1024>}, {transform_indices = @transform_1, window_bounds = array<i64: 1, 1024, 1024>}, {pipeline_mode = #tpu.pipeline_mode<synchronous>, transform_indices = @transform_2, window_bounds = array<i64: 1, 2048>}, {transform_indices = @transform_3, window_bounds = array<i64: 8, 1024>}]} {
    %c1024_i32 = arith.constant 1024 : i32
    %0 = arith.muli %arg0, %c1024_i32 : i32
    %1 = tpu.assume_multiple %0, 1024 : i32
    %c0 = arith.constant 0 : index
    %2 = arith.index_cast %1 : i32 to index
    %3 = vector.load %arg3[%c0, %2] : memref<1x2048xf32, #tpu.memory_space<vmem>>, vector<1x1024xf32>
    %c0_0 = arith.constant 0 : index
    %c0_1 = arith.constant 0 : index
    %4 = vector.load %arg1[%c0_0, %c0_1] : memref<8x1024xf32, #tpu.memory_space<vmem>>, vector<8x1024xf32>
    %c0_2 = arith.constant 0 : index
    %c0_3 = arith.constant 0 : index
    %c0_4 = arith.constant 0 : index
    %5 = vector.load %arg2[%c0_2, %c0_3, %c0_4] : memref<1x1024x1024xf32, #tpu.memory_space<vmem>>, vector<1x1024x1024xf32>
    %6 = vector.shape_cast %5 : vector<1x1024x1024xf32> to vector<1024x1024xf32>
    %cst = arith.constant dense<0.000000e+00> : vector<8x1024xf32>
    %7 = tpu.matmul %4, %6, %cst {dimension_numbers = #tpu.dot_dimension_numbers<[1], [0], [0], [1], [0, 0, 1, 1], [], []>} : vector<8x1024xf32>, vector<1024x1024xf32>, vector<8x1024xf32> -> vector<8x1024xf32>
    %8 = vector.broadcast %3 : vector<1x1024xf32> to vector<8x1024xf32>
    %9 = arith.addf %7, %8 : vector<8x1024xf32>
    %c0_5 = arith.constant 0 : index
    %c0_6 = arith.constant 0 : index
    %10 = vector.load %arg4[%c0_5, %c0_6] : memref<8x1024xf32, #tpu.memory_space<vmem>>, vector<8x1024xf32>
    tpu.vector_store %arg4[%c0_5, %c0_6], %9 {strides = array<i32>} : memref<8x1024xf32, #tpu.memory_space<vmem>>, vector<8x1024xf32>,
    return
  }
  func.func @transform_0(%arg0: i32) -> (i32, i32) {
    %c0_i32 = arith.constant 0 : i32
    %c0_i32_0 = arith.constant 0 : i32
    %c0_i32_1 = arith.constant 0 : i32
    return %c0_i32, %c0_i32_0 : i32, i32
  }
  func.func @transform_1(%arg0: i32) -> (i32, i32, i32) {
    %c0_i32 = arith.constant 0 : i32
    %c0_i32_0 = arith.constant 0 : i32
    %c0_i32_1 = arith.constant 0 : i32
    return %arg0, %c0_i32, %c0_i32_0 : i32, i32, i32
  }
  func.func @transform_2(%arg0: i32) -> (i32, i32) {
    %c0_i32 = arith.constant 0 : i32
    %c0_i32_0 = arith.constant 0 : i32
    %c0_i32_1 = arith.constant 0 : i32
    return %c0_i32, %c0_i32_0 : i32, i32
  }
  func.func @transform_3(%arg0: i32) -> (i32, i32) {
    %c0_i32 = arith.constant 0 : i32
    %c0_i32_0 = arith.constant 0 : i32
    return %c0_i32, %arg0 : i32, i32
  }
}

</mosaic_0001>

<bundles_post_ra>
// kernel: tpu_custom_call.1
= control target key start
LH: loop header
LB: loop body
LE: loop exit
PB: predicated region body
PF: predicated region fallthrough
CT: control target
= control target key end

     0   :  { %8 = vsyncpa [#allocation3], 0  ;;  %s4314_s0 = inlined_call_operand.hbm [shape: f32[8,1024], index: 0, kind: input, shape index: {}]   ;;  %s4315_s1 = inlined_call_operand.hbm [shape: f32[2,1024,1024], index: 1, kind: input, shape index: {}]   ;;  %s4316_s2 = inlined_call_operand.hbm [shape: f32[1,2048], index: 2, kind: input, shape index: {}]   ;;  %s4317_s3 = inlined_call_operand.hbm [shape: f32[8,2048], index: 3, kind: output, shape index: {}]  }
   0x1   :  { %9 = vsyncpa [#allocation6], 0 }
   0x2   :  { %11 = vsyncpa [#allocation6 + $0x1], 0 }
   0x3   :  { %12 = vsyncpa [#allocation4], 0 }
   0x4   :  { %14 = vsyncpa [#allocation4 + $0x1], 0  ;;  %s2978_s12 = smov 0   ;;  %s2980_s13 = smov 0  }
   0x5   :  { %s2982_s14 = smov 0   ;;  %s2984_s15 = smov 0  }
   0x6 LB: > { %s2999_s16 = sadd.s32 4294967295, %s2952_s15   ;;  %s2672_s17 = sadd.s32 4294967294, %s2952_s15   ;;  %s2952_s15 = sphi %s2984_s15, %s4328_s15   ;;  %s2948_s14 = sphi %s2982_s14, %s4327_s14   ;;  %s2944_s13 = sphi %s2980_s13, %s4326_s13   ;;  %s2940_s12 = sphi %s2978_s12, %s4325_s12  }
   0x7   : > { %s3003_s18 = sadd.s32 1, %s2952_s15   ;;  %s48_s19 = sadd.s32 1, %s2948_s14 }
   0x8   : > { %s45_s20 = ssub.s32 %s2952_s15, %s3003_s18  ;;  %p55_p0 = scmp.ne.s32.totalorder %s2948_s14, %s2944_s13 }
   0x9   : > { %p46_p1 = scmp.eq.s32.totalorder %s45_s20, 0  ;;  %p56_p2 = scmp.eq.s32.totalorder %s2952_s15, 0 }
   0xa   : > { %p61_p3 = scmp.ne.s32.totalorder %s2944_s13, %s2940_s12  ;;  %p62_p4 = scmp.eq.s32.totalorder %s2999_s16, 0 }
   0xb   : > { %s3015_s21 = scalar_select %p46_p1, %s2948_s14, %s48_s19  }
   0xc   : > { %p3017_p5 = por %p56_p2, %p55_p0  ;;  %p3023_p6 = por %p62_p4, %p61_p3 }
   0xd   : > { %p106_p7 = scmp.eq.s32.totalorder %s2999_s16, 1  ;;  %p112_p8 = scmp.eq.s32.totalorder %s2672_s17, 1 }
   0xe   : > { %p2673_p9 = scmp.ge.s32.totalorder %s2952_s15, 1  ;;  %p119_p10 = scmp.lt.s32.totalorder %s2952_s15, 3 }
   0xf   : > { %p3030_p11 = por %p106_p7, %p55_p0  ;;  %p3034_p12 = por %p112_p8, %p61_p3 }
  0x10   : > { %p3038_p13 = pnand %p2673_p9, %p119_p10  ;;  %s143_s29 = sshll.u32 %s4316_s2, 4  ;;  %s144_s29 = int_to_ptr.hbm [resolvable:$true] %s143_s29 }
  0x11   : > { %s2954_s30 = smov [#allocation7]   ;;  %p2722_p3 = scmp.lt.s32.totalorder %s2952_s15, 2 }
  0x12   : > { %p2705_p1 = pneg %p3038_p13  ;;  %s145_s4 = sshll.u32 %s2954_s30, 4  ;;  %s146_s4 = int_to_ptr.vmem [resolvable:$true] %s145_s4 }
  0x13   : > { %s131_s7 = sshll.u32 %s4314_s0, 4  ;;  %p3056_p7 = pnand %p2722_p3, %p3017_p5  ;;  %s132_s7 = int_to_ptr.hbm [resolvable:$true] %s131_s7 }
  0x14   : > { %p2706_p2 = pnand %p2705_p1, %p62_p4  ;;  %s2955_s9 = smov [#allocation2]  }
  0x15   : > { %s133_s10 = sshll.u32 %s2955_s9, 4  ;;  %s156_s11 = sand.u32 1, %s2952_s15   ;;  %s134_s10 = int_to_ptr.vmem [resolvable:$true] %s133_s10 }
  0x16   : > { %2711 = dma.hbm_to_vmem [thread:$0]  (!%p2706_p2), %s144_s29, 256, %s146_s4, [#allocation6]  }
  0x17   : > { %2708 = dma.hbm_to_vmem [thread:$0]  (!%p2706_p2), %s132_s7, 1024, %s134_s10, [#allocation3]  }
  0x18   : > { %s158_s17 = sand.u32 1, %s2948_s14   ;;  %s2691_s20 = sshll.u32 %s2952_s15, 13 }
  0x19   : > { %s2677_s19 = sshll.u32 %s158_s17, 13  ;;  %s165_s30 = scalar_lea.hbm %s4315_s1, %s2691_s20 }
  0x1a   : > { %s166_s5 = sshll.u32 %s165_s30, 4  ;;  %s160_s29 = scalar_lea.vmem [#allocation5], %s2677_s19  ;;  %s167_s5 = int_to_ptr.hbm [resolvable:$true] %s166_s5 }
  0x1b   : > { %s168_s22 = sshll.u32 %s160_s29, 4  ;;  %s157_s4 = scalar_lea.sflag [#allocation6], %s156_s11  ;;  %s169_s22 = int_to_ptr.vmem [resolvable:$true] %s168_s22 }
  0x1c   : > { %s2848_s6 = sshra.s32 %s167_s5, 4  ;;  %p2852_p8 = pneg %p3056_p7  ;;  %s2849_s6 = int_to_ptr.hbm [resolvable:$true] %s2848_s6 }
  0x1d   : > { %s2850_s9 = scalar_lea.hbm %s2849_s6, 8192  ;;  %s2855_s17 = scalar_lea.hbm %s4315_s1, 16384 }
  0x1e   : > { %p2851_p5 = scmp.ne.s32.totalorder %s2849_s6, %s2850_s9  ;;  %p2856_p1 = scmp.lt.s32.totalorder %s2849_s6, %s4315_s1 }
  0x1f   : > { %p2857_p2 = scmp.lt.s32.totalorder %s2855_s17, %s2850_s9 }
  0x20   : > { %p2853_p9 = pnand %p2852_p8, %p2851_p5 }
  0x21   : > { %p2858_p3 = por %p2857_p2, %p2856_p1 }
  0x22   : > { %p2854_p10 = pneg %p2853_p9 }
  0x24   : > { %p2859_p0 = pnand %p2858_p3, %p2854_p10 }
  0x26   : > { %2862 = shalt.err (!%p2859_p0)
}
  0x27   : > { %s2956_s11 = smov 1024   ;;  %s2957_s19 = smov 64  }
  0x28   : > { %2715 = dma.hbm_to_vmem [thread:$0]  (!%p3056_p7), %s167_s5, 131072, %s169_s22, %s157_s4, %s2956_s11, %s2956_s11, %s2957_s19  }
  0x29   : > { %180 = sbr.rel (%p3038_p13) target bundleno = 902 (0x386), region = 32 }
  0x2e   : > { %2923 = dma.done.wait (%p62_p4), [#allocation3], 1024  }
  0x2f   : > { %2925 = vsyncadd (%p62_p4), [#allocation3], 4294966272  ;;  %s187_s28 = sand.u32 1, %s2999_s16   ;;  %s3084_s30 = sand.u32 1, %s2944_s13  }
  0x30   : > { %s2682_s29 = sshll.u32 %s3084_s30, 13  ;;  %s188_s6 = scalar_lea.sflag [#allocation6], %s187_s28 }
  0x31   : > { %s3087_s8 = scalar_lea.vmem [#allocation5], %s2682_s29 }
  0x32   : > { %2927 = dma.done.wait (%p3023_p6), %s188_s6, 131072  }
  0x33   : > { %2929 = vsyncadd (%p3023_p6), %s188_s6, 4294836224 }
  0x34   : > { %2931 = dma.done.wait (%p62_p4), [#allocation6], 256  }
  0x35   : > { %2933 = vsyncadd (%p62_p4), [#allocation6], 4294967040  ;;  %v610_v0 = vld [vmem:[%s3087_s8 + $0xbc0] sm:$0xff]  ;;  %s2685_s23 = sshll.u32 %s2999_s16, 10  ;;  %s2684_s22 = sshll.u32 %s3084_s30, 6 }
  0x36   : > { %v354_v1 = vld [vmem:[%s3087_s8 + $0x3c0] sm:$0xff]  ;;  %1315 = vmatpush.msra.mxu2 %v610_v0  ;;  %s222_s26 = sshra.s32 %s2685_s23, 7  ;;  %s3555_s4 = scalar_lea.vmem [#allocation8], %s2684_s22 }
  0x37   : > { %v602_v2 = vld [vmem:[%s3087_s8 + $0xb80] sm:$0xff]  ;;  %1275 = vmatpush.msra.mxu0 %v354_v1  ;;  %s3488_s5 = scalar_lea.vmem [#allocation7], %s222_s26  ;;  %s2692_s9 = sshll.u32 %s2999_s16, 6 }
  0x38   : > { %v738_v3 = vld [vmem:[%s3087_s8 + $0xfc0] sm:$0xff]  ;;  %1316 = vmatpush.msra.mxu2 %v602_v2  ;;  %s2575_s17 = scalar_lea.hbm %s4317_s3, %s2692_s9  ;;  %s2577_s27 = sshll.u32 %s3555_s4, 4  ;;  %s2578_s27 = int_to_ptr.vmem [resolvable:$true] %s2577_s27 }
  0x39   : > { %v346_v4 = vld [vmem:[%s3087_s8 + $0x380] sm:$0xff]  ;;  %1335 = vmatpush.msra.mxu3 %v738_v3  ;;  %s2579_s20 = sshll.u32 %s2575_s17, 4  ;;  %s2564_s11 = scalar_lea.sflag [#allocation4], %s3084_s30  ;;  %s2580_s20 = int_to_ptr.hbm [resolvable:$true] %s2579_s20 }
  0x3a   : > { %v482_v5 = vld [vmem:[%s3087_s8 + $0x7c0] sm:$0xff]  ;;  %1276 = vmatpush.msra.mxu0 %v346_v4  ;;  %s2892_s16 = sshra.s32 %s2580_s20, 4  ;;  %s2898_s6 = scalar_lea.hbm %s4317_s3, 128  ;;  %s2893_s16 = int_to_ptr.hbm [resolvable:$true] %s2892_s16 }
  0x3b   : > { %1295 = vmatpush.msra.mxu1 %v482_v5  ;;  %v594_v6 = vld [vmem:[%s3087_s8 + $0xb40] sm:$0xff]  ;;  %s2894_s19 = scalar_lea.hbm %s2893_s16, 64  ;;  %p2899_p0 = scmp.lt.s32.totalorder %s2893_s16, %s4317_s3 }
  0x3c   : > { %v730_v7 = vld [vmem:[%s3087_s8 + $0xf80] sm:$0xff]  ;;  %1317 = vmatpush.msra.mxu2 %v594_v6  ;;  %p2895_p4 = scmp.ne.s32.totalorder %s2893_s16, %s2894_s19  ;;  %p2900_p7 = scmp.lt.s32.totalorder %s2898_s6, %s2894_s19 }
  0x3d   : > { %v338_v8 = vld [vmem:[%s3087_s8 + $0x340] sm:$0xff]  ;;  %1336 = vmatpush.msra.mxu3 %v730_v7 }
  0x3e   : > { %v474_v9 = vld [vmem:[%s3087_s8 + $0x780] sm:$0xff]  ;;  %1277 = vmatpush.msra.mxu0 %v338_v8  ;;  %p2896_p6 = pnand %p2895_p4, %p3030_p11  ;;  %p2901_p5 = por %p2900_p7, %p2899_p0 }
  0x3f   : > { %v722_v10 = vld [vmem:[%s3087_s8 + $0xf40] sm:$0xff]  ;;  %1296 = vmatpush.msra.mxu1 %v474_v9 }
  0x40   : > { %v586_v11 = vld [vmem:[%s3087_s8 + $0xb00] sm:$0xff]  ;;  %1337 = vmatpush.msra.mxu3 %v722_v10  ;;  %p2897_p13 = pneg %p2896_p6 }
  0x41   : > { %v330_v12 = vld [vmem:[%s3087_s8 + $0x300] sm:$0xff]  ;;  %1318 = vmatpush.msra.mxu2 %v586_v11 }
  0x42   : > { %v466_v13 = vld [vmem:[%s3087_s8 + $0x740] sm:$0xff]  ;;  %1278 = vmatpush.msra.mxu0 %v330_v12  ;;  %p2902_p8 = pnand %p2901_p5, %p2897_p13 }
  0x43   : > { %v714_v14 = vld [vmem:[%s3087_s8 + $0xf00] sm:$0xff]  ;;  %1297 = vmatpush.msra.mxu1 %v466_v13 }
  0x44   : > { %v458_v15 = vld [vmem:[%s3087_s8 + $0x700] sm:$0xff]  ;;  %1338 = vmatpush.msra.mxu3 %v714_v14 }
  0x45   : > { %v578_v16 = vld [vmem:[%s3087_s8 + $0xac0] sm:$0xff]  ;;  %1298 = vmatpush.msra.mxu1 %v458_v15 }
  0x46   : > { %v322_v17 = vld [vmem:[%s3087_s8 + $0x2c0] sm:$0xff]  ;;  %1319 = vmatpush.msra.mxu2 %v578_v16 }
  0x47   : > { %v706_v18 = vld [vmem:[%s3087_s8 + $0xec0] sm:$0xff]  ;;  %1279 = vmatpush.msra.mxu0 %v322_v17 }
  0x48   : > { %v450_v19 = vld [vmem:[%s3087_s8 + $0x6c0] sm:$0xff]  ;;  %1339 = vmatpush.msra.mxu3 %v706_v18 }
  0x49   : > { %v570_v20 = vld [vmem:[%s3087_s8 + $0xa80] sm:$0xff]  ;;  %1299 = vmatpush.msra.mxu1 %v450_v19 }
  0x4a   : > { %v314_v21 = vld [vmem:[%s3087_s8 + $0x280] sm:$0xff]  ;;  %1320 = vmatpush.msra.mxu2 %v570_v20 }
  0x4b   : > { %v698_v22 = vld [vmem:[%s3087_s8 + $0xe80] sm:$0xff]  ;;  %1280 = vmatpush.msra.mxu0 %v314_v21 }
  0x4c   : > { %v442_v23 = vld [vmem:[%s3087_s8 + $0x680] sm:$0xff]  ;;  %1340 = vmatpush.msra.mxu3 %v698_v22 }
  0x4d   : > { %v562_v24 = vld [vmem:[%s3087_s8 + $0xa40] sm:$0xff]  ;;  %1300 = vmatpush.msra.mxu1 %v442_v23 }
  0x4e   : > { %v306_v25 = vld [vmem:[%s3087_s8 + $0x240] sm:$0xff]  ;;  %1321 = vmatpush.msra.mxu2 %v562_v24 }
  0x4f   : > { %v690_v26 = vld [vmem:[%s3087_s8 + $0xe40] sm:$0xff]  ;;  %1281 = vmatpush.msra.mxu0 %v306_v25 }
  0x50   : > { %v434_v27 = vld [vmem:[%s3087_s8 + $0x640] sm:$0xff]  ;;  %1341 = vmatpush.msra.mxu3 %v690_v26 }
  0x51   : > { %v554_v28 = vld [vmem:[%s3087_s8 + $0xa00] sm:$0xff]  ;;  %1301 = vmatpush.msra.mxu1 %v434_v27 }
  0x52   : > { %v298_v29 = vld [vmem:[%s3087_s8 + $0x200] sm:$0xff]  ;;  %1322 = vmatpush.msra.mxu2 %v554_v28 }
  0x53   : > { %v682_v30 = vld [vmem:[%s3087_s8 + $0xe00] sm:$0xff]  ;;  %1282 = vmatpush.msra.mxu0 %v298_v29 }
  0x54   : > { %v426_v31 = vld [vmem:[%s3087_s8 + $0x600] sm:$0xff]  ;;  %1342 = vmatpush.msra.mxu3 %v682_v30 }
  0x55   : > { %v546_v32 = vld [vmem:[%s3087_s8 + $0x9c0] sm:$0xff]  ;;  %1302 = vmatpush.msra.mxu1 %v426_v31 }
  0x56   : > { %v290_v33 = vld [vmem:[%s3087_s8 + $0x1c0] sm:$0xff]  ;;  %1323 = vmatpush.msra.mxu2 %v546_v32 }
  0x57   : > { %v674_v34 = vld [vmem:[%s3087_s8 + $0xdc0] sm:$0xff]  ;;  %1283 = vmatpush.msra.mxu0 %v290_v33 }
  0x58   : > { %v418_v35 = vld [vmem:[%s3087_s8 + $0x5c0] sm:$0xff]  ;;  %1343 = vmatpush.msra.mxu3 %v674_v34 }
  0x59   : > { %v538_v36 = vld [vmem:[%s3087_s8 + $0x980] sm:$0xff]  ;;  %1303 = vmatpush.msra.mxu1 %v418_v35 }
  0x5a   : > { %v282_v37 = vld [vmem:[%s3087_s8 + $0x180] sm:$0xff]  ;;  %1324 = vmatpush.msra.mxu2 %v538_v36 }
  0x5b   : > { %v666_v38 = vld [vmem:[%s3087_s8 + $0xd80] sm:$0xff]  ;;  %1284 = vmatpush.msra.mxu0 %v282_v37 }
  0x5c   : > { %v410_v39 = vld [vmem:[%s3087_s8 + $0x580] sm:$0xff]  ;;  %1344 = vmatpush.msra.mxu3 %v666_v38 }
  0x5d   : > { %v530_v40 = vld [vmem:[%s3087_s8 + $0x940] sm:$0xff]  ;;  %1304 = vmatpush.msra.mxu1 %v410_v39 }
  0x5e   : > { %v274_v41 = vld [vmem:[%s3087_s8 + $0x140] sm:$0xff]  ;;  %1325 = vmatpush.msra.mxu2 %v530_v40 }
  0x5f   : > { %v658_v42 = vld [vmem:[%s3087_s8 + $0xd40] sm:$0xff]  ;;  %1285 = vmatpush.msra.mxu0 %v274_v41 }
  0x60   : > { %v402_v43 = vld [vmem:[%s3087_s8 + $0x540] sm:$0xff]  ;;  %1345 = vmatpush.msra.mxu3 %v658_v42 }
  0x61   : > { %v522_v44 = vld [vmem:[%s3087_s8 + $0x900] sm:$0xff]  ;;  %1305 = vmatpush.msra.mxu1 %v402_v43 }
  0x62   : > { %v266_v45 = vld [vmem:[%s3087_s8 + $0x100] sm:$0xff]  ;;  %1326 = vmatpush.msra.mxu2 %v522_v44 }
  0x63   : > { %v650_v46 = vld [vmem:[%s3087_s8 + $0xd00] sm:$0xff]  ;;  %1286 = vmatpush.msra.mxu0 %v266_v45 }
  0x64   : > { %v394_v47 = vld [vmem:[%s3087_s8 + $0x500] sm:$0xff]  ;;  %1346 = vmatpush.msra.mxu3 %v650_v46 }
  0x65   : > { %v514_v48 = vld [vmem:[%s3087_s8 + $0x8c0] sm:$0xff]  ;;  %1306 = vmatpush.msra.mxu1 %v394_v47 }
  0x66   : > { %v258_v49 = vld [vmem:[%s3087_s8 + $0xc0] sm:$0xff]  ;;  %1327 = vmatpush.msra.mxu2 %v514_v48 }
  0x67   : > { %v642_v50 = vld [vmem:[%s3087_s8 + $0xcc0] sm:$0xff]  ;;  %1287 = vmatpush.msra.mxu0 %v258_v49 }
  0x68   : > { %v386_v51 = vld [vmem:[%s3087_s8 + $0x4c0] sm:$0xff]  ;;  %1347 = vmatpush.msra.mxu3 %v642_v50 }
  0x69   : > { %v506_v52 = vld [vmem:[%s3087_s8 + $0x880] sm:$0xff]  ;;  %1307 = vmatpush.msra.mxu1 %v386_v51 }
  0x6a   : > { %v250_v53 = vld [vmem:[%s3087_s8 + $0x80] sm:$0xff]  ;;  %1328 = vmatpush.msra.mxu2 %v506_v52 }
  0x6b   : > { %v634_v54 = vld [vmem:[%s3087_s8 + $0xc80] sm:$0xff]  ;;  %1288 = vmatpush.msra.mxu0 %v250_v53 }
  0x6c   : > { %v378_v55 = vld [vmem:[%s3087_s8 + $0x480] sm:$0xff]  ;;  %1348 = vmatpush.msra.mxu3 %v634_v54 }
  0x6d   : > { %v498_v56 = vld [vmem:[%s3087_s8 + $0x840] sm:$0xff]  ;;  %1308 = vmatpush.msra.mxu1 %v378_v55 }
  0x6e   : > { %v242_v57 = vld [vmem:[%s3087_s8 + $0x40] sm:$0xff]  ;;  %1329 = vmatpush.msra.mxu2 %v498_v56 }
  0x6f   : > { %v626_v58 = vld [vmem:[%s3087_s8 + $0xc40] sm:$0xff]  ;;  %1289 = vmatpush.msra.mxu0 %v242_v57 }
  0x70   : > { %v370_v59 = vld [vmem:[%s3087_s8 + $0x440] sm:$0xff]  ;;  %1349 = vmatpush.msra.mxu3 %v626_v58 }
  0x71   : > { %v490_v60 = vld [vmem:[%s3087_s8 + $0x800] sm:$0xff]  ;;  %1309 = vmatpush.msra.mxu1 %v370_v59 }
  0x72   : > { %v234_v61 = vld [vmem:[%s3087_s8] sm:$0xff]  ;;  %1330 = vmatpush.msra.mxu2 %v490_v60  ;;  %v3221_v60 = vld [vmem:[#allocation2 + $0x10] sm:$0xff] }
  0x73   : > { %v1122_v62 = vld [vmem:[%s3087_s8 + $0x1bc0] sm:$0xff]  ;;  %1290 = vmatpush.msra.mxu0 %v234_v61  ;;  %1331 = vmatmul.f32.vlgmr.msra.gmra.mxu2 %v3221_v60 }
  0x74   : > { %v618_v63 = vld [vmem:[%s3087_s8 + $0xc00] sm:$0xff]  ;;  %1395 = vmatpush.msrb.mxu2 %v1122_v62  ;;  %v611_v62 = vld [vmem:[%s3087_s8 + $0xbc8] sm:$0xff] }
  0x75   : > { %v866_v0 = vld [vmem:[%s3087_s8 + $0x13c0] sm:$0xff]  ;;  %1350 = vmatpush.msra.mxu3 %v618_v63 }
  0x76   : > { %v1250_v1 = vld [vmem:[%s3087_s8 + $0x1fc0] sm:$0xff]  ;;  %1355 = vmatpush.msrb.mxu0 %v866_v0 }
  0x77   : > { %v1114_v2 = vld [vmem:[%s3087_s8 + $0x1b80] sm:$0xff]  ;;  %1415 = vmatpush.msrb.mxu3 %v1250_v1 }
  0x78   : > { %v362_v3 = vld [vmem:[%s3087_s8 + $0x400] sm:$0xff]  ;;  %1396 = vmatpush.msrb.mxu2 %v1114_v2  ;;  %v3230_v2 = vld [vmem:[#allocation2 + $0x18] sm:$0xff] }
  0x79   : > { %v858_v4 = vld [vmem:[%s3087_s8 + $0x1380] sm:$0xff]  ;;  %1310 = vmatpush.msra.mxu1 %v362_v3  ;;  %v355_v3 = vld [vmem:[%s3087_s8 + $0x3c8] sm:$0xff]  ;;  %1351 = vmatmul.f32.vlgmr.msra.gmra.mxu3 %v3230_v2 }
  0x7a   : > { %v994_v5 = vld [vmem:[%s3087_s8 + $0x17c0] sm:$0xff]  ;;  %1356 = vmatpush.msrb.mxu0 %v858_v4  ;;  %v603_v4 = vld [vmem:[%s3087_s8 + $0xb88] sm:$0xff] }
  0x7b   : > { %v1106_v6 = vld [vmem:[%s3087_s8 + $0x1b40] sm:$0xff]  ;;  %1375 = vmatpush.msrb.mxu1 %v994_v5  ;;  %v739_v5 = vld [vmem:[%s3087_s8 + $0xfc8] sm:$0xff] }
  0x7c   : > { %v1242_v7 = vld [vmem:[%s3087_s8 + $0x1f80] sm:$0xff]  ;;  %1397 = vmatpush.msrb.mxu2 %v1106_v6 }
  0x7d   : > { %v850_v8 = vld [vmem:[%s3087_s8 + $0x1340] sm:$0xff]  ;;  %1416 = vmatpush.msrb.mxu3 %v1242_v7  ;;  %v347_v7 = vld [vmem:[%s3087_s8 + $0x388] sm:$0xff] }
  0x7e   : > { %v986_v9 = vld [vmem:[%s3087_s8 + $0x1780] sm:$0xff]  ;;  %1357 = vmatpush.msrb.mxu0 %v850_v8  ;;  %v3239_v8 = vld [vmem:[#allocation2 + $0x8] sm:$0xff] }
  0x7f   : > { %v1098_v10 = vld [vmem:[%s3087_s8 + $0x1b00] sm:$0xff]  ;;  %1376 = vmatpush.msrb.mxu1 %v986_v9  ;;  %v595_v9 = vld [vmem:[%s3087_s8 + $0xb48] sm:$0xff] }
  0x80   : > { %v1234_v11 = vld [vmem:[%s3087_s8 + $0x1f40] sm:$0xff]  ;;  %1398 = vmatpush.msrb.mxu2 %v1098_v10  ;;  %v483_v10 = vld [vmem:[%s3087_s8 + $0x7c8] sm:$0xff]  ;;  %1311 = vmatmul.f32.vlgmr.msra.gmra.mxu1 %v3239_v8 }
  0x81   : > { %v842_v12 = vld [vmem:[%s3087_s8 + $0x1300] sm:$0xff]  ;;  %1417 = vmatpush.msrb.mxu3 %v1234_v11  ;;  %v731_v11 = vld [vmem:[%s3087_s8 + $0xf88] sm:$0xff] }
  0x82   : > { %v978_v13 = vld [vmem:[%s3087_s8 + $0x1740] sm:$0xff]  ;;  %1358 = vmatpush.msrb.mxu0 %v842_v12  ;;  %v339_v12 = vld [vmem:[%s3087_s8 + $0x348] sm:$0xff] }
  0x83   : > { %v1090_v14 = vld [vmem:[%s3087_s8 + $0x1ac0] sm:$0xff]  ;;  %1377 = vmatpush.msrb.mxu1 %v978_v13  ;;  %v587_v13 = vld [vmem:[%s3087_s8 + $0xb08] sm:$0xff] }
  0x84   : > { %v1226_v15 = vld [vmem:[%s3087_s8 + $0x1f00] sm:$0xff]  ;;  %1399 = vmatpush.msrb.mxu2 %v1090_v14  ;;  %v475_v14 = vld [vmem:[%s3087_s8 + $0x788] sm:$0xff] }
  0x85   : > { %v834_v16 = vld [vmem:[%s3087_s8 + $0x12c0] sm:$0xff]  ;;  %1418 = vmatpush.msrb.mxu3 %v1226_v15  ;;  %v723_v15 = vld [vmem:[%s3087_s8 + $0xf48] sm:$0xff] }
  0x86   : > { %v970_v17 = vld [vmem:[%s3087_s8 + $0x1700] sm:$0xff]  ;;  %1359 = vmatpush.msrb.mxu0 %v834_v16  ;;  %v3249_v16 = vld [vmem:[#allocation2 + $0x30] sm:$0xff] }
  0x87   : > { %v1082_v18 = vld [vmem:[%s3087_s8 + $0x1a80] sm:$0xff]  ;;  %1378 = vmatpush.msrb.mxu1 %v970_v17  ;;  %v331_v17 = vld [vmem:[%s3087_s8 + $0x308] sm:$0xff] }
  0x88   : > { %v1218_v19 = vld [vmem:[%s3087_s8 + $0x1ec0] sm:$0xff]  ;;  %1400 = vmatpush.msrb.mxu2 %v1082_v18  ;;  %v467_v18 = vld [vmem:[%s3087_s8 + $0x748] sm:$0xff] }
  0x89   : > { %v826_v20 = vld [vmem:[%s3087_s8 + $0x1280] sm:$0xff]  ;;  %1419 = vmatpush.msrb.mxu3 %v1218_v19  ;;  %v579_v19 = vld [vmem:[%s3087_s8 + $0xac8] sm:$0xff] }
  0x8a   : > { %v962_v21 = vld [vmem:[%s3087_s8 + $0x16c0] sm:$0xff]  ;;  %1360 = vmatpush.msrb.mxu0 %v826_v20  ;;  %v715_v20 = vld [vmem:[%s3087_s8 + $0xf08] sm:$0xff] }
  0x8b   : > { %v1074_v22 = vld [vmem:[%s3087_s8 + $0x1a40] sm:$0xff]  ;;  %1379 = vmatpush.msrb.mxu1 %v962_v21 }
  0x8c   : > { %v1210_v23 = vld [vmem:[%s3087_s8 + $0x1e80] sm:$0xff]  ;;  %1401 = vmatpush.msrb.mxu2 %v1074_v22  ;;  %v3258_v22 = vld [vmem:[#allocation2 + $0x38] sm:$0xff] }
  0x8d   : > { %v818_v24 = vld [vmem:[%s3087_s8 + $0x1240] sm:$0xff]  ;;  %1420 = vmatpush.msrb.mxu3 %v1210_v23  ;;  %v323_v23 = vld [vmem:[%s3087_s8 + $0x2c8] sm:$0xff] }
  0x8e   : > { %v954_v25 = vld [vmem:[%s3087_s8 + $0x1680] sm:$0xff]  ;;  %1361 = vmatpush.msrb.mxu0 %v818_v24  ;;  %v459_v24 = vld [vmem:[%s3087_s8 + $0x708] sm:$0xff] }
  0x8f   : > { %v1066_v26 = vld [vmem:[%s3087_s8 + $0x1a00] sm:$0xff]  ;;  %1380 = vmatpush.msrb.mxu1 %v954_v25  ;;  %v571_v25 = vld [vmem:[%s3087_s8 + $0xa88] sm:$0xff] }
  0x90   : > { %v1202_v27 = vld [vmem:[%s3087_s8 + $0x1e40] sm:$0xff]  ;;  %1402 = vmatpush.msrb.mxu2 %v1066_v26  ;;  %v707_v26 = vld [vmem:[%s3087_s8 + $0xec8] sm:$0xff] }
  0x91   : > { %v810_v28 = vld [vmem:[%s3087_s8 + $0x1200] sm:$0xff]  ;;  %1421 = vmatpush.msrb.mxu3 %v1202_v27  ;;  %v3265_v27 = vld [vmem:[#allocation2 + $0x28] sm:$0xff] }
  0x92   : > { %v946_v29 = vld [vmem:[%s3087_s8 + $0x1640] sm:$0xff]  ;;  %1362 = vmatpush.msrb.mxu0 %v810_v28  ;;  %v315_v28 = vld [vmem:[%s3087_s8 + $0x288] sm:$0xff] }
  0x93   : > { %v1058_v30 = vld [vmem:[%s3087_s8 + $0x19c0] sm:$0xff]  ;;  %1381 = vmatpush.msrb.mxu1 %v946_v29  ;;  %v451_v29 = vld [vmem:[%s3087_s8 + $0x6c8] sm:$0xff] }
  0x94   : > { %v1194_v31 = vld [vmem:[%s3087_s8 + $0x1e00] sm:$0xff]  ;;  %1403 = vmatpush.msrb.mxu2 %v1058_v30  ;;  %v563_v30 = vld [vmem:[%s3087_s8 + $0xa48] sm:$0xff] }
  0x95   : > { %v802_v32 = vld [vmem:[%s3087_s8 + $0x11c0] sm:$0xff]  ;;  %1422 = vmatpush.msrb.mxu3 %v1194_v31  ;;  %v699_v31 = vld [vmem:[%s3087_s8 + $0xe88] sm:$0xff] }
  0x96   : > { %v938_v33 = vld [vmem:[%s3087_s8 + $0x1600] sm:$0xff]  ;;  %1363 = vmatpush.msrb.mxu0 %v802_v32  ;;  %v307_v32 = vld [vmem:[%s3087_s8 + $0x248] sm:$0xff] }
  0x97   : > { %v1050_v34 = vld [vmem:[%s3087_s8 + $0x1980] sm:$0xff]  ;;  %1382 = vmatpush.msrb.mxu1 %v938_v33  ;;  %v443_v33 = vld [vmem:[%s3087_s8 + $0x688] sm:$0xff] }
  0x98   : > { %v1186_v35 = vld [vmem:[%s3087_s8 + $0x1dc0] sm:$0xff]  ;;  %1404 = vmatpush.msrb.mxu2 %v1050_v34  ;;  %v555_v34 = vld [vmem:[%s3087_s8 + $0xa08] sm:$0xff] }
  0x99   : > { %v794_v36 = vld [vmem:[%s3087_s8 + $0x1180] sm:$0xff]  ;;  %1423 = vmatpush.msrb.mxu3 %v1186_v35  ;;  %v691_v35 = vld [vmem:[%s3087_s8 + $0xe48] sm:$0xff] }
  0x9a   : > { %v930_v37 = vld [vmem:[%s3087_s8 + $0x15c0] sm:$0xff]  ;;  %1364 = vmatpush.msrb.mxu0 %v794_v36  ;;  %v299_v36 = vld [vmem:[%s3087_s8 + $0x208] sm:$0xff] }
  0x9b   : > { %v1042_v38 = vld [vmem:[%s3087_s8 + $0x1940] sm:$0xff]  ;;  %1383 = vmatpush.msrb.mxu1 %v930_v37  ;;  %v435_v37 = vld [vmem:[%s3087_s8 + $0x648] sm:$0xff] }
  0x9c   : > { %v1178_v39 = vld [vmem:[%s3087_s8 + $0x1d80] sm:$0xff]  ;;  %1405 = vmatpush.msrb.mxu2 %v1042_v38  ;;  %v547_v38 = vld [vmem:[%s3087_s8 + $0x9c8] sm:$0xff] }
  0x9d   : > { %v786_v40 = vld [vmem:[%s3087_s8 + $0x1140] sm:$0xff]  ;;  %1424 = vmatpush.msrb.mxu3 %v1178_v39  ;;  %v683_v39 = vld [vmem:[%s3087_s8 + $0xe08] sm:$0xff] }
  0x9e   : > { %v922_v41 = vld [vmem:[%s3087_s8 + $0x1580] sm:$0xff]  ;;  %1365 = vmatpush.msrb.mxu0 %v786_v40  ;;  %v291_v40 = vld [vmem:[%s3087_s8 + $0x1c8] sm:$0xff] }
  0x9f   : > { %v1034_v42 = vld [vmem:[%s3087_s8 + $0x1900] sm:$0xff]  ;;  %1384 = vmatpush.msrb.mxu1 %v922_v41  ;;  %v427_v41 = vld [vmem:[%s3087_s8 + $0x608] sm:$0xff] }
  0xa0   : > { %v1170_v43 = vld [vmem:[%s3087_s8 + $0x1d40] sm:$0xff]  ;;  %1406 = vmatpush.msrb.mxu2 %v1034_v42  ;;  %v539_v42 = vld [vmem:[%s3087_s8 + $0x988] sm:$0xff] }
  0xa1   : > { %v778_v44 = vld [vmem:[%s3087_s8 + $0x1100] sm:$0xff]  ;;  %1425 = vmatpush.msrb.mxu3 %v1170_v43  ;;  %v675_v43 = vld [vmem:[%s3087_s8 + $0xdc8] sm:$0xff] }
  0xa2   : > { %v914_v45 = vld [vmem:[%s3087_s8 + $0x1540] sm:$0xff]  ;;  %1366 = vmatpush.msrb.mxu0 %v778_v44  ;;  %v283_v44 = vld [vmem:[%s3087_s8 + $0x188] sm:$0xff] }
  0xa3   : > { %v1026_v46 = vld [vmem:[%s3087_s8 + $0x18c0] sm:$0xff]  ;;  %1385 = vmatpush.msrb.mxu1 %v914_v45  ;;  %v419_v45 = vld [vmem:[%s3087_s8 + $0x5c8] sm:$0xff] }
  0xa4   : > { %v1162_v47 = vld [vmem:[%s3087_s8 + $0x1d00] sm:$0xff]  ;;  %1407 = vmatpush.msrb.mxu2 %v1026_v46  ;;  %v531_v46 = vld [vmem:[%s3087_s8 + $0x948] sm:$0xff] }
  0xa5   : > { %v770_v48 = vld [vmem:[%s3087_s8 + $0x10c0] sm:$0xff]  ;;  %1426 = vmatpush.msrb.mxu3 %v1162_v47  ;;  %v667_v47 = vld [vmem:[%s3087_s8 + $0xd88] sm:$0xff] }
  0xa6   : > { %v906_v49 = vld [vmem:[%s3087_s8 + $0x1500] sm:$0xff]  ;;  %1367 = vmatpush.msrb.mxu0 %v770_v48  ;;  %v275_v48 = vld [vmem:[%s3087_s8 + $0x148] sm:$0xff] }
  0xa7   : > { %v1018_v50 = vld [vmem:[%s3087_s8 + $0x1880] sm:$0xff]  ;;  %1386 = vmatpush.msrb.mxu1 %v906_v49  ;;  %v411_v49 = vld [vmem:[%s3087_s8 + $0x588] sm:$0xff] }
  0xa8   : > { %v1154_v51 = vld [vmem:[%s3087_s8 + $0x1cc0] sm:$0xff]  ;;  %1408 = vmatpush.msrb.mxu2 %v1018_v50  ;;  %v523_v50 = vld [vmem:[%s3087_s8 + $0x908] sm:$0xff] }
  0xa9   : > { %v762_v52 = vld [vmem:[%s3087_s8 + $0x1080] sm:$0xff]  ;;  %1427 = vmatpush.msrb.mxu3 %v1154_v51  ;;  %v659_v51 = vld [vmem:[%s3087_s8 + $0xd48] sm:$0xff] }
  0xaa   : > { %v898_v53 = vld [vmem:[%s3087_s8 + $0x14c0] sm:$0xff]  ;;  %1368 = vmatpush.msrb.mxu0 %v762_v52  ;;  %v267_v52 = vld [vmem:[%s3087_s8 + $0x108] sm:$0xff] }
  0xab   : > { %v1010_v54 = vld [vmem:[%s3087_s8 + $0x1840] sm:$0xff]  ;;  %1387 = vmatpush.msrb.mxu1 %v898_v53  ;;  %v403_v53 = vld [vmem:[%s3087_s8 + $0x548] sm:$0xff] }
  0xac   : > { %v1146_v55 = vld [vmem:[%s3087_s8 + $0x1c80] sm:$0xff]  ;;  %1409 = vmatpush.msrb.mxu2 %v1010_v54  ;;  %v515_v54 = vld [vmem:[%s3087_s8 + $0x8c8] sm:$0xff] }
  0xad   : > { %v754_v56 = vld [vmem:[%s3087_s8 + $0x1040] sm:$0xff]  ;;  %1428 = vmatpush.msrb.mxu3 %v1146_v55  ;;  %v651_v55 = vld [vmem:[%s3087_s8 + $0xd08] sm:$0xff] }
  0xae   : > { %v890_v57 = vld [vmem:[%s3087_s8 + $0x1480] sm:$0xff]  ;;  %1369 = vmatpush.msrb.mxu0 %v754_v56  ;;  %v259_v56 = vld [vmem:[%s3087_s8 + $0xc8] sm:$0xff] }
  0xaf   : > { %v1002_v58 = vld [vmem:[%s3087_s8 + $0x1800] sm:$0xff]  ;;  %1388 = vmatpush.msrb.mxu1 %v890_v57  ;;  %v395_v57 = vld [vmem:[%s3087_s8 + $0x508] sm:$0xff] }
  0xb0   : > { %v1138_v59 = vld [vmem:[%s3087_s8 + $0x1c40] sm:$0xff]  ;;  %1410 = vmatpush.msrb.mxu2 %v1002_v58  ;;  %v507_v58 = vld [vmem:[%s3087_s8 + $0x888] sm:$0xff] }
  0xb1   : > { %v746_v61 = vld [vmem:[%s3087_s8 + $0x1000] sm:$0xff]  ;;  %1429 = vmatpush.msrb.mxu3 %v1138_v59  ;;  %1411 = vmatmul.f32.vlgmr.msrb.gmra.mxu2 %v3249_v16  ;;  %v643_v59 = vld [vmem:[%s3087_s8 + $0xcc8] sm:$0xff] }
  0xb2   : > { %v882_v63 = vld [vmem:[%s3087_s8 + $0x1440] sm:$0xff]  ;;  %1370 = vmatpush.msrb.mxu0 %v746_v61  ;;  %1475 = vmatpush.msra.mxu2 %v611_v62  ;;  %v251_v61 = vld [vmem:[%s3087_s8 + $0x88] sm:$0xff] }
  0xb3   : > { %v1130_v0 = vld [vmem:[%s3087_s8 + $0x1c00] sm:$0xff]  ;;  %1389 = vmatpush.msrb.mxu1 %v882_v63  ;;  %v387_v62 = vld [vmem:[%s3087_s8 + $0x4c8] sm:$0xff] }
  0xb4   : > { %v3227_v1 = vld [vmem:[#allocation2] sm:$0xff]  ;;  %1430 = vmatpush.msrb.mxu3 %v1130_v0  ;;  %1476 = vmatpush.msra.mxu2 %v603_v4  ;;  %v499_v63 = vld [vmem:[%s3087_s8 + $0x848] sm:$0xff] }
  0xb5   : > { %1291 = vmatmul.f32.vlgmr.msra.gmra.mxu0 %v3227_v1  ;;  %v874_v6 = vld [vmem:[%s3087_s8 + $0x1400] sm:$0xff]  ;;  %1431 = vmatmul.f32.vlgmr.msrb.gmra.mxu3 %v3258_v22  ;;  %v635_v0 = vld [vmem:[%s3087_s8 + $0xc88] sm:$0xff] }
  0xb6   : > { %1435 = vmatpush.msra.mxu0 %v355_v3  ;;  %1495 = vmatpush.msra.mxu3 %v739_v5  ;;  %v3255_v21 = vld [vmem:[#allocation2 + $0x20] sm:$0xff]  ;;  %v243_v3 = vld [vmem:[%s3087_s8 + $0x48] sm:$0xff] }
  0xb7   : > { %1390 = vmatpush.msrb.mxu1 %v874_v6  ;;  %1477 = vmatpush.msra.mxu2 %v595_v9  ;;  %v379_v4 = vld [vmem:[%s3087_s8 + $0x488] sm:$0xff] }
  0xb8   : > { %1436 = vmatpush.msra.mxu0 %v347_v7  ;;  %1496 = vmatpush.msra.mxu3 %v731_v11  ;;  %v491_v5 = vld [vmem:[%s3087_s8 + $0x808] sm:$0xff] }
  0xb9   : > { %1455 = vmatpush.msra.mxu1 %v483_v10  ;;  %1478 = vmatpush.msra.mxu2 %v587_v13  ;;  %v627_v6 = vld [vmem:[%s3087_s8 + $0xc48] sm:$0xff] }
  0xba   : > { %1437 = vmatpush.msra.mxu0 %v339_v12  ;;  %1497 = vmatpush.msra.mxu3 %v723_v15  ;;  %v1123_v7 = vld [vmem:[%s3087_s8 + $0x1bc8] sm:$0xff] }
  0xbb   : > { %1456 = vmatpush.msra.mxu1 %v475_v14  ;;  %1479 = vmatpush.msra.mxu2 %v579_v19  ;;  %v235_v9 = vld [vmem:[%s3087_s8 + $0x8] sm:$0xff] }
  0xbc   : > { %1438 = vmatpush.msra.mxu0 %v331_v17  ;;  %1498 = vmatpush.msra.mxu3 %v715_v20  ;;  %v371_v10 = vld [vmem:[%s3087_s8 + $0x448] sm:$0xff] }
  0xbd   : > { %1457 = vmatpush.msra.mxu1 %v467_v18  ;;  %1371 = vmatmul.f32.vlgmr.msrb.gmra.mxu0 %v3255_v21  ;;  %v619_v11 = vld [vmem:[%s3087_s8 + $0xc08] sm:$0xff] }
  0xbe   : > { %1439 = vmatpush.msra.mxu0 %v323_v23  ;;  %1480 = vmatpush.msra.mxu2 %v571_v25  ;;  %v867_v12 = vld [vmem:[%s3087_s8 + $0x13c8] sm:$0xff] }
  0xbf   : > { %1458 = vmatpush.msra.mxu1 %v459_v24  ;;  %1499 = vmatpush.msra.mxu3 %v707_v26  ;;  %v1115_v13 = vld [vmem:[%s3087_s8 + $0x1b88] sm:$0xff] }
  0xc0   : > { %1391 = vmatmul.f32.vlgmr.msrb.gmra.mxu1 %v3265_v27  ;;  %1440 = vmatpush.msra.mxu0 %v315_v28  ;;  %v1251_v14 = vld [vmem:[%s3087_s8 + $0x1fc8] sm:$0xff] }
  0xc1   : > { %1459 = vmatpush.msra.mxu1 %v451_v29  ;;  %1481 = vmatpush.msra.mxu2 %v563_v30  ;;  %v363_v15 = vld [vmem:[%s3087_s8 + $0x408] sm:$0xff] }
  0xc2   : > { %1500 = vmatpush.msra.mxu3 %v699_v31  ;;  %1441 = vmatpush.msra.mxu0 %v307_v32  ;;  %v859_v17 = vld [vmem:[%s3087_s8 + $0x1388] sm:$0xff] }
  0xc3   : > { %1460 = vmatpush.msra.mxu1 %v443_v33  ;;  %1482 = vmatpush.msra.mxu2 %v555_v34  ;;  %v995_v18 = vld [vmem:[%s3087_s8 + $0x17c8] sm:$0xff] }
  0xc4   : > { %1501 = vmatpush.msra.mxu3 %v691_v35  ;;  %1442 = vmatpush.msra.mxu0 %v299_v36  ;;  %v1107_v19 = vld [vmem:[%s3087_s8 + $0x1b48] sm:$0xff] }
  0xc5   : > { %1461 = vmatpush.msra.mxu1 %v435_v37  ;;  %1483 = vmatpush.msra.mxu2 %v547_v38  ;;  %v1243_v20 = vld [vmem:[%s3087_s8 + $0x1f88] sm:$0xff] }
  0xc6   : > { %1502 = vmatpush.msra.mxu3 %v683_v39  ;;  %1443 = vmatpush.msra.mxu0 %v291_v40  ;;  %v851_v23 = vld [vmem:[%s3087_s8 + $0x1348] sm:$0xff] }
  0xc7   : > { %1462 = vmatpush.msra.mxu1 %v427_v41  ;;  %1484 = vmatpush.msra.mxu2 %v539_v42  ;;  %v987_v24 = vld [vmem:[%s3087_s8 + $0x1788] sm:$0xff] }
  0xc8   : > { %1503 = vmatpush.msra.mxu3 %v675_v43  ;;  %1444 = vmatpush.msra.mxu0 %v283_v44  ;;  %v1099_v25 = vld [vmem:[%s3087_s8 + $0x1b08] sm:$0xff] }
  0xc9   : > { %1463 = vmatpush.msra.mxu1 %v419_v45  ;;  %1485 = vmatpush.msra.mxu2 %v531_v46  ;;  %v1235_v26 = vld [vmem:[%s3087_s8 + $0x1f48] sm:$0xff] }
  0xca   : > { %1504 = vmatpush.msra.mxu3 %v667_v47  ;;  %1445 = vmatpush.msra.mxu0 %v275_v48  ;;  %v843_v28 = vld [vmem:[%s3087_s8 + $0x1308] sm:$0xff] }
  0xcb   : > { %1464 = vmatpush.msra.mxu1 %v411_v49  ;;  %1486 = vmatpush.msra.mxu2 %v523_v50  ;;  %v979_v29 = vld [vmem:[%s3087_s8 + $0x1748] sm:$0xff] }
  0xcc   : > { %1505 = vmatpush.msra.mxu3 %v659_v51  ;;  %1446 = vmatpush.msra.mxu0 %v267_v52  ;;  %v1091_v30 = vld [vmem:[%s3087_s8 + $0x1ac8] sm:$0xff] }
  0xcd   : > { %1465 = vmatpush.msra.mxu1 %v403_v53  ;;  %1487 = vmatpush.msra.mxu2 %v515_v54  ;;  %v1227_v31 = vld [vmem:[%s3087_s8 + $0x1f08] sm:$0xff] }
  0xce   : > { %1506 = vmatpush.msra.mxu3 %v651_v55  ;;  %1447 = vmatpush.msra.mxu0 %v259_v56  ;;  %v835_v32 = vld [vmem:[%s3087_s8 + $0x12c8] sm:$0xff] }
  0xcf   : > { %1466 = vmatpush.msra.mxu1 %v395_v57  ;;  %1488 = vmatpush.msra.mxu2 %v507_v58  ;;  %v971_v33 = vld [vmem:[%s3087_s8 + $0x1708] sm:$0xff] }
  0xd0   : > { %1507 = vmatpush.msra.mxu3 %v643_v59  ;;  %1448 = vmatpush.msra.mxu0 %v251_v61  ;;  %v1083_v34 = vld [vmem:[%s3087_s8 + $0x1a88] sm:$0xff] }
  0xd1   : > { %1467 = vmatpush.msra.mxu1 %v387_v62  ;;  %1489 = vmatpush.msra.mxu2 %v499_v63  ;;  %v1219_v35 = vld [vmem:[%s3087_s8 + $0x1ec8] sm:$0xff] }
  0xd2   : > { %1508 = vmatpush.msra.mxu3 %v635_v0  ;;  %1449 = vmatpush.msra.mxu0 %v243_v3  ;;  %v827_v36 = vld [vmem:[%s3087_s8 + $0x1288] sm:$0xff] }
  0xd3   : > { %1468 = vmatpush.msra.mxu1 %v379_v4  ;;  %1490 = vmatpush.msra.mxu2 %v491_v5  ;;  %v963_v37 = vld [vmem:[%s3087_s8 + $0x16c8] sm:$0xff] }
  0xd4   : > { %1509 = vmatpush.msra.mxu3 %v627_v6  ;;  %1450 = vmatpush.msra.mxu0 %v235_v9  ;;  %v1075_v38 = vld [vmem:[%s3087_s8 + $0x1a48] sm:$0xff] }
  0xd5   : > { %1555 = vmatpush.msrb.mxu2 %v1123_v7  ;;  %1469 = vmatpush.msra.mxu1 %v371_v10  ;;  %v1211_v39 = vld [vmem:[%s3087_s8 + $0x1e88] sm:$0xff] }
  0xd6   : > { %1510 = vmatpush.msra.mxu3 %v619_v11  ;;  %1515 = vmatpush.msrb.mxu0 %v867_v12  ;;  %v819_v40 = vld [vmem:[%s3087_s8 + $0x1248] sm:$0xff] }
  0xd7   : > { %1556 = vmatpush.msrb.mxu2 %v1115_v13  ;;  %1470 = vmatpush.msra.mxu1 %v363_v15  ;;  %v955_v41 = vld [vmem:[%s3087_s8 + $0x1688] sm:$0xff] }
  0xd8   : > { %1575 = vmatpush.msrb.mxu3 %v1251_v14  ;;  %1516 = vmatpush.msrb.mxu0 %v859_v17  ;;  %v1067_v42 = vld [vmem:[%s3087_s8 + $0x1a08] sm:$0xff] }
  0xd9   : > { %1535 = vmatpush.msrb.mxu1 %v995_v18  ;;  %1557 = vmatpush.msrb.mxu2 %v1107_v19  ;;  %v1203_v43 = vld [vmem:[%s3087_s8 + $0x1e48] sm:$0xff]  ;;  %v612_v18 = vld [vmem:[%s3087_s8 + $0xbd0] sm:$0xff] }
  0xda   : > { %1576 = vmatpush.msrb.mxu3 %v1243_v20  ;;  %1517 = vmatpush.msrb.mxu0 %v851_v23  ;;  %v811_v44 = vld [vmem:[%s3087_s8 + $0x1208] sm:$0xff]  ;;  %v356_v23 = vld [vmem:[%s3087_s8 + $0x3d0] sm:$0xff] }
  0xdb   : > { %1536 = vmatpush.msrb.mxu1 %v987_v24  ;;  %1558 = vmatpush.msrb.mxu2 %v1099_v25  ;;  %v947_v45 = vld [vmem:[%s3087_s8 + $0x1648] sm:$0xff]  ;;  %v604_v24 = vld [vmem:[%s3087_s8 + $0xb90] sm:$0xff] }
  0xdc   : > { %1577 = vmatpush.msrb.mxu3 %v1235_v26  ;;  %1518 = vmatpush.msrb.mxu0 %v843_v28  ;;  %v1059_v46 = vld [vmem:[%s3087_s8 + $0x19c8] sm:$0xff]  ;;  %v740_v25 = vld [vmem:[%s3087_s8 + $0xfd0] sm:$0xff] }
  0xdd   : > { %1537 = vmatpush.msrb.mxu1 %v979_v29  ;;  %1559 = vmatpush.msrb.mxu2 %v1091_v30  ;;  %v1195_v47 = vld [vmem:[%s3087_s8 + $0x1e08] sm:$0xff]  ;;  %v348_v28 = vld [vmem:[%s3087_s8 + $0x390] sm:$0xff] }
  0xde   : > { %1578 = vmatpush.msrb.mxu3 %v1227_v31  ;;  %1519 = vmatpush.msrb.mxu0 %v835_v32  ;;  %v803_v48 = vld [vmem:[%s3087_s8 + $0x11c8] sm:$0xff]  ;;  %v484_v29 = vld [vmem:[%s3087_s8 + $0x7d0] sm:$0xff] }
  0xdf   : > { %1538 = vmatpush.msrb.mxu1 %v971_v33  ;;  %1560 = vmatpush.msrb.mxu2 %v1083_v34  ;;  %v939_v49 = vld [vmem:[%s3087_s8 + $0x1608] sm:$0xff]  ;;  %v732_v30 = vld [vmem:[%s3087_s8 + $0xf90] sm:$0xff] }
  0xe0   : > { %1579 = vmatpush.msrb.mxu3 %v1219_v35  ;;  %1520 = vmatpush.msrb.mxu0 %v827_v36  ;;  %v1051_v50 = vld [vmem:[%s3087_s8 + $0x1988] sm:$0xff]  ;;  %v340_v31 = vld [vmem:[%s3087_s8 + $0x350] sm:$0xff] }
  0xe1   : > { %1539 = vmatpush.msrb.mxu1 %v963_v37  ;;  %1561 = vmatpush.msrb.mxu2 %v1075_v38  ;;  %v1187_v51 = vld [vmem:[%s3087_s8 + $0x1dc8] sm:$0xff]  ;;  %v476_v32 = vld [vmem:[%s3087_s8 + $0x790] sm:$0xff] }
  0xe2   : > { %1580 = vmatpush.msrb.mxu3 %v1211_v39  ;;  %1521 = vmatpush.msrb.mxu0 %v819_v40  ;;  %v795_v52 = vld [vmem:[%s3087_s8 + $0x1188] sm:$0xff]  ;;  %v332_v33 = vld [vmem:[%s3087_s8 + $0x310] sm:$0xff] }
  0xe3   : > { %1540 = vmatpush.msrb.mxu1 %v955_v41  ;;  %1562 = vmatpush.msrb.mxu2 %v1067_v42  ;;  %v931_v53 = vld [vmem:[%s3087_s8 + $0x15c8] sm:$0xff]  ;;  %v468_v34 = vld [vmem:[%s3087_s8 + $0x750] sm:$0xff] }
  0xe4   : > { %1581 = vmatpush.msrb.mxu3 %v1203_v43  ;;  %1522 = vmatpush.msrb.mxu0 %v811_v44  ;;  %v1043_v54 = vld [vmem:[%s3087_s8 + $0x1948] sm:$0xff]  ;;  %v580_v35 = vld [vmem:[%s3087_s8 + $0xad0] sm:$0xff] }
  0xe5   : > { %1541 = vmatpush.msrb.mxu1 %v947_v45  ;;  %1563 = vmatpush.msrb.mxu2 %v1059_v46  ;;  %v1179_v55 = vld [vmem:[%s3087_s8 + $0x1d88] sm:$0xff]  ;;  %v716_v36 = vld [vmem:[%s3087_s8 + $0xf10] sm:$0xff] }
  0xe6   : > { %1582 = vmatpush.msrb.mxu3 %v1195_v47  ;;  %1523 = vmatpush.msrb.mxu0 %v803_v48  ;;  %v787_v56 = vld [vmem:[%s3087_s8 + $0x1148] sm:$0xff]  ;;  %v460_v37 = vld [vmem:[%s3087_s8 + $0x710] sm:$0xff] }
  0xe7   : > { %1542 = vmatpush.msrb.mxu1 %v939_v49  ;;  %1564 = vmatpush.msrb.mxu2 %v1051_v50  ;;  %v923_v57 = vld [vmem:[%s3087_s8 + $0x1588] sm:$0xff]  ;;  %v572_v38 = vld [vmem:[%s3087_s8 + $0xa90] sm:$0xff] }
  0xe8   : > { %1583 = vmatpush.msrb.mxu3 %v1187_v51  ;;  %1524 = vmatpush.msrb.mxu0 %v795_v52  ;;  %v1035_v58 = vld [vmem:[%s3087_s8 + $0x1908] sm:$0xff]  ;;  %v708_v39 = vld [vmem:[%s3087_s8 + $0xed0] sm:$0xff] }
  0xe9   : > { %1543 = vmatpush.msrb.mxu1 %v931_v53  ;;  %v1171_v59 = vld [vmem:[%s3087_s8 + $0x1d48] sm:$0xff]  ;;  %1565 = vmatpush.msrb.mxu2 %v1043_v54  ;;  %v452_v40 = vld [vmem:[%s3087_s8 + $0x6d0] sm:$0xff] }
  0xea   : > { %1584 = vmatpush.msrb.mxu3 %v1179_v55  ;;  %v779_v61 = vld [vmem:[%s3087_s8 + $0x1108] sm:$0xff]  ;;  %1525 = vmatpush.msrb.mxu0 %v787_v56  ;;  %v564_v41 = vld [vmem:[%s3087_s8 + $0xa50] sm:$0xff] }
  0xeb   : > { %v915_v62 = vld [vmem:[%s3087_s8 + $0x1548] sm:$0xff]  ;;  %1544 = vmatpush.msrb.mxu1 %v923_v57  ;;  %1566 = vmatpush.msrb.mxu2 %v1035_v58  ;;  %v700_v42 = vld [vmem:[%s3087_s8 + $0xe90] sm:$0xff] }
  0xec   : > { %v1027_v63 = vld [vmem:[%s3087_s8 + $0x18c8] sm:$0xff]  ;;  %1585 = vmatpush.msrb.mxu3 %v1171_v59  ;;  %1526 = vmatpush.msrb.mxu0 %v779_v61  ;;  %v444_v43 = vld [vmem:[%s3087_s8 + $0x690] sm:$0xff] }
  0xed   : > { %v1163_v0 = vld [vmem:[%s3087_s8 + $0x1d08] sm:$0xff]  ;;  %1545 = vmatpush.msrb.mxu1 %v915_v62  ;;  %1567 = vmatpush.msrb.mxu2 %v1027_v63  ;;  %v692_v44 = vld [vmem:[%s3087_s8 + $0xe50] sm:$0xff] }
  0xee   : > { %v771_v3 = vld [vmem:[%s3087_s8 + $0x10c8] sm:$0xff]  ;;  %1586 = vmatpush.msrb.mxu3 %v1163_v0  ;;  %1491 = vmatmul.f32.vlgmr.msra.gmra.mxu2 %v3221_v60  ;;  %v596_v60 = vld [vmem:[%s3087_s8 + $0xb50] sm:$0xff] }
  0xef   : > { %v907_v4 = vld [vmem:[%s3087_s8 + $0x1508] sm:$0xff]  ;;  %1527 = vmatpush.msrb.mxu0 %v771_v3  ;;  %1511 = vmatmul.f32.vlgmr.msra.gmra.mxu3 %v3230_v2  ;;  %v724_v2 = vld [vmem:[%s3087_s8 + $0xf50] sm:$0xff] }
  0xf0   : > { %v1019_v5 = vld [vmem:[%s3087_s8 + $0x1888] sm:$0xff]  ;;  %1546 = vmatpush.msrb.mxu1 %v907_v4  ;;  %1451 = vmatmul.f32.vlgmr.msra.gmra.mxu0 %v3227_v1  ;;  %v588_v1 = vld [vmem:[%s3087_s8 + $0xb10] sm:$0xff] }
  0xf1   : > { %v1155_v6 = vld [vmem:[%s3087_s8 + $0x1cc8] sm:$0xff]  ;;  %1568 = vmatpush.msrb.mxu2 %v1019_v5  ;;  %1471 = vmatmul.f32.vlgmr.msra.gmra.mxu1 %v3239_v8  ;;  %v324_v8 = vld [vmem:[%s3087_s8 + $0x2d0] sm:$0xff] }
  0xf2   : > { %v763_v7 = vld [vmem:[%s3087_s8 + $0x1088] sm:$0xff]  ;;  %1587 = vmatpush.msrb.mxu3 %v1155_v6  ;;  %v300_v45 = vld [vmem:[%s3087_s8 + $0x210] sm:$0xff] }
  0xf3   : > { %v899_v9 = vld [vmem:[%s3087_s8 + $0x14c8] sm:$0xff]  ;;  %1528 = vmatpush.msrb.mxu0 %v763_v7  ;;  %v436_v46 = vld [vmem:[%s3087_s8 + $0x650] sm:$0xff] }
  0xf4   : > { %v1011_v10 = vld [vmem:[%s3087_s8 + $0x1848] sm:$0xff]  ;;  %1547 = vmatpush.msrb.mxu1 %v899_v9  ;;  %v548_v47 = vld [vmem:[%s3087_s8 + $0x9d0] sm:$0xff] }
  0xf5   : > { %v1147_v11 = vld [vmem:[%s3087_s8 + $0x1c88] sm:$0xff]  ;;  %1569 = vmatpush.msrb.mxu2 %v1011_v10  ;;  %v292_v48 = vld [vmem:[%s3087_s8 + $0x1d0] sm:$0xff] }
  0xf6   : > { %v755_v12 = vld [vmem:[%s3087_s8 + $0x1048] sm:$0xff]  ;;  %1588 = vmatpush.msrb.mxu3 %v1147_v11  ;;  %v428_v49 = vld [vmem:[%s3087_s8 + $0x610] sm:$0xff] }
  0xf7   : > { %v891_v13 = vld [vmem:[%s3087_s8 + $0x1488] sm:$0xff]  ;;  %1529 = vmatpush.msrb.mxu0 %v755_v12  ;;  %v540_v50 = vld [vmem:[%s3087_s8 + $0x990] sm:$0xff] }
  0xf8   : > { %v1003_v14 = vld [vmem:[%s3087_s8 + $0x1808] sm:$0xff]  ;;  %1548 = vmatpush.msrb.mxu1 %v891_v13  ;;  %v676_v51 = vld [vmem:[%s3087_s8 + $0xdd0] sm:$0xff] }
  0xf9   : > { %v1139_v15 = vld [vmem:[%s3087_s8 + $0x1c48] sm:$0xff]  ;;  %1570 = vmatpush.msrb.mxu2 %v1003_v14  ;;  %v284_v52 = vld [vmem:[%s3087_s8 + $0x190] sm:$0xff] }
  0xfa   : > { %v747_v17 = vld [vmem:[%s3087_s8 + $0x1008] sm:$0xff]  ;;  %1589 = vmatpush.msrb.mxu3 %v1139_v15  ;;  %1571 = vmatmul.f32.vlgmr.msrb.gmra.mxu2 %v3249_v16  ;;  %v316_v16 = vld [vmem:[%s3087_s8 + $0x290] sm:$0xff] }
  0xfb   : > { %v883_v19 = vld [vmem:[%s3087_s8 + $0x1448] sm:$0xff]  ;;  %1530 = vmatpush.msrb.mxu0 %v747_v17  ;;  %1635 = vmatpush.msra.mxu2 %v612_v18  ;;  %v420_v53 = vld [vmem:[%s3087_s8 + $0x5d0] sm:$0xff] }
  0xfc   : > { %v1131_v20 = vld [vmem:[%s3087_s8 + $0x1c08] sm:$0xff]  ;;  %1549 = vmatpush.msrb.mxu1 %v883_v19  ;;  %1531 = vmatmul.f32.vlgmr.msrb.gmra.mxu0 %v3255_v21  ;;  %v308_v21 = vld [vmem:[%s3087_s8 + $0x250] sm:$0xff] }
  0xfd   : > { %1590 = vmatpush.msrb.mxu3 %v1131_v20  ;;  %v875_v26 = vld [vmem:[%s3087_s8 + $0x1408] sm:$0xff]  ;;  %1595 = vmatpush.msra.mxu0 %v356_v23  ;;  %v532_v54 = vld [vmem:[%s3087_s8 + $0x950] sm:$0xff] }
  0xfe   : > { %1636 = vmatpush.msra.mxu2 %v604_v24  ;;  %1550 = vmatpush.msrb.mxu1 %v875_v26  ;;  %v668_v55 = vld [vmem:[%s3087_s8 + $0xd90] sm:$0xff] }
  0xff   : > { %1655 = vmatpush.msra.mxu3 %v740_v25  ;;  %1596 = vmatpush.msra.mxu0 %v348_v28  ;;  %v276_v56 = vld [vmem:[%s3087_s8 + $0x150] sm:$0xff] }
 0x100   : > { %1637 = vmatpush.msra.mxu2 %v596_v60  ;;  %1615 = vmatpush.msra.mxu1 %v484_v29  ;;  %v412_v57 = vld [vmem:[%s3087_s8 + $0x590] sm:$0xff] }
 0x101   : > { %1656 = vmatpush.msra.mxu3 %v732_v30  ;;  %1597 = vmatpush.msra.mxu0 %v340_v31  ;;  %v524_v58 = vld [vmem:[%s3087_s8 + $0x910] sm:$0xff] }
 0x102   : > { %1638 = vmatpush.msra.mxu2 %v588_v1  ;;  %1616 = vmatpush.msra.mxu1 %v476_v32  ;;  %v660_v59 = vld [vmem:[%s3087_s8 + $0xd50] sm:$0xff] }
 0x103   : > { %1657 = vmatpush.msra.mxu3 %v724_v2  ;;  %1598 = vmatpush.msra.mxu0 %v332_v33  ;;  %v268_v61 = vld [vmem:[%s3087_s8 + $0x110] sm:$0xff] }
 0x104   : > { %1617 = vmatpush.msra.mxu1 %v468_v34  ;;  %1639 = vmatpush.msra.mxu2 %v580_v35  ;;  %v404_v62 = vld [vmem:[%s3087_s8 + $0x550] sm:$0xff] }
 0x105   : > { %1658 = vmatpush.msra.mxu3 %v716_v36  ;;  %1599 = vmatpush.msra.mxu0 %v324_v8  ;;  %v516_v63 = vld [vmem:[%s3087_s8 + $0x8d0] sm:$0xff] }
 0x106   : > { %1591 = vmatmul.f32.vlgmr.msrb.gmra.mxu3 %v3258_v22  ;;  %1618 = vmatpush.msra.mxu1 %v460_v37  ;;  %v556_v22 = vld [vmem:[%s3087_s8 + $0xa10] sm:$0xff] }
 0x107   : > { %1640 = vmatpush.msra.mxu2 %v572_v38  ;;  %1659 = vmatpush.msra.mxu3 %v708_v39  ;;  %v652_v0 = vld [vmem:[%s3087_s8 + $0xd10] sm:$0xff] }
 0x108   : > { %1551 = vmatmul.f32.vlgmr.msrb.gmra.mxu1 %v3265_v27  ;;  %1600 = vmatpush.msra.mxu0 %v316_v16  ;;  %v684_v27 = vld [vmem:[%s3087_s8 + $0xe10] sm:$0xff] }
 0x109   : > { %1619 = vmatpush.msra.mxu1 %v452_v40  ;;  %1641 = vmatpush.msra.mxu2 %v564_v41  ;;  %v260_v3 = vld [vmem:[%s3087_s8 + $0xd0] sm:$0xff] }
 0x10a   : > { %1660 = vmatpush.msra.mxu3 %v700_v42  ;;  %1601 = vmatpush.msra.mxu0 %v308_v21  ;;  %v396_v4 = vld [vmem:[%s3087_s8 + $0x510] sm:$0xff] }
 0x10b   : > { %1620 = vmatpush.msra.mxu1 %v444_v43  ;;  %1642 = vmatpush.msra.mxu2 %v556_v22  ;;  %v508_v5 = vld [vmem:[%s3087_s8 + $0x890] sm:$0xff] }
 0x10c   : > { %1661 = vmatpush.msra.mxu3 %v692_v44  ;;  %1602 = vmatpush.msra.mxu0 %v300_v45  ;;  %v644_v6 = vld [vmem:[%s3087_s8 + $0xcd0] sm:$0xff] }
 0x10d   : > { %1621 = vmatpush.msra.mxu1 %v436_v46  ;;  %1643 = vmatpush.msra.mxu2 %v548_v47  ;;  %v252_v7 = vld [vmem:[%s3087_s8 + $0x90] sm:$0xff] }
 0x10e   : > { %1662 = vmatpush.msra.mxu3 %v684_v27  ;;  %1603 = vmatpush.msra.mxu0 %v292_v48  ;;  %v388_v9 = vld [vmem:[%s3087_s8 + $0x4d0] sm:$0xff] }
 0x10f   : > { %1622 = vmatpush.msra.mxu1 %v428_v49  ;;  %1644 = vmatpush.msra.mxu2 %v540_v50  ;;  %v500_v10 = vld [vmem:[%s3087_s8 + $0x850] sm:$0xff] }
 0x110   : > { %1663 = vmatpush.msra.mxu3 %v676_v51  ;;  %1604 = vmatpush.msra.mxu0 %v284_v52  ;;  %v636_v11 = vld [vmem:[%s3087_s8 + $0xc90] sm:$0xff] }
 0x111   : > { %1623 = vmatpush.msra.mxu1 %v420_v53  ;;  %1645 = vmatpush.msra.mxu2 %v532_v54  ;;  %v244_v12 = vld [vmem:[%s3087_s8 + $0x50] sm:$0xff]  ;;  %v3491_v54 = vld [vmem:[%s3488_s5] sm:$0xff] }
 0x112   : > { %1664 = vmatpush.msra.mxu3 %v668_v55  ;;  %1605 = vmatpush.msra.mxu0 %v276_v56  ;;  %v380_v13 = vld [vmem:[%s3087_s8 + $0x490] sm:$0xff] }
 0x113   : > { %1624 = vmatpush.msra.mxu1 %v412_v57  ;;  %1646 = vmatpush.msra.mxu2 %v524_v58  ;;  %v492_v14 = vld [vmem:[%s3087_s8 + $0x810] sm:$0xff] }
 0x114   : > { %1665 = vmatpush.msra.mxu3 %v660_v59  ;;  %1606 = vmatpush.msra.mxu0 %v268_v61  ;;  %v628_v15 = vld [vmem:[%s3087_s8 + $0xc50] sm:$0xff] }
 0x115   : > { %1625 = vmatpush.msra.mxu1 %v404_v62  ;;  %1647 = vmatpush.msra.mxu2 %v516_v63  ;;  %v1124_v17 = vld [vmem:[%s3087_s8 + $0x1bd0] sm:$0xff]  ;;  %v1259_v62 = vperm.slane %v3491_v54, 0 }
 0x116   : > { %1666 = vmatpush.msra.mxu3 %v652_v0  ;;  %1607 = vmatpush.msra.mxu0 %v260_v3  ;;  %v236_v18 = vld [vmem:[%s3087_s8 + $0x10] sm:$0xff] }
 0x117   : > { %1626 = vmatpush.msra.mxu1 %v396_v4  ;;  %1648 = vmatpush.msra.mxu2 %v508_v5  ;;  %v372_v19 = vld [vmem:[%s3087_s8 + $0x450] sm:$0xff] }
 0x118   : > { %1667 = vmatpush.msra.mxu3 %v644_v6  ;;  %1608 = vmatpush.msra.mxu0 %v252_v7  ;;  %v620_v20 = vld [vmem:[%s3087_s8 + $0xc10] sm:$0xff] }
 0x119   : > { %1627 = vmatpush.msra.mxu1 %v388_v9  ;;  %1649 = vmatpush.msra.mxu2 %v500_v10  ;;  %v868_v23 = vld [vmem:[%s3087_s8 + $0x13d0] sm:$0xff] }
 0x11a   : > { %1668 = vmatpush.msra.mxu3 %v636_v11  ;;  %1609 = vmatpush.msra.mxu0 %v244_v12  ;;  %v1116_v24 = vld [vmem:[%s3087_s8 + $0x1b90] sm:$0xff] }
 0x11b   : > { %1628 = vmatpush.msra.mxu1 %v380_v13  ;;  %1650 = vmatpush.msra.mxu2 %v492_v14  ;;  %v1252_v25 = vld [vmem:[%s3087_s8 + $0x1fd0] sm:$0xff] }
 0x11c   : > { %1669 = vmatpush.msra.mxu3 %v628_v15  ;;  %1610 = vmatpush.msra.mxu0 %v236_v18  ;;  %v364_v26 = vld [vmem:[%s3087_s8 + $0x410] sm:$0xff] }
 0x11d   : > { %1715 = vmatpush.msrb.mxu2 %v1124_v17  ;;  %1629 = vmatpush.msra.mxu1 %v372_v19  ;;  %v860_v28 = vld [vmem:[%s3087_s8 + $0x1390] sm:$0xff]  ;;  %v1312_v19 = vpop.f32.mrf.mxu1 }
 0x11e   : > { %1670 = vmatpush.msra.mxu3 %v620_v20  ;;  %v996_v60 = vld [vmem:[%s3087_s8 + $0x17d0] sm:$0xff]  ;;  %1675 = vmatpush.msrb.mxu0 %v868_v23  ;;  %v1332_v20 = vpop.f32.mrf.mxu2 }
 0x11f   : > { %1716 = vmatpush.msrb.mxu2 %v1116_v24  ;;  %v1108_v29 = vld [vmem:[%s3087_s8 + $0x1b50] sm:$0xff]  ;;  %1630 = vmatpush.msra.mxu1 %v364_v26 }
 0x120   : > { %v1244_v30 = vld [vmem:[%s3087_s8 + $0x1f90] sm:$0xff]  ;;  %1735 = vmatpush.msrb.mxu3 %v1252_v25  ;;  %1676 = vmatpush.msrb.mxu0 %v860_v28  ;;  %v613_v28 = vld [vmem:[%s3087_s8 + $0xbd8] sm:$0xff] }
 0x121   : > { %v852_v31 = vld [vmem:[%s3087_s8 + $0x1350] sm:$0xff]  ;;  %1695 = vmatpush.msrb.mxu1 %v996_v60  ;;  %1717 = vmatpush.msrb.mxu2 %v1108_v29 }
 0x122   : > { %v988_v1 = vld [vmem:[%s3087_s8 + $0x1790] sm:$0xff]  ;;  %1736 = vmatpush.msrb.mxu3 %v1244_v30  ;;  %1677 = vmatpush.msrb.mxu0 %v852_v31  ;;  %v1352_v30 = vpop.f32.mrf.mxu3 }
 0x123   : > { %v1100_v32 = vld [vmem:[%s3087_s8 + $0x1b10] sm:$0xff]  ;;  %1696 = vmatpush.msrb.mxu1 %v988_v1 }
 0x124   : > { %v1236_v2 = vld [vmem:[%s3087_s8 + $0x1f50] sm:$0xff]  ;;  %1718 = vmatpush.msrb.mxu2 %v1100_v32  ;;  %v357_v32 = vld [vmem:[%s3087_s8 + $0x3d8] sm:$0xff] }
 0x125   : > { %v844_v33 = vld [vmem:[%s3087_s8 + $0x1310] sm:$0xff]  ;;  %1737 = vmatpush.msrb.mxu3 %v1236_v2 }
 0x126   : > { %v980_v34 = vld [vmem:[%s3087_s8 + $0x1750] sm:$0xff]  ;;  %1678 = vmatpush.msrb.mxu0 %v844_v33  ;;  %v605_v33 = vld [vmem:[%s3087_s8 + $0xb98] sm:$0xff] }
 0x127   : > { %v1092_v35 = vld [vmem:[%s3087_s8 + $0x1ad0] sm:$0xff]  ;;  %1697 = vmatpush.msrb.mxu1 %v980_v34  ;;  %v741_v34 = vld [vmem:[%s3087_s8 + $0xfd8] sm:$0xff] }
 0x128   : > { %v1228_v36 = vld [vmem:[%s3087_s8 + $0x1f10] sm:$0xff]  ;;  %1719 = vmatpush.msrb.mxu2 %v1092_v35 }
 0x129   : > { %v836_v8 = vld [vmem:[%s3087_s8 + $0x12d0] sm:$0xff]  ;;  %1738 = vmatpush.msrb.mxu3 %v1228_v36  ;;  %v3526_v36 = vld [vmem:[#allocation2] sm:$0xff] }
 0x12a   : > { %v972_v37 = vld [vmem:[%s3087_s8 + $0x1710] sm:$0xff]  ;;  %1679 = vmatpush.msrb.mxu0 %v836_v8 }
 0x12b   : > { %v1084_v38 = vld [vmem:[%s3087_s8 + $0x1a90] sm:$0xff]  ;;  %1698 = vmatpush.msrb.mxu1 %v972_v37  ;;  %1611 = vmatmul.f32.vlgmr.msra.gmra.mxu0 %v3526_v36  ;;  %v349_v37 = vld [vmem:[%s3087_s8 + $0x398] sm:$0xff] }
 0x12c   : > { %v1220_v39 = vld [vmem:[%s3087_s8 + $0x1ed0] sm:$0xff]  ;;  %1720 = vmatpush.msrb.mxu2 %v1084_v38 }
 0x12d   : > { %v828_v16 = vld [vmem:[%s3087_s8 + $0x1290] sm:$0xff]  ;;  %1739 = vmatpush.msrb.mxu3 %v1220_v39  ;;  %v3531_v39 = vld [vmem:[#allocation2 + $0x18] sm:$0xff] }
 0x12e   : > { %v964_v40 = vld [vmem:[%s3087_s8 + $0x16d0] sm:$0xff]  ;;  %1680 = vmatpush.msrb.mxu0 %v828_v16  ;;  %1671 = vmatmul.f32.vlgmr.msra.gmra.mxu3 %v3531_v39  ;;  %v597_v16 = vld [vmem:[%s3087_s8 + $0xb58] sm:$0xff] }
 0x12f   : > { %v1076_v41 = vld [vmem:[%s3087_s8 + $0x1a50] sm:$0xff]  ;;  %1699 = vmatpush.msrb.mxu1 %v964_v40  ;;  %v485_v40 = vld [vmem:[%s3087_s8 + $0x7d8] sm:$0xff] }
 0x130   : > { %v1212_v42 = vld [vmem:[%s3087_s8 + $0x1e90] sm:$0xff]  ;;  %1721 = vmatpush.msrb.mxu2 %v1076_v41  ;;  %v733_v41 = vld [vmem:[%s3087_s8 + $0xf98] sm:$0xff] }
 0x131   : > { %v820_v21 = vld [vmem:[%s3087_s8 + $0x1250] sm:$0xff]  ;;  %1740 = vmatpush.msrb.mxu3 %v1212_v42 }
 0x132   : > { %v956_v43 = vld [vmem:[%s3087_s8 + $0x1690] sm:$0xff]  ;;  %1681 = vmatpush.msrb.mxu0 %v820_v21  ;;  %v1292_v7 = vpop.f32.mrf.mxu0  ;;  %v341_v21 = vld [vmem:[%s3087_s8 + $0x358] sm:$0xff] }
 0x133   : > { %v1068_v22 = vld [vmem:[%s3087_s8 + $0x1a10] sm:$0xff]  ;;  %1700 = vmatpush.msrb.mxu1 %v956_v43  ;;  %v1293_v11 = vadd.f32 %v1292_v7, %v1259_v62  ;;  %v589_v43 = vld [vmem:[%s3087_s8 + $0xb18] sm:$0xff] }
 0x134   : > { %v1204_v44 = vld [vmem:[%s3087_s8 + $0x1e50] sm:$0xff]  ;;  %1722 = vmatpush.msrb.mxu2 %v1068_v22  ;;  %v3562_v62 = vld [vmem:[#allocation2 + $0x38] sm:$0xff] }
 0x135   : > { %v812_v45 = vld [vmem:[%s3087_s8 + $0x1210] sm:$0xff]  ;;  %1741 = vmatpush.msrb.mxu3 %v1204_v44  ;;  %v1313_v25 = vadd.f32 %v1312_v19, %v1293_v11  ;;  %v1412_v44 = vpop.f32.mrf.mxu2  ;;  %v445_v7 = vld [vmem:[%s3087_s8 + $0x698] sm:$0xff] }
 0x136   : > { %v948_v46 = vld [vmem:[%s3087_s8 + $0x1650] sm:$0xff]  ;;  %1682 = vmatpush.msrb.mxu0 %v812_v45  ;;  %v3540_v45 = vld [vmem:[#allocation2 + $0x8] sm:$0xff]  ;;  %v301_v11 = vld [vmem:[%s3087_s8 + $0x218] sm:$0xff] }
 0x137   : > { %v1060_v47 = vld [vmem:[%s3087_s8 + $0x19d0] sm:$0xff]  ;;  %1701 = vmatpush.msrb.mxu1 %v948_v46  ;;  %v1333_v29 = vadd.f32 %v1332_v20, %v1313_v25  ;;  %v477_v46 = vld [vmem:[%s3087_s8 + $0x798] sm:$0xff] }
 0x138   : > { %v1196_v27 = vld [vmem:[%s3087_s8 + $0x1e10] sm:$0xff]  ;;  %1723 = vmatpush.msrb.mxu2 %v1060_v47  ;;  %1631 = vmatmul.f32.vlgmr.msra.gmra.mxu1 %v3540_v45  ;;  %v725_v47 = vld [vmem:[%s3087_s8 + $0xf58] sm:$0xff] }
 0x139   : > { %v804_v48 = vld [vmem:[%s3087_s8 + $0x11d0] sm:$0xff]  ;;  %1742 = vmatpush.msrb.mxu3 %v1196_v27  ;;  %v1353_v2 = vadd.f32 %v1352_v30, %v1333_v29  ;;  %v333_v27 = vld [vmem:[%s3087_s8 + $0x318] sm:$0xff] }
 0x13a   : > { %v940_v49 = vld [vmem:[%s3087_s8 + $0x1610] sm:$0xff]  ;;  %1683 = vmatpush.msrb.mxu0 %v804_v48  ;;  %v1372_v35 = vpop.f32.mrf.mxu0  ;;  %v677_v19 = vld [vmem:[%s3087_s8 + $0xdd8] sm:$0xff] }
 0x13b   : > { %v1052_v50 = vld [vmem:[%s3087_s8 + $0x1990] sm:$0xff]  ;;  %1702 = vmatpush.msrb.mxu1 %v940_v49  ;;  %v1373_v38 = vadd.f32 %v1372_v35, %v1353_v2  ;;  %v469_v49 = vld [vmem:[%s3087_s8 + $0x758] sm:$0xff] }
 0x13c   : > { %v1188_v51 = vld [vmem:[%s3087_s8 + $0x1dd0] sm:$0xff]  ;;  %1724 = vmatpush.msrb.mxu2 %v1052_v50  ;;  %v581_v50 = vld [vmem:[%s3087_s8 + $0xad8] sm:$0xff] }
 0x13d   : > { %v796_v52 = vld [vmem:[%s3087_s8 + $0x1190] sm:$0xff]  ;;  %1743 = vmatpush.msrb.mxu3 %v1188_v51  ;;  %v1392_v42 = vpop.f32.mrf.mxu1  ;;  %v1432_v51 = vpop.f32.mrf.mxu3  ;;  %v285_v20 = vld [vmem:[%s3087_s8 + $0x198] sm:$0xff] }
 0x13e   : > { %v932_v53 = vld [vmem:[%s3087_s8 + $0x15d0] sm:$0xff]  ;;  %1684 = vmatpush.msrb.mxu0 %v796_v52  ;;  %v1393_v22 = vadd.f32 %v1392_v42, %v1373_v38  ;;  %v717_v52 = vld [vmem:[%s3087_s8 + $0xf18] sm:$0xff] }
 0x13f   : > { %v1044_v55 = vld [vmem:[%s3087_s8 + $0x1950] sm:$0xff]  ;;  %1703 = vmatpush.msrb.mxu1 %v932_v53  ;;  %v669_v25 = vld [vmem:[%s3087_s8 + $0xd98] sm:$0xff] }
 0x140   : > { %v1180_v56 = vld [vmem:[%s3087_s8 + $0x1d90] sm:$0xff]  ;;  %1725 = vmatpush.msrb.mxu2 %v1044_v55  ;;  %v1413_v48 = vadd.f32 %v1412_v44, %v1393_v22  ;;  %v661_v29 = vld [vmem:[%s3087_s8 + $0xd58] sm:$0xff] }
 0x141   : > { %v788_v57 = vld [vmem:[%s3087_s8 + $0x1150] sm:$0xff]  ;;  %1744 = vmatpush.msrb.mxu3 %v1180_v56  ;;  %v325_v56 = vld [vmem:[%s3087_s8 + $0x2d8] sm:$0xff] }
 0x142   : > { %v924_v58 = vld [vmem:[%s3087_s8 + $0x1590] sm:$0xff]  ;;  %1685 = vmatpush.msrb.mxu0 %v788_v57  ;;  %v1433_v53 = vadd.f32 %v1432_v51, %v1413_v48  ;;  %v461_v57 = vld [vmem:[%s3087_s8 + $0x718] sm:$0xff] }
 0x143   : > { %v1036_v59 = vld [vmem:[%s3087_s8 + $0x1910] sm:$0xff]  ;;  %1704 = vmatpush.msrb.mxu1 %v924_v58  ;;  %v573_v58 = vld [vmem:[%s3087_s8 + $0xa98] sm:$0xff] }
 0x144   : > { %v1172_v61 = vld [vmem:[%s3087_s8 + $0x1d50] sm:$0xff]  ;;  %1726 = vmatpush.msrb.mxu2 %v1036_v59  ;;  %2555 = vst [vmem:[%s3555_s4] sm:$0xff] %v1433_v53  ;;  %v3558_v59 = vld [vmem:[#allocation2 + $0x20] sm:$0xff]  ;;  %v269_v30 = vld [vmem:[%s3087_s8 + $0x118] sm:$0xff] }
 0x145   : > { %v780_v63 = vld [vmem:[%s3087_s8 + $0x1110] sm:$0xff]  ;;  %1745 = vmatpush.msrb.mxu3 %v1172_v61  ;;  %v709_v61 = vld [vmem:[%s3087_s8 + $0xed8] sm:$0xff] }
 0x146   : > { %v916_v0 = vld [vmem:[%s3087_s8 + $0x1550] sm:$0xff]  ;;  %1686 = vmatpush.msrb.mxu0 %v780_v63  ;;  %v317_v63 = vld [vmem:[%s3087_s8 + $0x298] sm:$0xff] }
 0x147   : > { %v1028_v3 = vld [vmem:[%s3087_s8 + $0x18d0] sm:$0xff]  ;;  %1705 = vmatpush.msrb.mxu1 %v916_v0  ;;  %v453_v0 = vld [vmem:[%s3087_s8 + $0x6d8] sm:$0xff] }
 0x148   : > { %v1164_v4 = vld [vmem:[%s3087_s8 + $0x1d10] sm:$0xff]  ;;  %1727 = vmatpush.msrb.mxu2 %v1028_v3  ;;  %v565_v3 = vld [vmem:[%s3087_s8 + $0xa58] sm:$0xff] }
 0x149   : > { %v772_v5 = vld [vmem:[%s3087_s8 + $0x10d0] sm:$0xff]  ;;  %1746 = vmatpush.msrb.mxu3 %v1164_v4  ;;  %v701_v4 = vld [vmem:[%s3087_s8 + $0xe98] sm:$0xff] }
 0x14a   : > { %v908_v6 = vld [vmem:[%s3087_s8 + $0x1510] sm:$0xff]  ;;  %1687 = vmatpush.msrb.mxu0 %v772_v5  ;;  %v3569_v5 = vld [vmem:[#allocation2 + $0x28] sm:$0xff]  ;;  %v653_v2 = vld [vmem:[%s3087_s8 + $0xd18] sm:$0xff] }
 0x14b   : > { %v1020_v9 = vld [vmem:[%s3087_s8 + $0x1890] sm:$0xff]  ;;  %1706 = vmatpush.msrb.mxu1 %v908_v6  ;;  %v309_v6 = vld [vmem:[%s3087_s8 + $0x258] sm:$0xff] }
 0x14c   : > { %v1156_v10 = vld [vmem:[%s3087_s8 + $0x1cd0] sm:$0xff]  ;;  %1728 = vmatpush.msrb.mxu2 %v1020_v9  ;;  %v557_v9 = vld [vmem:[%s3087_s8 + $0xa18] sm:$0xff] }
 0x14d   : > { %v764_v12 = vld [vmem:[%s3087_s8 + $0x1090] sm:$0xff]  ;;  %1747 = vmatpush.msrb.mxu3 %v1156_v10  ;;  %v693_v10 = vld [vmem:[%s3087_s8 + $0xe58] sm:$0xff] }
 0x14e   : > { %v900_v13 = vld [vmem:[%s3087_s8 + $0x14d0] sm:$0xff]  ;;  %1688 = vmatpush.msrb.mxu0 %v764_v12  ;;  %v437_v12 = vld [vmem:[%s3087_s8 + $0x658] sm:$0xff] }
 0x14f   : > { %v1012_v14 = vld [vmem:[%s3087_s8 + $0x1850] sm:$0xff]  ;;  %1707 = vmatpush.msrb.mxu1 %v900_v13  ;;  %v549_v13 = vld [vmem:[%s3087_s8 + $0x9d8] sm:$0xff] }
 0x150   : > { %v1148_v15 = vld [vmem:[%s3087_s8 + $0x1c90] sm:$0xff]  ;;  %1729 = vmatpush.msrb.mxu2 %v1012_v14  ;;  %v685_v14 = vld [vmem:[%s3087_s8 + $0xe18] sm:$0xff] }
 0x151   : > { %v756_v17 = vld [vmem:[%s3087_s8 + $0x1050] sm:$0xff]  ;;  %1748 = vmatpush.msrb.mxu3 %v1148_v15  ;;  %v293_v15 = vld [vmem:[%s3087_s8 + $0x1d8] sm:$0xff] }
 0x152   : > { %v892_v18 = vld [vmem:[%s3087_s8 + $0x1490] sm:$0xff]  ;;  %1689 = vmatpush.msrb.mxu0 %v756_v17  ;;  %v429_v17 = vld [vmem:[%s3087_s8 + $0x618] sm:$0xff] }
 0x153   : > { %v1004_v23 = vld [vmem:[%s3087_s8 + $0x1810] sm:$0xff]  ;;  %1708 = vmatpush.msrb.mxu1 %v892_v18  ;;  %v541_v18 = vld [vmem:[%s3087_s8 + $0x998] sm:$0xff] }
 0x154   : > { %v1140_v24 = vld [vmem:[%s3087_s8 + $0x1c50] sm:$0xff]  ;;  %1730 = vmatpush.msrb.mxu2 %v1004_v23  ;;  %v421_v23 = vld [vmem:[%s3087_s8 + $0x5d8] sm:$0xff] }
 0x155   : > { %v748_v26 = vld [vmem:[%s3087_s8 + $0x1010] sm:$0xff]  ;;  %1749 = vmatpush.msrb.mxu3 %v1140_v24  ;;  %v533_v24 = vld [vmem:[%s3087_s8 + $0x958] sm:$0xff] }
 0x156   : > { %v884_v60 = vld [vmem:[%s3087_s8 + $0x1450] sm:$0xff]  ;;  %1690 = vmatpush.msrb.mxu0 %v748_v26  ;;  %v277_v26 = vld [vmem:[%s3087_s8 + $0x158] sm:$0xff] }
 0x157   : > { %v1132_v31 = vld [vmem:[%s3087_s8 + $0x1c10] sm:$0xff]  ;;  %1709 = vmatpush.msrb.mxu1 %v884_v60  ;;  %1691 = vmatmul.f32.vlgmr.msrb.gmra.mxu0 %v3558_v59  ;;  %v525_v60 = vld [vmem:[%s3087_s8 + $0x918] sm:$0xff] }
 0x158   : > { %v3520_v1 = vld [vmem:[#allocation2 + $0x10] sm:$0xff]  ;;  %1750 = vmatpush.msrb.mxu3 %v1132_v31  ;;  %1755 = vmatpush.msra.mxu0 %v357_v32  ;;  %v405_v31 = vld [vmem:[%s3087_s8 + $0x558] sm:$0xff] }
 0x159   : > { %1651 = vmatmul.f32.vlgmr.msra.gmra.mxu2 %v3520_v1  ;;  %v876_v8 = vld [vmem:[%s3087_s8 + $0x1410] sm:$0xff]  ;;  %1751 = vmatmul.f32.vlgmr.msrb.gmra.mxu3 %v3562_v62  ;;  %v517_v32 = vld [vmem:[%s3087_s8 + $0x8d8] sm:$0xff] }
 0x15a   : > { %1795 = vmatpush.msra.mxu2 %v613_v28  ;;  %1815 = vmatpush.msra.mxu3 %v741_v34  ;;  %v3549_v55 = vld [vmem:[#allocation2 + $0x30] sm:$0xff]  ;;  %v413_v28 = vld [vmem:[%s3087_s8 + $0x598] sm:$0xff] }
 0x15b   : > { %1710 = vmatpush.msrb.mxu1 %v876_v8  ;;  %1756 = vmatpush.msra.mxu0 %v349_v37  ;;  %v397_v34 = vld [vmem:[%s3087_s8 + $0x518] sm:$0xff] }
 0x15c   : > { %1796 = vmatpush.msra.mxu2 %v605_v33  ;;  %1816 = vmatpush.msra.mxu3 %v733_v41  ;;  %v261_v33 = vld [vmem:[%s3087_s8 + $0xd8] sm:$0xff] }
 0x15d   : > { %1775 = vmatpush.msra.mxu1 %v485_v40  ;;  %1757 = vmatpush.msra.mxu0 %v341_v21  ;;  %v509_v35 = vld [vmem:[%s3087_s8 + $0x898] sm:$0xff] }
 0x15e   : > { %1797 = vmatpush.msra.mxu2 %v597_v16  ;;  %1817 = vmatpush.msra.mxu3 %v725_v47  ;;  %v645_v8 = vld [vmem:[%s3087_s8 + $0xcd8] sm:$0xff] }
 0x15f   : > { %1776 = vmatpush.msra.mxu1 %v477_v46  ;;  %1758 = vmatpush.msra.mxu0 %v333_v27  ;;  %v253_v37 = vld [vmem:[%s3087_s8 + $0x98] sm:$0xff] }
 0x160   : > { %1798 = vmatpush.msra.mxu2 %v589_v43  ;;  %1818 = vmatpush.msra.mxu3 %v717_v52  ;;  %v389_v38 = vld [vmem:[%s3087_s8 + $0x4d8] sm:$0xff] }
 0x161   : > { %1731 = vmatmul.f32.vlgmr.msrb.gmra.mxu2 %v3549_v55  ;;  %1777 = vmatpush.msra.mxu1 %v469_v49  ;;  %v501_v16 = vld [vmem:[%s3087_s8 + $0x858] sm:$0xff] }
 0x162   : > { %1799 = vmatpush.msra.mxu2 %v581_v50  ;;  %1759 = vmatpush.msra.mxu0 %v325_v56  ;;  %v637_v40 = vld [vmem:[%s3087_s8 + $0xc98] sm:$0xff] }
 0x163   : > { %1778 = vmatpush.msra.mxu1 %v461_v57  ;;  %1819 = vmatpush.msra.mxu3 %v709_v61  ;;  %v245_v41 = vld [vmem:[%s3087_s8 + $0x58] sm:$0xff] }
 0x164   : > { %1800 = vmatpush.msra.mxu2 %v573_v58  ;;  %1711 = vmatmul.f32.vlgmr.msrb.gmra.mxu1 %v3569_v5  ;;  %v381_v42 = vld [vmem:[%s3087_s8 + $0x498] sm:$0xff] }
 0x165   : > { %1760 = vmatpush.msra.mxu0 %v317_v63  ;;  %1779 = vmatpush.msra.mxu1 %v453_v0  ;;  %v493_v21 = vld [vmem:[%s3087_s8 + $0x818] sm:$0xff] }
 0x166   : > { %1801 = vmatpush.msra.mxu2 %v565_v3  ;;  %1820 = vmatpush.msra.mxu3 %v701_v4  ;;  %v629_v43 = vld [vmem:[%s3087_s8 + $0xc58] sm:$0xff] }
 0x167   : > { %1761 = vmatpush.msra.mxu0 %v309_v6  ;;  %1780 = vmatpush.msra.mxu1 %v445_v7  ;;  %v1125_v22 = vld [vmem:[%s3087_s8 + $0x1bd8] sm:$0xff] }
 0x168   : > { %1802 = vmatpush.msra.mxu2 %v557_v9  ;;  %1821 = vmatpush.msra.mxu3 %v693_v10  ;;  %v237_v44 = vld [vmem:[%s3087_s8 + $0x18] sm:$0xff] }
 0x169   : > { %1762 = vmatpush.msra.mxu0 %v301_v11  ;;  %1781 = vmatpush.msra.mxu1 %v437_v12  ;;  %v373_v46 = vld [vmem:[%s3087_s8 + $0x458] sm:$0xff] }
 0x16a   : > { %1803 = vmatpush.msra.mxu2 %v549_v13  ;;  %1822 = vmatpush.msra.mxu3 %v685_v14  ;;  %v621_v47 = vld [vmem:[%s3087_s8 + $0xc18] sm:$0xff] }
 0x16b   : > { %1763 = vmatpush.msra.mxu0 %v293_v15  ;;  %1782 = vmatpush.msra.mxu1 %v429_v17  ;;  %v869_v27 = vld [vmem:[%s3087_s8 + $0x13d8] sm:$0xff] }
 0x16c   : > { %1804 = vmatpush.msra.mxu2 %v541_v18  ;;  %1823 = vmatpush.msra.mxu3 %v677_v19  ;;  %v1117_v48 = vld [vmem:[%s3087_s8 + $0x1b98] sm:$0xff] }
 0x16d   : > { %1764 = vmatpush.msra.mxu0 %v285_v20  ;;  %1783 = vmatpush.msra.mxu1 %v421_v23  ;;  %v1253_v49 = vld [vmem:[%s3087_s8 + $0x1fd8] sm:$0xff] }
 0x16e   : > { %1805 = vmatpush.msra.mxu2 %v533_v24  ;;  %1824 = vmatpush.msra.mxu3 %v669_v25  ;;  %v365_v50 = vld [vmem:[%s3087_s8 + $0x418] sm:$0xff] }
 0x16f   : > { %1765 = vmatpush.msra.mxu0 %v277_v26  ;;  %1784 = vmatpush.msra.mxu1 %v413_v28  ;;  %v861_v51 = vld [vmem:[%s3087_s8 + $0x1398] sm:$0xff] }
 0x170   : > { %1806 = vmatpush.msra.mxu2 %v525_v60  ;;  %1825 = vmatpush.msra.mxu3 %v661_v29  ;;  %v997_v52 = vld [vmem:[%s3087_s8 + $0x17d8] sm:$0xff] }
 0x171   : > { %1766 = vmatpush.msra.mxu0 %v269_v30  ;;  %1785 = vmatpush.msra.mxu1 %v405_v31  ;;  %v1109_v53 = vld [vmem:[%s3087_s8 + $0x1b58] sm:$0xff] }
 0x172   : > { %1807 = vmatpush.msra.mxu2 %v517_v32  ;;  %1826 = vmatpush.msra.mxu3 %v653_v2  ;;  %v1245_v56 = vld [vmem:[%s3087_s8 + $0x1f98] sm:$0xff] }
 0x173   : > { %1767 = vmatpush.msra.mxu0 %v261_v33  ;;  %1786 = vmatpush.msra.mxu1 %v397_v34  ;;  %v853_v57 = vld [vmem:[%s3087_s8 + $0x1358] sm:$0xff] }
 0x174   : > { %1808 = vmatpush.msra.mxu2 %v509_v35  ;;  %1827 = vmatpush.msra.mxu3 %v645_v8  ;;  %v989_v58 = vld [vmem:[%s3087_s8 + $0x1798] sm:$0xff] }
 0x175   : > { %1768 = vmatpush.msra.mxu0 %v253_v37  ;;  %1787 = vmatpush.msra.mxu1 %v389_v38  ;;  %v1101_v61 = vld [vmem:[%s3087_s8 + $0x1b18] sm:$0xff]  ;;  %v1260_v38 = vperm.slane %v3491_v54, 1 }
 0x176   : > { %1809 = vmatpush.msra.mxu2 %v501_v16  ;;  %1828 = vmatpush.msra.mxu3 %v637_v40  ;;  %v1237_v63 = vld [vmem:[%s3087_s8 + $0x1f58] sm:$0xff] }
 0x177   : > { %1769 = vmatpush.msra.mxu0 %v245_v41  ;;  %1788 = vmatpush.msra.mxu1 %v381_v42  ;;  %v845_v0 = vld [vmem:[%s3087_s8 + $0x1318] sm:$0xff] }
 0x178   : > { %1810 = vmatpush.msra.mxu2 %v493_v21  ;;  %1829 = vmatpush.msra.mxu3 %v629_v43  ;;  %v981_v3 = vld [vmem:[%s3087_s8 + $0x1758] sm:$0xff] }
 0x179   : > { %1770 = vmatpush.msra.mxu0 %v237_v44  ;;  %1789 = vmatpush.msra.mxu1 %v373_v46  ;;  %v1093_v4 = vld [vmem:[%s3087_s8 + $0x1ad8] sm:$0xff] }
 0x17a   : > { %1875 = vmatpush.msrb.mxu2 %v1125_v22  ;;  %1830 = vmatpush.msra.mxu3 %v621_v47  ;;  %v1229_v6 = vld [vmem:[%s3087_s8 + $0x1f18] sm:$0xff]  ;;  %v1452_v22 = vpop.f32.mrf.mxu0 }
 0x17b   : > { %1835 = vmatpush.msrb.mxu0 %v869_v27  ;;  %1790 = vmatpush.msra.mxu1 %v365_v50  ;;  %v837_v7 = vld [vmem:[%s3087_s8 + $0x12d8] sm:$0xff]  ;;  %v1453_v46 = vadd.f32 %v1452_v22, %v1260_v38  ;;  %v446_v38 = vld [vmem:[%s3087_s8 + $0x6a0] sm:$0xff] }
 0x17c   : > { %1876 = vmatpush.msrb.mxu2 %v1117_v48  ;;  %1895 = vmatpush.msrb.mxu3 %v1253_v49  ;;  %v973_v9 = vld [vmem:[%s3087_s8 + $0x1718] sm:$0xff]  ;;  %v542_v22 = vld [vmem:[%s3087_s8 + $0x9a0] sm:$0xff] }
 0x17d   : > { %1836 = vmatpush.msrb.mxu0 %v861_v51  ;;  %1855 = vmatpush.msrb.mxu1 %v997_v52  ;;  %v1085_v10 = vld [vmem:[%s3087_s8 + $0x1a98] sm:$0xff]  ;;  %v1472_v52 = vpop.f32.mrf.mxu1 }
 0x17e   : > { %1877 = vmatpush.msrb.mxu2 %v1109_v53  ;;  %1896 = vmatpush.msrb.mxu3 %v1245_v56  ;;  %v1221_v11 = vld [vmem:[%s3087_s8 + $0x1ed8] sm:$0xff]  ;;  %v1492_v53 = vpop.f32.mrf.mxu2 }
 0x17f   : > { %1837 = vmatpush.msrb.mxu0 %v853_v57  ;;  %1856 = vmatpush.msrb.mxu1 %v989_v58  ;;  %v829_v12 = vld [vmem:[%s3087_s8 + $0x1298] sm:$0xff]  ;;  %v1473_v58 = vadd.f32 %v1472_v52, %v1453_v46  ;;  %v422_v46 = vld [vmem:[%s3087_s8 + $0x5e0] sm:$0xff] }
 0x180   : > { %1878 = vmatpush.msrb.mxu2 %v1101_v61  ;;  %1897 = vmatpush.msrb.mxu3 %v1237_v63  ;;  %v965_v13 = vld [vmem:[%s3087_s8 + $0x16d8] sm:$0xff]  ;;  %v614_v63 = vld [vmem:[%s3087_s8 + $0xbe0] sm:$0xff] }
 0x181   : > { %1838 = vmatpush.msrb.mxu0 %v845_v0  ;;  %1857 = vmatpush.msrb.mxu1 %v981_v3  ;;  %v1077_v14 = vld [vmem:[%s3087_s8 + $0x1a58] sm:$0xff]  ;;  %v1493_v3 = vadd.f32 %v1492_v53, %v1473_v58  ;;  %v270_v52 = vld [vmem:[%s3087_s8 + $0x120] sm:$0xff] }
 0x182   : > { %1879 = vmatpush.msrb.mxu2 %v1093_v4  ;;  %1898 = vmatpush.msrb.mxu3 %v1229_v6  ;;  %v1213_v15 = vld [vmem:[%s3087_s8 + $0x1e98] sm:$0xff]  ;;  %v1512_v4 = vpop.f32.mrf.mxu3  ;;  %v406_v53 = vld [vmem:[%s3087_s8 + $0x560] sm:$0xff] }
 0x183   : > { %1839 = vmatpush.msrb.mxu0 %v837_v7  ;;  %1858 = vmatpush.msrb.mxu1 %v973_v9  ;;  %v821_v17 = vld [vmem:[%s3087_s8 + $0x1258] sm:$0xff]  ;;  %v358_v7 = vld [vmem:[%s3087_s8 + $0x3e0] sm:$0xff]  ;;  %v1513_v9 = vadd.f32 %v1512_v4, %v1493_v3 }
 0x184   : > { %1880 = vmatpush.msrb.mxu2 %v1085_v10  ;;  %1899 = vmatpush.msrb.mxu3 %v1221_v11  ;;  %v957_v18 = vld [vmem:[%s3087_s8 + $0x1698] sm:$0xff]  ;;  %v606_v10 = vld [vmem:[%s3087_s8 + $0xba0] sm:$0xff] }
 0x185   : > { %1840 = vmatpush.msrb.mxu0 %v829_v12  ;;  %1859 = vmatpush.msrb.mxu1 %v965_v13  ;;  %v1069_v19 = vld [vmem:[%s3087_s8 + $0x1a18] sm:$0xff]  ;;  %v742_v11 = vld [vmem:[%s3087_s8 + $0xfe0] sm:$0xff]  ;;  %v1532_v12 = vpop.f32.mrf.mxu0 }
 0x186   : > { %v1205_v20 = vld [vmem:[%s3087_s8 + $0x1e58] sm:$0xff]  ;;  %1881 = vmatpush.msrb.mxu2 %v1077_v14  ;;  %1900 = vmatpush.msrb.mxu3 %v1213_v15  ;;  %v350_v14 = vld [vmem:[%s3087_s8 + $0x3a0] sm:$0xff]  ;;  %v1533_v15 = vadd.f32 %v1532_v12, %v1513_v9 }
 0x187   : > { %v813_v23 = vld [vmem:[%s3087_s8 + $0x1218] sm:$0xff]  ;;  %1841 = vmatpush.msrb.mxu0 %v821_v17  ;;  %1860 = vmatpush.msrb.mxu1 %v957_v18  ;;  %v486_v17 = vld [vmem:[%s3087_s8 + $0x7e0] sm:$0xff] }
 0x188   : > { %v949_v24 = vld [vmem:[%s3087_s8 + $0x1658] sm:$0xff]  ;;  %1882 = vmatpush.msrb.mxu2 %v1069_v19  ;;  %1901 = vmatpush.msrb.mxu3 %v1205_v20  ;;  %v734_v18 = vld [vmem:[%s3087_s8 + $0xfa0] sm:$0xff]  ;;  %v1552_v19 = vpop.f32.mrf.mxu1 }
 0x189   : > { %v1061_v25 = vld [vmem:[%s3087_s8 + $0x19d8] sm:$0xff]  ;;  %1842 = vmatpush.msrb.mxu0 %v813_v23  ;;  %1861 = vmatpush.msrb.mxu1 %v949_v24  ;;  %v590_v20 = vld [vmem:[%s3087_s8 + $0xb20] sm:$0xff]  ;;  %v1553_v23 = vadd.f32 %v1552_v19, %v1533_v15  ;;  %v1572_v24 = vpop.f32.mrf.mxu2 }
 0x18a   : > { %v1197_v26 = vld [vmem:[%s3087_s8 + $0x1e18] sm:$0xff]  ;;  %1883 = vmatpush.msrb.mxu2 %v1061_v25  ;;  %1771 = vmatmul.f32.vlgmr.msra.gmra.mxu0 %v3526_v36  ;;  %v342_v36 = vld [vmem:[%s3087_s8 + $0x360] sm:$0xff] }
 0x18b   : > { %v805_v28 = vld [vmem:[%s3087_s8 + $0x11d8] sm:$0xff]  ;;  %1902 = vmatpush.msrb.mxu3 %v1197_v26  ;;  %1811 = vmatmul.f32.vlgmr.msra.gmra.mxu2 %v3520_v1  ;;  %v598_v1 = vld [vmem:[%s3087_s8 + $0xb60] sm:$0xff] }
 0x18c   : > { %v941_v60 = vld [vmem:[%s3087_s8 + $0x1618] sm:$0xff]  ;;  %1843 = vmatpush.msrb.mxu0 %v805_v28  ;;  %1831 = vmatmul.f32.vlgmr.msra.gmra.mxu3 %v3531_v39  ;;  %v478_v39 = vld [vmem:[%s3087_s8 + $0x7a0] sm:$0xff]  ;;  %v1573_v28 = vadd.f32 %v1572_v24, %v1553_v23 }
 0x18d   : > { %v1053_v29 = vld [vmem:[%s3087_s8 + $0x1998] sm:$0xff]  ;;  %1862 = vmatpush.msrb.mxu1 %v941_v60  ;;  %v726_v25 = vld [vmem:[%s3087_s8 + $0xf60] sm:$0xff] }
 0x18e   : > { %v1189_v30 = vld [vmem:[%s3087_s8 + $0x1dd8] sm:$0xff]  ;;  %1884 = vmatpush.msrb.mxu2 %v1053_v29  ;;  %1791 = vmatmul.f32.vlgmr.msra.gmra.mxu1 %v3540_v45  ;;  %v334_v26 = vld [vmem:[%s3087_s8 + $0x320] sm:$0xff] }
 0x18f   : > { %v797_v31 = vld [vmem:[%s3087_s8 + $0x1198] sm:$0xff]  ;;  %1903 = vmatpush.msrb.mxu3 %v1189_v30  ;;  %v470_v60 = vld [vmem:[%s3087_s8 + $0x760] sm:$0xff]  ;;  %v1592_v30 = vpop.f32.mrf.mxu3 }
 0x190   : > { %v933_v32 = vld [vmem:[%s3087_s8 + $0x15d8] sm:$0xff]  ;;  %1844 = vmatpush.msrb.mxu0 %v797_v31  ;;  %v582_v29 = vld [vmem:[%s3087_s8 + $0xae0] sm:$0xff]  ;;  %v1593_v31 = vadd.f32 %v1592_v30, %v1573_v28 }
 0x191   : > { %v1045_v2 = vld [vmem:[%s3087_s8 + $0x1958] sm:$0xff]  ;;  %1863 = vmatpush.msrb.mxu1 %v933_v32  ;;  %v718_v45 = vld [vmem:[%s3087_s8 + $0xf20] sm:$0xff] }
 0x192   : > { %v1181_v33 = vld [vmem:[%s3087_s8 + $0x1d98] sm:$0xff]  ;;  %1885 = vmatpush.msrb.mxu2 %v1045_v2  ;;  %v326_v32 = vld [vmem:[%s3087_s8 + $0x2e0] sm:$0xff]  ;;  %2556 = vst [vmem:[%s3555_s4 + $0x8] sm:$0xff] %v1593_v31 }
 0x193   : > { %v789_v34 = vld [vmem:[%s3087_s8 + $0x1158] sm:$0xff]  ;;  %1904 = vmatpush.msrb.mxu3 %v1181_v33  ;;  %v462_v2 = vld [vmem:[%s3087_s8 + $0x720] sm:$0xff] }
 0x194   : > { %v925_v35 = vld [vmem:[%s3087_s8 + $0x1598] sm:$0xff]  ;;  %1845 = vmatpush.msrb.mxu0 %v789_v34  ;;  %v574_v33 = vld [vmem:[%s3087_s8 + $0xaa0] sm:$0xff] }
 0x195   : > { %v1037_v8 = vld [vmem:[%s3087_s8 + $0x1918] sm:$0xff]  ;;  %1864 = vmatpush.msrb.mxu1 %v925_v35  ;;  %v710_v34 = vld [vmem:[%s3087_s8 + $0xee0] sm:$0xff] }
 0x196   : > { %v1173_v37 = vld [vmem:[%s3087_s8 + $0x1d58] sm:$0xff]  ;;  %1886 = vmatpush.msrb.mxu2 %v1037_v8  ;;  %v454_v35 = vld [vmem:[%s3087_s8 + $0x6e0] sm:$0xff] }
 0x197   : > { %v781_v16 = vld [vmem:[%s3087_s8 + $0x1118] sm:$0xff]  ;;  %1905 = vmatpush.msrb.mxu3 %v1173_v37  ;;  %v566_v8 = vld [vmem:[%s3087_s8 + $0xa60] sm:$0xff] }
 0x198   : > { %v917_v40 = vld [vmem:[%s3087_s8 + $0x1558] sm:$0xff]  ;;  %1846 = vmatpush.msrb.mxu0 %v781_v16  ;;  %v702_v37 = vld [vmem:[%s3087_s8 + $0xea0] sm:$0xff] }
 0x199   : > { %v1029_v41 = vld [vmem:[%s3087_s8 + $0x18d8] sm:$0xff]  ;;  %1865 = vmatpush.msrb.mxu1 %v917_v40  ;;  %v694_v16 = vld [vmem:[%s3087_s8 + $0xe60] sm:$0xff] }
 0x19a   : > { %v1165_v42 = vld [vmem:[%s3087_s8 + $0x1d18] sm:$0xff]  ;;  %1887 = vmatpush.msrb.mxu2 %v1029_v41  ;;  %v302_v40 = vld [vmem:[%s3087_s8 + $0x220] sm:$0xff] }
 0x19b   : > { %v773_v21 = vld [vmem:[%s3087_s8 + $0x10d8] sm:$0xff]  ;;  %1906 = vmatpush.msrb.mxu3 %v1165_v42  ;;  %v438_v41 = vld [vmem:[%s3087_s8 + $0x660] sm:$0xff] }
 0x19c   : > { %v909_v43 = vld [vmem:[%s3087_s8 + $0x1518] sm:$0xff]  ;;  %1847 = vmatpush.msrb.mxu0 %v773_v21  ;;  %v550_v42 = vld [vmem:[%s3087_s8 + $0x9e0] sm:$0xff] }
 0x19d   : > { %v1021_v54 = vld [vmem:[%s3087_s8 + $0x1898] sm:$0xff]  ;;  %1866 = vmatpush.msrb.mxu1 %v909_v43  ;;  %v294_v21 = vld [vmem:[%s3087_s8 + $0x1e0] sm:$0xff] }
 0x19e   : > { %v1157_v44 = vld [vmem:[%s3087_s8 + $0x1cd8] sm:$0xff]  ;;  %1888 = vmatpush.msrb.mxu2 %v1021_v54  ;;  %v430_v43 = vld [vmem:[%s3087_s8 + $0x620] sm:$0xff] }
 0x19f   : > { %v765_v47 = vld [vmem:[%s3087_s8 + $0x1098] sm:$0xff]  ;;  %1907 = vmatpush.msrb.mxu3 %v1157_v44  ;;  %v678_v54 = vld [vmem:[%s3087_s8 + $0xde0] sm:$0xff] }
 0x1a0   : > { %v901_v27 = vld [vmem:[%s3087_s8 + $0x14d8] sm:$0xff]  ;;  %1848 = vmatpush.msrb.mxu0 %v765_v47  ;;  %v286_v44 = vld [vmem:[%s3087_s8 + $0x1a0] sm:$0xff] }
 0x1a1   : > { %v1013_v48 = vld [vmem:[%s3087_s8 + $0x1858] sm:$0xff]  ;;  %1867 = vmatpush.msrb.mxu1 %v901_v27  ;;  %v534_v47 = vld [vmem:[%s3087_s8 + $0x960] sm:$0xff] }
 0x1a2   : > { %v1149_v49 = vld [vmem:[%s3087_s8 + $0x1c98] sm:$0xff]  ;;  %1889 = vmatpush.msrb.mxu2 %v1013_v48  ;;  %v670_v27 = vld [vmem:[%s3087_s8 + $0xda0] sm:$0xff] }
 0x1a3   : > { %v757_v50 = vld [vmem:[%s3087_s8 + $0x1058] sm:$0xff]  ;;  %1908 = vmatpush.msrb.mxu3 %v1149_v49  ;;  %v278_v48 = vld [vmem:[%s3087_s8 + $0x160] sm:$0xff] }
 0x1a4   : > { %v893_v51 = vld [vmem:[%s3087_s8 + $0x1498] sm:$0xff]  ;;  %1849 = vmatpush.msrb.mxu0 %v757_v50  ;;  %v414_v49 = vld [vmem:[%s3087_s8 + $0x5a0] sm:$0xff] }
 0x1a5   : > { %v1005_v56 = vld [vmem:[%s3087_s8 + $0x1818] sm:$0xff]  ;;  %1868 = vmatpush.msrb.mxu1 %v893_v51  ;;  %v526_v50 = vld [vmem:[%s3087_s8 + $0x920] sm:$0xff] }
 0x1a6   : > { %v1141_v57 = vld [vmem:[%s3087_s8 + $0x1c58] sm:$0xff]  ;;  %1890 = vmatpush.msrb.mxu2 %v1005_v56  ;;  %v662_v51 = vld [vmem:[%s3087_s8 + $0xd60] sm:$0xff] }
 0x1a7   : > { %v749_v61 = vld [vmem:[%s3087_s8 + $0x1018] sm:$0xff]  ;;  %1909 = vmatpush.msrb.mxu3 %v1141_v57  ;;  %1891 = vmatmul.f32.vlgmr.msrb.gmra.mxu2 %v3549_v55  ;;  %v318_v55 = vld [vmem:[%s3087_s8 + $0x2a0] sm:$0xff] }
 0x1a8   : > { %v885_v0 = vld [vmem:[%s3087_s8 + $0x1458] sm:$0xff]  ;;  %1850 = vmatpush.msrb.mxu0 %v749_v61  ;;  %1955 = vmatpush.msra.mxu2 %v614_v63  ;;  %v518_v56 = vld [vmem:[%s3087_s8 + $0x8e0] sm:$0xff] }
 0x1a9   : > { %v1133_v6 = vld [vmem:[%s3087_s8 + $0x1c18] sm:$0xff]  ;;  %1869 = vmatpush.msrb.mxu1 %v885_v0  ;;  %1851 = vmatmul.f32.vlgmr.msrb.gmra.mxu0 %v3558_v59  ;;  %v310_v59 = vld [vmem:[%s3087_s8 + $0x260] sm:$0xff] }
 0x1aa   : > { %1910 = vmatpush.msrb.mxu3 %v1133_v6  ;;  %v877_v13 = vld [vmem:[%s3087_s8 + $0x1418] sm:$0xff]  ;;  %1915 = vmatpush.msra.mxu0 %v358_v7  ;;  %v654_v57 = vld [vmem:[%s3087_s8 + $0xd20] sm:$0xff] }
 0x1ab   : > { %1956 = vmatpush.msra.mxu2 %v606_v10  ;;  %1870 = vmatpush.msrb.mxu1 %v877_v13  ;;  %v262_v58 = vld [vmem:[%s3087_s8 + $0xe0] sm:$0xff] }
 0x1ac   : > { %1975 = vmatpush.msra.mxu3 %v742_v11  ;;  %1916 = vmatpush.msra.mxu0 %v350_v14  ;;  %v398_v61 = vld [vmem:[%s3087_s8 + $0x520] sm:$0xff] }
 0x1ad   : > { %1957 = vmatpush.msra.mxu2 %v598_v1  ;;  %1935 = vmatpush.msra.mxu1 %v486_v17  ;;  %v510_v63 = vld [vmem:[%s3087_s8 + $0x8a0] sm:$0xff] }
 0x1ae   : > { %1976 = vmatpush.msra.mxu3 %v734_v18  ;;  %1917 = vmatpush.msra.mxu0 %v342_v36  ;;  %v646_v0 = vld [vmem:[%s3087_s8 + $0xce0] sm:$0xff] }
 0x1af   : > { %1958 = vmatpush.msra.mxu2 %v590_v20  ;;  %1936 = vmatpush.msra.mxu1 %v478_v39  ;;  %v254_v3 = vld [vmem:[%s3087_s8 + $0xa0] sm:$0xff] }
 0x1b0   : > { %1977 = vmatpush.msra.mxu3 %v726_v25  ;;  %1918 = vmatpush.msra.mxu0 %v334_v26  ;;  %v390_v4 = vld [vmem:[%s3087_s8 + $0x4e0] sm:$0xff] }
 0x1b1   : > { %1937 = vmatpush.msra.mxu1 %v470_v60  ;;  %1959 = vmatpush.msra.mxu2 %v582_v29  ;;  %v502_v6 = vld [vmem:[%s3087_s8 + $0x860] sm:$0xff] }
 0x1b2   : > { %1978 = vmatpush.msra.mxu3 %v718_v45  ;;  %1919 = vmatpush.msra.mxu0 %v326_v32  ;;  %v638_v7 = vld [vmem:[%s3087_s8 + $0xca0] sm:$0xff] }
 0x1b3   : > { %1911 = vmatmul.f32.vlgmr.msrb.gmra.mxu3 %v3562_v62  ;;  %1938 = vmatpush.msra.mxu1 %v462_v2  ;;  %v558_v62 = vld [vmem:[%s3087_s8 + $0xa20] sm:$0xff] }
 0x1b4   : > { %1960 = vmatpush.msra.mxu2 %v574_v33  ;;  %1979 = vmatpush.msra.mxu3 %v710_v34  ;;  %v246_v9 = vld [vmem:[%s3087_s8 + $0x60] sm:$0xff] }
 0x1b5   : > { %1871 = vmatmul.f32.vlgmr.msrb.gmra.mxu1 %v3569_v5  ;;  %1920 = vmatpush.msra.mxu0 %v318_v55  ;;  %v686_v5 = vld [vmem:[%s3087_s8 + $0xe20] sm:$0xff] }
 0x1b6   : > { %1939 = vmatpush.msra.mxu1 %v454_v35  ;;  %1961 = vmatpush.msra.mxu2 %v566_v8  ;;  %v382_v10 = vld [vmem:[%s3087_s8 + $0x4a0] sm:$0xff] }
 0x1b7   : > { %1980 = vmatpush.msra.mxu3 %v702_v37  ;;  %1921 = vmatpush.msra.mxu0 %v310_v59  ;;  %v494_v11 = vld [vmem:[%s3087_s8 + $0x820] sm:$0xff] }
 0x1b8   : > { %1940 = vmatpush.msra.mxu1 %v446_v38  ;;  %1962 = vmatpush.msra.mxu2 %v558_v62  ;;  %v630_v12 = vld [vmem:[%s3087_s8 + $0xc60] sm:$0xff] }
 0x1b9   : > { %1981 = vmatpush.msra.mxu3 %v694_v16  ;;  %1922 = vmatpush.msra.mxu0 %v302_v40  ;;  %v1126_v13 = vld [vmem:[%s3087_s8 + $0x1be0] sm:$0xff] }
 0x1ba   : > { %1941 = vmatpush.msra.mxu1 %v438_v41  ;;  %1963 = vmatpush.msra.mxu2 %v550_v42  ;;  %v238_v14 = vld [vmem:[%s3087_s8 + $0x20] sm:$0xff] }
 0x1bb   : > { %1982 = vmatpush.msra.mxu3 %v686_v5  ;;  %1923 = vmatpush.msra.mxu0 %v294_v21  ;;  %v374_v15 = vld [vmem:[%s3087_s8 + $0x460] sm:$0xff] }
 0x1bc   : > { %1942 = vmatpush.msra.mxu1 %v430_v43  ;;  %1964 = vmatpush.msra.mxu2 %v542_v22  ;;  %v622_v1 = vld [vmem:[%s3087_s8 + $0xc20] sm:$0xff] }
 0x1bd   : > { %1983 = vmatpush.msra.mxu3 %v678_v54  ;;  %1924 = vmatpush.msra.mxu0 %v286_v44  ;;  %v870_v17 = vld [vmem:[%s3087_s8 + $0x13e0] sm:$0xff] }
 0x1be   : > { %1943 = vmatpush.msra.mxu1 %v422_v46  ;;  %1965 = vmatpush.msra.mxu2 %v534_v47  ;;  %v1118_v18 = vld [vmem:[%s3087_s8 + $0x1ba0] sm:$0xff] }
 0x1bf   : > { %1984 = vmatpush.msra.mxu3 %v670_v27  ;;  %1925 = vmatpush.msra.mxu0 %v278_v48  ;;  %v1254_v19 = vld [vmem:[%s3087_s8 + $0x1fe0] sm:$0xff] }
 0x1c0   : > { %1944 = vmatpush.msra.mxu1 %v414_v49  ;;  %1966 = vmatpush.msra.mxu2 %v526_v50  ;;  %v366_v36 = vld [vmem:[%s3087_s8 + $0x420] sm:$0xff] }
 0x1c1   : > { %1985 = vmatpush.msra.mxu3 %v662_v51  ;;  %1926 = vmatpush.msra.mxu0 %v270_v52  ;;  %v862_v20 = vld [vmem:[%s3087_s8 + $0x13a0] sm:$0xff] }
 0x1c2   : > { %1945 = vmatpush.msra.mxu1 %v406_v53  ;;  %1967 = vmatpush.msra.mxu2 %v518_v56  ;;  %v998_v23 = vld [vmem:[%s3087_s8 + $0x17e0] sm:$0xff] }
 0x1c3   : > { %1986 = vmatpush.msra.mxu3 %v654_v57  ;;  %1927 = vmatpush.msra.mxu0 %v262_v58  ;;  %v1110_v24 = vld [vmem:[%s3087_s8 + $0x1b60] sm:$0xff] }
 0x1c4   : > { %1946 = vmatpush.msra.mxu1 %v398_v61  ;;  %1968 = vmatpush.msra.mxu2 %v510_v63  ;;  %v1246_v39 = vld [vmem:[%s3087_s8 + $0x1fa0] sm:$0xff] }
 0x1c5   : > { %1987 = vmatpush.msra.mxu3 %v646_v0  ;;  %1928 = vmatpush.msra.mxu0 %v254_v3  ;;  %v854_v25 = vld [vmem:[%s3087_s8 + $0x1360] sm:$0xff]  ;;  %v1612_v3 = vpop.f32.mrf.mxu0 }
 0x1c6   : > { %1947 = vmatpush.msra.mxu1 %v390_v4  ;;  %1969 = vmatpush.msra.mxu2 %v502_v6  ;;  %v990_v26 = vld [vmem:[%s3087_s8 + $0x17a0] sm:$0xff] }
 0x1c7   : > { %1988 = vmatpush.msra.mxu3 %v638_v7  ;;  %1929 = vmatpush.msra.mxu0 %v246_v9  ;;  %v1102_v28 = vld [vmem:[%s3087_s8 + $0x1b20] sm:$0xff] }
 0x1c8   : > { %1948 = vmatpush.msra.mxu1 %v382_v10  ;;  %1970 = vmatpush.msra.mxu2 %v494_v11  ;;  %v1238_v60 = vld [vmem:[%s3087_s8 + $0x1f60] sm:$0xff] }
 0x1c9   : > { %1989 = vmatpush.msra.mxu3 %v630_v12  ;;  %1930 = vmatpush.msra.mxu0 %v238_v14  ;;  %v846_v29 = vld [vmem:[%s3087_s8 + $0x1320] sm:$0xff] }
 0x1ca   : > { %2035 = vmatpush.msrb.mxu2 %v1126_v13  ;;  %1949 = vmatpush.msra.mxu1 %v374_v15  ;;  %v982_v30 = vld [vmem:[%s3087_s8 + $0x1760] sm:$0xff]  ;;  %v1632_v15 = vpop.f32.mrf.mxu1 }
 0x1cb   : > { %1990 = vmatpush.msra.mxu3 %v622_v1  ;;  %1995 = vmatpush.msrb.mxu0 %v870_v17  ;;  %v1094_v45 = vld [vmem:[%s3087_s8 + $0x1ae0] sm:$0xff] }
 0x1cc   : > { %2036 = vmatpush.msrb.mxu2 %v1118_v18  ;;  %1950 = vmatpush.msra.mxu1 %v366_v36  ;;  %v1230_v31 = vld [vmem:[%s3087_s8 + $0x1f20] sm:$0xff] }
 0x1cd   : > { %2055 = vmatpush.msrb.mxu3 %v1254_v19  ;;  %1996 = vmatpush.msrb.mxu0 %v862_v20  ;;  %v838_v32 = vld [vmem:[%s3087_s8 + $0x12e0] sm:$0xff]  ;;  %v615_v20 = vld [vmem:[%s3087_s8 + $0xbe8] sm:$0xff] }
 0x1ce   : > { %2015 = vmatpush.msrb.mxu1 %v998_v23  ;;  %2037 = vmatpush.msrb.mxu2 %v1110_v24  ;;  %v974_v2 = vld [vmem:[%s3087_s8 + $0x1720] sm:$0xff] }
 0x1cf   : > { %2056 = vmatpush.msrb.mxu3 %v1246_v39  ;;  %1997 = vmatpush.msrb.mxu0 %v854_v25  ;;  %v1086_v33 = vld [vmem:[%s3087_s8 + $0x1aa0] sm:$0xff]  ;;  %v1672_v39 = vpop.f32.mrf.mxu3 }
 0x1d0   : > { %2016 = vmatpush.msrb.mxu1 %v990_v26  ;;  %2038 = vmatpush.msrb.mxu2 %v1102_v28  ;;  %v1222_v34 = vld [vmem:[%s3087_s8 + $0x1ee0] sm:$0xff]  ;;  %v3818_v26 = vld [vmem:[#allocation2 + $0x10] sm:$0xff]  ;;  %v359_v28 = vld [vmem:[%s3087_s8 + $0x3e8] sm:$0xff] }
 0x1d1   : > { %2057 = vmatpush.msrb.mxu3 %v1238_v60  ;;  %1998 = vmatpush.msrb.mxu0 %v846_v29  ;;  %v830_v55 = vld [vmem:[%s3087_s8 + $0x12a0] sm:$0xff]  ;;  %v607_v29 = vld [vmem:[%s3087_s8 + $0xba8] sm:$0xff] }
 0x1d2   : > { %2017 = vmatpush.msrb.mxu1 %v982_v30  ;;  %2039 = vmatpush.msrb.mxu2 %v1094_v45  ;;  %v966_v35 = vld [vmem:[%s3087_s8 + $0x16e0] sm:$0xff]  ;;  %v743_v30 = vld [vmem:[%s3087_s8 + $0xfe8] sm:$0xff] }
 0x1d3   : > { %2058 = vmatpush.msrb.mxu3 %v1230_v31  ;;  %1999 = vmatpush.msrb.mxu0 %v838_v32  ;;  %v1078_v8 = vld [vmem:[%s3087_s8 + $0x1a60] sm:$0xff] }
 0x1d4   : > { %2018 = vmatpush.msrb.mxu1 %v974_v2  ;;  %v1214_v37 = vld [vmem:[%s3087_s8 + $0x1ea0] sm:$0xff]  ;;  %2040 = vmatpush.msrb.mxu2 %v1086_v33  ;;  %v1692_v45 = vpop.f32.mrf.mxu0  ;;  %v351_v2 = vld [vmem:[%s3087_s8 + $0x3a8] sm:$0xff] }
 0x1d5   : > { %2059 = vmatpush.msrb.mxu3 %v1222_v34  ;;  %v822_v59 = vld [vmem:[%s3087_s8 + $0x1260] sm:$0xff]  ;;  %2000 = vmatpush.msrb.mxu0 %v830_v55  ;;  %v3829_v34 = vld [vmem:[#allocation2 + $0x18] sm:$0xff]  ;;  %v599_v55 = vld [vmem:[%s3087_s8 + $0xb68] sm:$0xff] }
 0x1d6   : > { %v958_v38 = vld [vmem:[%s3087_s8 + $0x16a0] sm:$0xff]  ;;  %2019 = vmatpush.msrb.mxu1 %v966_v35  ;;  %2041 = vmatpush.msrb.mxu2 %v1078_v8  ;;  %v487_v35 = vld [vmem:[%s3087_s8 + $0x7e8] sm:$0xff] }
 0x1d7   : > { %v1070_v62 = vld [vmem:[%s3087_s8 + $0x1a20] sm:$0xff]  ;;  %2060 = vmatpush.msrb.mxu3 %v1214_v37  ;;  %2001 = vmatpush.msrb.mxu0 %v822_v59  ;;  %v735_v8 = vld [vmem:[%s3087_s8 + $0xfa8] sm:$0xff] }
 0x1d8   : > { %v1206_v16 = vld [vmem:[%s3087_s8 + $0x1e60] sm:$0xff]  ;;  %2020 = vmatpush.msrb.mxu1 %v958_v38  ;;  %2042 = vmatpush.msrb.mxu2 %v1070_v62  ;;  %v343_v59 = vld [vmem:[%s3087_s8 + $0x368] sm:$0xff] }
 0x1d9   : > { %v814_v40 = vld [vmem:[%s3087_s8 + $0x1220] sm:$0xff]  ;;  %2061 = vmatpush.msrb.mxu3 %v1206_v16  ;;  %1971 = vmatmul.f32.vlgmr.msra.gmra.mxu2 %v3818_v26  ;;  %v591_v38 = vld [vmem:[%s3087_s8 + $0xb28] sm:$0xff] }
 0x1da   : > { %v950_v41 = vld [vmem:[%s3087_s8 + $0x1660] sm:$0xff]  ;;  %2002 = vmatpush.msrb.mxu0 %v814_v40  ;;  %1991 = vmatmul.f32.vlgmr.msra.gmra.mxu3 %v3829_v34  ;;  %v3837_v40 = vld [vmem:[#allocation2 + $0x8] sm:$0xff] }
 0x1db   : > { %v1062_v42 = vld [vmem:[%s3087_s8 + $0x19e0] sm:$0xff]  ;;  %2021 = vmatpush.msrb.mxu1 %v950_v41  ;;  %v479_v41 = vld [vmem:[%s3087_s8 + $0x7a8] sm:$0xff] }
 0x1dc   : > { %v1198_v5 = vld [vmem:[%s3087_s8 + $0x1e20] sm:$0xff]  ;;  %2043 = vmatpush.msrb.mxu2 %v1062_v42  ;;  %v1652_v1 = vpop.f32.mrf.mxu2  ;;  %1951 = vmatmul.f32.vlgmr.msra.gmra.mxu1 %v3837_v40  ;;  %v727_v42 = vld [vmem:[%s3087_s8 + $0xf68] sm:$0xff] }
 0x1dd   : > { %v806_v21 = vld [vmem:[%s3087_s8 + $0x11e0] sm:$0xff]  ;;  %2062 = vmatpush.msrb.mxu3 %v1198_v5  ;;  %v335_v5 = vld [vmem:[%s3087_s8 + $0x328] sm:$0xff] }
 0x1de   : > { %v942_v43 = vld [vmem:[%s3087_s8 + $0x1620] sm:$0xff]  ;;  %2003 = vmatpush.msrb.mxu0 %v806_v21 }
 0x1df   : > { %v1054_v22 = vld [vmem:[%s3087_s8 + $0x19a0] sm:$0xff]  ;;  %2022 = vmatpush.msrb.mxu1 %v942_v43  ;;  %v471_v43 = vld [vmem:[%s3087_s8 + $0x768] sm:$0xff] }
 0x1e0   : > { %v1190_v54 = vld [vmem:[%s3087_s8 + $0x1de0] sm:$0xff]  ;;  %2044 = vmatpush.msrb.mxu2 %v1054_v22  ;;  %v583_v22 = vld [vmem:[%s3087_s8 + $0xae8] sm:$0xff] }
 0x1e1   : > { %v798_v44 = vld [vmem:[%s3087_s8 + $0x11a0] sm:$0xff]  ;;  %2063 = vmatpush.msrb.mxu3 %v1190_v54  ;;  %v1712_v37 = vpop.f32.mrf.mxu1  ;;  %v1752_v54 = vpop.f32.mrf.mxu3 }
 0x1e2   : > { %v934_v46 = vld [vmem:[%s3087_s8 + $0x15e0] sm:$0xff]  ;;  %2004 = vmatpush.msrb.mxu0 %v798_v44  ;;  %v719_v44 = vld [vmem:[%s3087_s8 + $0xf28] sm:$0xff] }
 0x1e3   : > { %v1046_v47 = vld [vmem:[%s3087_s8 + $0x1960] sm:$0xff]  ;;  %2023 = vmatpush.msrb.mxu1 %v934_v46 }
 0x1e4   : > { %v1182_v27 = vld [vmem:[%s3087_s8 + $0x1da0] sm:$0xff]  ;;  %2045 = vmatpush.msrb.mxu2 %v1046_v47  ;;  %v1732_v16 = vpop.f32.mrf.mxu2  ;;  %v3846_v47 = vld [vmem:[#allocation2 + $0x30] sm:$0xff] }
 0x1e5   : > { %v790_v48 = vld [vmem:[%s3087_s8 + $0x1160] sm:$0xff]  ;;  %2064 = vmatpush.msrb.mxu3 %v1182_v27  ;;  %v327_v27 = vld [vmem:[%s3087_s8 + $0x2e8] sm:$0xff] }
 0x1e6   : > { %v926_v49 = vld [vmem:[%s3087_s8 + $0x15a0] sm:$0xff]  ;;  %2005 = vmatpush.msrb.mxu0 %v790_v48  ;;  %v463_v48 = vld [vmem:[%s3087_s8 + $0x728] sm:$0xff] }
 0x1e7   : > { %v1038_v50 = vld [vmem:[%s3087_s8 + $0x1920] sm:$0xff]  ;;  %2024 = vmatpush.msrb.mxu1 %v926_v49  ;;  %v575_v49 = vld [vmem:[%s3087_s8 + $0xaa8] sm:$0xff] }
 0x1e8   : > { %v1174_v51 = vld [vmem:[%s3087_s8 + $0x1d60] sm:$0xff]  ;;  %2046 = vmatpush.msrb.mxu2 %v1038_v50 }
 0x1e9   : > { %v3795_v52 = vld [vmem:[%s3488_s5] sm:$0xff]  ;;  %2065 = vmatpush.msrb.mxu3 %v1174_v51  ;;  %v711_v51 = vld [vmem:[%s3087_s8 + $0xee8] sm:$0xff] }
 0x1ea   : > { %v1261_v53 = vperm.slane %v3795_v52, 2  ;;  %v782_v56 = vld [vmem:[%s3087_s8 + $0x1120] sm:$0xff] }
 0x1eb   : > { %v918_v57 = vld [vmem:[%s3087_s8 + $0x1560] sm:$0xff]  ;;  %2006 = vmatpush.msrb.mxu0 %v782_v56  ;;  %v319_v56 = vld [vmem:[%s3087_s8 + $0x2a8] sm:$0xff] }
 0x1ec   : > { %v1030_v58 = vld [vmem:[%s3087_s8 + $0x18e0] sm:$0xff]  ;;  %2025 = vmatpush.msrb.mxu1 %v918_v57  ;;  %v1613_v7 = vadd.f32 %v1612_v3, %v1261_v53  ;;  %v3857_v53 = vld [vmem:[#allocation2 + $0x38] sm:$0xff]  ;;  %v455_v57 = vld [vmem:[%s3087_s8 + $0x6e8] sm:$0xff] }
 0x1ed   : > { %v1166_v61 = vld [vmem:[%s3087_s8 + $0x1d20] sm:$0xff]  ;;  %2047 = vmatpush.msrb.mxu2 %v1030_v58  ;;  %v567_v58 = vld [vmem:[%s3087_s8 + $0xa68] sm:$0xff] }
 0x1ee   : > { %v774_v63 = vld [vmem:[%s3087_s8 + $0x10e0] sm:$0xff]  ;;  %2066 = vmatpush.msrb.mxu3 %v1166_v61  ;;  %v1633_v19 = vadd.f32 %v1632_v15, %v1613_v7  ;;  %v703_v61 = vld [vmem:[%s3087_s8 + $0xea8] sm:$0xff] }
 0x1ef   : > { %v910_v0 = vld [vmem:[%s3087_s8 + $0x1520] sm:$0xff]  ;;  %2007 = vmatpush.msrb.mxu0 %v774_v63  ;;  %v3864_v63 = vld [vmem:[#allocation2 + $0x28] sm:$0xff] }
 0x1f0   : > { %v1022_v4 = vld [vmem:[%s3087_s8 + $0x18a0] sm:$0xff]  ;;  %2026 = vmatpush.msrb.mxu1 %v910_v0  ;;  %v1653_v24 = vadd.f32 %v1652_v1, %v1633_v19  ;;  %v311_v0 = vld [vmem:[%s3087_s8 + $0x268] sm:$0xff] }
 0x1f1   : > { %v1158_v6 = vld [vmem:[%s3087_s8 + $0x1ce0] sm:$0xff]  ;;  %2048 = vmatpush.msrb.mxu2 %v1022_v4  ;;  %v447_v3 = vld [vmem:[%s3087_s8 + $0x6a8] sm:$0xff] }
 0x1f2   : > { %v766_v9 = vld [vmem:[%s3087_s8 + $0x10a0] sm:$0xff]  ;;  %2067 = vmatpush.msrb.mxu3 %v1158_v6  ;;  %v1673_v60 = vadd.f32 %v1672_v39, %v1653_v24  ;;  %v559_v4 = vld [vmem:[%s3087_s8 + $0xa28] sm:$0xff] }
 0x1f3   : > { %v902_v10 = vld [vmem:[%s3087_s8 + $0x14e0] sm:$0xff]  ;;  %2008 = vmatpush.msrb.mxu0 %v766_v9  ;;  %v695_v6 = vld [vmem:[%s3087_s8 + $0xe68] sm:$0xff] }
 0x1f4   : > { %v1014_v11 = vld [vmem:[%s3087_s8 + $0x1860] sm:$0xff]  ;;  %2027 = vmatpush.msrb.mxu1 %v902_v10  ;;  %v1693_v33 = vadd.f32 %v1692_v45, %v1673_v60  ;;  %v303_v7 = vld [vmem:[%s3087_s8 + $0x228] sm:$0xff] }
 0x1f5   : > { %v1150_v12 = vld [vmem:[%s3087_s8 + $0x1ca0] sm:$0xff]  ;;  %2049 = vmatpush.msrb.mxu2 %v1014_v11  ;;  %v439_v9 = vld [vmem:[%s3087_s8 + $0x668] sm:$0xff] }
 0x1f6   : > { %v758_v13 = vld [vmem:[%s3087_s8 + $0x1060] sm:$0xff]  ;;  %2068 = vmatpush.msrb.mxu3 %v1150_v12  ;;  %v1713_v62 = vadd.f32 %v1712_v37, %v1693_v33  ;;  %v551_v10 = vld [vmem:[%s3087_s8 + $0x9e8] sm:$0xff] }
 0x1f7   : > { %v894_v14 = vld [vmem:[%s3087_s8 + $0x14a0] sm:$0xff]  ;;  %2009 = vmatpush.msrb.mxu0 %v758_v13  ;;  %v687_v11 = vld [vmem:[%s3087_s8 + $0xe28] sm:$0xff] }
 0x1f8   : > { %v1006_v17 = vld [vmem:[%s3087_s8 + $0x1820] sm:$0xff]  ;;  %2028 = vmatpush.msrb.mxu1 %v894_v14  ;;  %v1733_v21 = vadd.f32 %v1732_v16, %v1713_v62  ;;  %v295_v12 = vld [vmem:[%s3087_s8 + $0x1e8] sm:$0xff] }
 0x1f9   : > { %v1142_v18 = vld [vmem:[%s3087_s8 + $0x1c60] sm:$0xff]  ;;  %2050 = vmatpush.msrb.mxu2 %v1006_v17  ;;  %v431_v13 = vld [vmem:[%s3087_s8 + $0x628] sm:$0xff] }
 0x1fa   : > { %v750_v36 = vld [vmem:[%s3087_s8 + $0x1020] sm:$0xff]  ;;  %2069 = vmatpush.msrb.mxu3 %v1142_v18  ;;  %v1753_v46 = vadd.f32 %v1752_v54, %v1733_v21  ;;  %2051 = vmatmul.f32.vlgmr.msrb.gmra.mxu2 %v3846_v47  ;;  %v543_v14 = vld [vmem:[%s3087_s8 + $0x9a8] sm:$0xff] }
 0x1fb   : > { %v886_v23 = vld [vmem:[%s3087_s8 + $0x1460] sm:$0xff]  ;;  %2010 = vmatpush.msrb.mxu0 %v750_v36  ;;  %2115 = vmatpush.msra.mxu2 %v615_v20  ;;  %v679_v15 = vld [vmem:[%s3087_s8 + $0xde8] sm:$0xff] }
 0x1fc   : > { %v1134_v25 = vld [vmem:[%s3087_s8 + $0x1c20] sm:$0xff]  ;;  %2029 = vmatpush.msrb.mxu1 %v886_v23  ;;  %2557 = vst [vmem:[%s3555_s4 + $0x10] sm:$0xff] %v1753_v46  ;;  %v287_v1 = vld [vmem:[%s3087_s8 + $0x1a8] sm:$0xff] }
 0x1fd   : > { %2070 = vmatpush.msrb.mxu3 %v1134_v25  ;;  %v3824_v31 = vld [vmem:[#allocation2] sm:$0xff]  ;;  %2116 = vmatpush.msra.mxu2 %v607_v29  ;;  %v423_v17 = vld [vmem:[%s3087_s8 + $0x5e8] sm:$0xff] }
 0x1fe   : > { %1931 = vmatmul.f32.vlgmr.msra.gmra.mxu0 %v3824_v31  ;;  %v878_v32 = vld [vmem:[%s3087_s8 + $0x1420] sm:$0xff]  ;;  %2071 = vmatmul.f32.vlgmr.msrb.gmra.mxu3 %v3857_v53  ;;  %v535_v18 = vld [vmem:[%s3087_s8 + $0x968] sm:$0xff] }
 0x1ff   : > { %2075 = vmatpush.msra.mxu0 %v359_v28  ;;  %2135 = vmatpush.msra.mxu3 %v743_v30  ;;  %v3853_v50 = vld [vmem:[#allocation2 + $0x20] sm:$0xff]  ;;  %v671_v19 = vld [vmem:[%s3087_s8 + $0xda8] sm:$0xff] }
 0x200   : > { %2030 = vmatpush.msrb.mxu1 %v878_v32  ;;  %2117 = vmatpush.msra.mxu2 %v599_v55  ;;  %v279_v36 = vld [vmem:[%s3087_s8 + $0x168] sm:$0xff] }
 0x201   : > { %2076 = vmatpush.msra.mxu0 %v351_v2  ;;  %2136 = vmatpush.msra.mxu3 %v735_v8  ;;  %v415_v20 = vld [vmem:[%s3087_s8 + $0x5a8] sm:$0xff] }
 0x202   : > { %2095 = vmatpush.msra.mxu1 %v487_v35  ;;  %2118 = vmatpush.msra.mxu2 %v591_v38  ;;  %v527_v23 = vld [vmem:[%s3087_s8 + $0x928] sm:$0xff] }
 0x203   : > { %2077 = vmatpush.msra.mxu0 %v343_v59  ;;  %2137 = vmatpush.msra.mxu3 %v727_v42  ;;  %v663_v24 = vld [vmem:[%s3087_s8 + $0xd68] sm:$0xff] }
 0x204   : > { %2096 = vmatpush.msra.mxu1 %v479_v41  ;;  %2119 = vmatpush.msra.mxu2 %v583_v22  ;;  %v271_v39 = vld [vmem:[%s3087_s8 + $0x128] sm:$0xff] }
 0x205   : > { %2078 = vmatpush.msra.mxu0 %v335_v5  ;;  %2138 = vmatpush.msra.mxu3 %v719_v44  ;;  %v407_v25 = vld [vmem:[%s3087_s8 + $0x568] sm:$0xff] }
 0x206   : > { %2097 = vmatpush.msra.mxu1 %v471_v43  ;;  %2011 = vmatmul.f32.vlgmr.msrb.gmra.mxu0 %v3853_v50  ;;  %v519_v28 = vld [vmem:[%s3087_s8 + $0x8e8] sm:$0xff] }
 0x207   : > { %2079 = vmatpush.msra.mxu0 %v327_v27  ;;  %2120 = vmatpush.msra.mxu2 %v575_v49  ;;  %v655_v60 = vld [vmem:[%s3087_s8 + $0xd28] sm:$0xff] }
 0x208   : > { %2098 = vmatpush.msra.mxu1 %v463_v48  ;;  %2139 = vmatpush.msra.mxu3 %v711_v51  ;;  %v263_v29 = vld [vmem:[%s3087_s8 + $0xe8] sm:$0xff] }
 0x209   : > { %2031 = vmatmul.f32.vlgmr.msrb.gmra.mxu1 %v3864_v63  ;;  %2080 = vmatpush.msra.mxu0 %v319_v56  ;;  %v399_v30 = vld [vmem:[%s3087_s8 + $0x528] sm:$0xff] }
 0x20a   : > { %2099 = vmatpush.msra.mxu1 %v455_v57  ;;  %2121 = vmatpush.msra.mxu2 %v567_v58  ;;  %v511_v45 = vld [vmem:[%s3087_s8 + $0x8a8] sm:$0xff] }
 0x20b   : > { %2140 = vmatpush.msra.mxu3 %v703_v61  ;;  %2081 = vmatpush.msra.mxu0 %v311_v0  ;;  %v647_v32 = vld [vmem:[%s3087_s8 + $0xce8] sm:$0xff] }
 0x20c   : > { %2100 = vmatpush.msra.mxu1 %v447_v3  ;;  %2122 = vmatpush.msra.mxu2 %v559_v4  ;;  %v255_v2 = vld [vmem:[%s3087_s8 + $0xa8] sm:$0xff] }
 0x20d   : > { %2141 = vmatpush.msra.mxu3 %v695_v6  ;;  %2082 = vmatpush.msra.mxu0 %v303_v7  ;;  %v391_v33 = vld [vmem:[%s3087_s8 + $0x4e8] sm:$0xff] }
 0x20e   : > { %2101 = vmatpush.msra.mxu1 %v439_v9  ;;  %2123 = vmatpush.msra.mxu2 %v551_v10  ;;  %v503_v55 = vld [vmem:[%s3087_s8 + $0x868] sm:$0xff] }
 0x20f   : > { %2142 = vmatpush.msra.mxu3 %v687_v11  ;;  %2083 = vmatpush.msra.mxu0 %v295_v12  ;;  %v639_v35 = vld [vmem:[%s3087_s8 + $0xca8] sm:$0xff] }
 0x210   : > { %2102 = vmatpush.msra.mxu1 %v431_v13  ;;  %2124 = vmatpush.msra.mxu2 %v543_v14  ;;  %v247_v8 = vld [vmem:[%s3087_s8 + $0x68] sm:$0xff] }
 0x211   : > { %2143 = vmatpush.msra.mxu3 %v679_v15  ;;  %2084 = vmatpush.msra.mxu0 %v287_v1  ;;  %v383_v37 = vld [vmem:[%s3087_s8 + $0x4a8] sm:$0xff] }
 0x212   : > { %2103 = vmatpush.msra.mxu1 %v423_v17  ;;  %2125 = vmatpush.msra.mxu2 %v535_v18  ;;  %v495_v59 = vld [vmem:[%s3087_s8 + $0x828] sm:$0xff] }
 0x213   : > { %2144 = vmatpush.msra.mxu3 %v671_v19  ;;  %2085 = vmatpush.msra.mxu0 %v279_v36  ;;  %v631_v38 = vld [vmem:[%s3087_s8 + $0xc68] sm:$0xff] }
 0x214   : > { %2104 = vmatpush.msra.mxu1 %v415_v20  ;;  %2126 = vmatpush.msra.mxu2 %v527_v23  ;;  %v1127_v62 = vld [vmem:[%s3087_s8 + $0x1be8] sm:$0xff] }
 0x215   : > { %2145 = vmatpush.msra.mxu3 %v663_v24  ;;  %2086 = vmatpush.msra.mxu0 %v271_v39  ;;  %v239_v16 = vld [vmem:[%s3087_s8 + $0x28] sm:$0xff] }
 0x216   : > { %2105 = vmatpush.msra.mxu1 %v407_v25  ;;  %2127 = vmatpush.msra.mxu2 %v519_v28  ;;  %v375_v41 = vld [vmem:[%s3087_s8 + $0x468] sm:$0xff] }
 0x217   : > { %2146 = vmatpush.msra.mxu3 %v655_v60  ;;  %2087 = vmatpush.msra.mxu0 %v263_v29  ;;  %v623_v42 = vld [vmem:[%s3087_s8 + $0xc28] sm:$0xff] }
 0x218   : > { %2106 = vmatpush.msra.mxu1 %v399_v30  ;;  %2128 = vmatpush.msra.mxu2 %v511_v45  ;;  %v871_v5 = vld [vmem:[%s3087_s8 + $0x13e8] sm:$0xff] }
 0x219   : > { %2147 = vmatpush.msra.mxu3 %v647_v32  ;;  %2088 = vmatpush.msra.mxu0 %v255_v2  ;;  %v1119_v21 = vld [vmem:[%s3087_s8 + $0x1ba8] sm:$0xff] }
 0x21a   : > { %2107 = vmatpush.msra.mxu1 %v391_v33  ;;  %2129 = vmatpush.msra.mxu2 %v503_v55  ;;  %v1255_v43 = vld [vmem:[%s3087_s8 + $0x1fe8] sm:$0xff]  ;;  %v1262_v33 = vperm.slane %v3795_v52, 3 }
 0x21b   : > { %2148 = vmatpush.msra.mxu3 %v639_v35  ;;  %2089 = vmatpush.msra.mxu0 %v247_v8  ;;  %v367_v22 = vld [vmem:[%s3087_s8 + $0x428] sm:$0xff] }
 0x21c   : > { %2108 = vmatpush.msra.mxu1 %v383_v37  ;;  %2130 = vmatpush.msra.mxu2 %v495_v59  ;;  %v863_v54 = vld [vmem:[%s3087_s8 + $0x13a8] sm:$0xff] }
 0x21d   : > { %2149 = vmatpush.msra.mxu3 %v631_v38  ;;  %2090 = vmatpush.msra.mxu0 %v239_v16  ;;  %v999_v44 = vld [vmem:[%s3087_s8 + $0x17e8] sm:$0xff] }
 0x21e   : > { %2195 = vmatpush.msrb.mxu2 %v1127_v62  ;;  %2109 = vmatpush.msra.mxu1 %v375_v41  ;;  %v1111_v46 = vld [vmem:[%s3087_s8 + $0x1b68] sm:$0xff]  ;;  %v1772_v62 = vpop.f32.mrf.mxu0 }
 0x21f   : > { %2150 = vmatpush.msra.mxu3 %v623_v42  ;;  %2155 = vmatpush.msrb.mxu0 %v871_v5  ;;  %v1247_v27 = vld [vmem:[%s3087_s8 + $0x1fa8] sm:$0xff]  ;;  %v1773_v41 = vadd.f32 %v1772_v62, %v1262_v33  ;;  %v448_v33 = vld [vmem:[%s3087_s8 + $0x6b0] sm:$0xff] }
 0x220   : > { %2196 = vmatpush.msrb.mxu2 %v1119_v21  ;;  %2110 = vmatpush.msra.mxu1 %v367_v22  ;;  %v855_v48 = vld [vmem:[%s3087_s8 + $0x1368] sm:$0xff]  ;;  %v544_v62 = vld [vmem:[%s3087_s8 + $0x9b0] sm:$0xff] }
 0x221   : > { %2215 = vmatpush.msrb.mxu3 %v1255_v43  ;;  %v991_v49 = vld [vmem:[%s3087_s8 + $0x17a8] sm:$0xff]  ;;  %2156 = vmatpush.msrb.mxu0 %v863_v54 }
 0x222   : > { %2175 = vmatpush.msrb.mxu1 %v999_v44  ;;  %v1103_v51 = vld [vmem:[%s3087_s8 + $0x1b28] sm:$0xff]  ;;  %2197 = vmatpush.msrb.mxu2 %v1111_v46  ;;  %v1792_v44 = vpop.f32.mrf.mxu1  ;;  %v1812_v46 = vpop.f32.mrf.mxu2 }
 0x223   : > { %v1239_v56 = vld [vmem:[%s3087_s8 + $0x1f68] sm:$0xff]  ;;  %2216 = vmatpush.msrb.mxu3 %v1247_v27  ;;  %2157 = vmatpush.msrb.mxu0 %v855_v48 }
 0x224   : > { %v847_v57 = vld [vmem:[%s3087_s8 + $0x1328] sm:$0xff]  ;;  %2176 = vmatpush.msrb.mxu1 %v991_v49  ;;  %2198 = vmatpush.msrb.mxu2 %v1103_v51  ;;  %v1793_v49 = vadd.f32 %v1792_v44, %v1773_v41  ;;  %v424_v41 = vld [vmem:[%s3087_s8 + $0x5f0] sm:$0xff] }
 0x225   : > { %v983_v58 = vld [vmem:[%s3087_s8 + $0x1768] sm:$0xff]  ;;  %2217 = vmatpush.msrb.mxu3 %v1239_v56  ;;  %2158 = vmatpush.msrb.mxu0 %v847_v57  ;;  %v616_v56 = vld [vmem:[%s3087_s8 + $0xbf0] sm:$0xff] }
 0x226   : > { %v1095_v61 = vld [vmem:[%s3087_s8 + $0x1ae8] sm:$0xff]  ;;  %2177 = vmatpush.msrb.mxu1 %v983_v58  ;;  %v1813_v58 = vadd.f32 %v1812_v46, %v1793_v49  ;;  %2131 = vmatmul.f32.vlgmr.msra.gmra.mxu2 %v3818_v26  ;;  %v600_v26 = vld [vmem:[%s3087_s8 + $0xb70] sm:$0xff] }
 0x227   : > { %v1231_v0 = vld [vmem:[%s3087_s8 + $0x1f28] sm:$0xff]  ;;  %2199 = vmatpush.msrb.mxu2 %v1095_v61  ;;  %v1832_v61 = vpop.f32.mrf.mxu3  ;;  %2091 = vmatmul.f32.vlgmr.msra.gmra.mxu0 %v3824_v31  ;;  %v344_v31 = vld [vmem:[%s3087_s8 + $0x370] sm:$0xff] }
 0x228   : > { %v839_v3 = vld [vmem:[%s3087_s8 + $0x12e8] sm:$0xff]  ;;  %2218 = vmatpush.msrb.mxu3 %v1231_v0  ;;  %2111 = vmatmul.f32.vlgmr.msra.gmra.mxu1 %v3837_v40  ;;  %v720_v40 = vld [vmem:[%s3087_s8 + $0xf30] sm:$0xff] }
 0x229   : > { %v975_v4 = vld [vmem:[%s3087_s8 + $0x1728] sm:$0xff]  ;;  %2159 = vmatpush.msrb.mxu0 %v839_v3  ;;  %v360_v3 = vld [vmem:[%s3087_s8 + $0x3f0] sm:$0xff]  ;;  %2151 = vmatmul.f32.vlgmr.msra.gmra.mxu3 %v3829_v34 }
 0x22a   : > { %v1087_v6 = vld [vmem:[%s3087_s8 + $0x1aa8] sm:$0xff]  ;;  %2178 = vmatpush.msrb.mxu1 %v975_v4  ;;  %v1833_v4 = vadd.f32 %v1832_v61, %v1813_v58  ;;  %v480_v34 = vld [vmem:[%s3087_s8 + $0x7b0] sm:$0xff] }
 0x22b   : > { %v1223_v7 = vld [vmem:[%s3087_s8 + $0x1ee8] sm:$0xff]  ;;  %2200 = vmatpush.msrb.mxu2 %v1087_v6  ;;  %v608_v6 = vld [vmem:[%s3087_s8 + $0xbb0] sm:$0xff] }
 0x22c   : > { %v831_v9 = vld [vmem:[%s3087_s8 + $0x12a8] sm:$0xff]  ;;  %2219 = vmatpush.msrb.mxu3 %v1223_v7  ;;  %v744_v7 = vld [vmem:[%s3087_s8 + $0xff0] sm:$0xff] }
 0x22d   : > { %v967_v10 = vld [vmem:[%s3087_s8 + $0x16e8] sm:$0xff]  ;;  %2160 = vmatpush.msrb.mxu0 %v831_v9  ;;  %v1852_v9 = vpop.f32.mrf.mxu0  ;;  %v272_v44 = vld [vmem:[%s3087_s8 + $0x130] sm:$0xff] }
 0x22e   : > { %v1079_v11 = vld [vmem:[%s3087_s8 + $0x1a68] sm:$0xff]  ;;  %2179 = vmatpush.msrb.mxu1 %v967_v10  ;;  %v408_v46 = vld [vmem:[%s3087_s8 + $0x570] sm:$0xff] }
 0x22f   : > { %v1215_v12 = vld [vmem:[%s3087_s8 + $0x1ea8] sm:$0xff]  ;;  %2201 = vmatpush.msrb.mxu2 %v1079_v11  ;;  %v352_v11 = vld [vmem:[%s3087_s8 + $0x3b0] sm:$0xff] }
 0x230   : > { %v823_v13 = vld [vmem:[%s3087_s8 + $0x1268] sm:$0xff]  ;;  %2220 = vmatpush.msrb.mxu3 %v1215_v12  ;;  %v1853_v12 = vadd.f32 %v1852_v9, %v1833_v4  ;;  %v264_v49 = vld [vmem:[%s3087_s8 + $0xf0] sm:$0xff] }
 0x231   : > { %v959_v14 = vld [vmem:[%s3087_s8 + $0x16a8] sm:$0xff]  ;;  %2161 = vmatpush.msrb.mxu0 %v823_v13  ;;  %v488_v13 = vld [vmem:[%s3087_s8 + $0x7f0] sm:$0xff] }
 0x232   : > { %v1071_v15 = vld [vmem:[%s3087_s8 + $0x1a28] sm:$0xff]  ;;  %2180 = vmatpush.msrb.mxu1 %v959_v14  ;;  %v736_v14 = vld [vmem:[%s3087_s8 + $0xfb0] sm:$0xff] }
 0x233   : > { %v1207_v1 = vld [vmem:[%s3087_s8 + $0x1e68] sm:$0xff]  ;;  %2202 = vmatpush.msrb.mxu2 %v1071_v15  ;;  %v1872_v15 = vpop.f32.mrf.mxu1  ;;  %v256_v58 = vld [vmem:[%s3087_s8 + $0xb0] sm:$0xff] }
 0x234   : > { %v815_v17 = vld [vmem:[%s3087_s8 + $0x1228] sm:$0xff]  ;;  %2221 = vmatpush.msrb.mxu3 %v1207_v1  ;;  %v592_v1 = vld [vmem:[%s3087_s8 + $0xb30] sm:$0xff] }
 0x235   : > { %v951_v18 = vld [vmem:[%s3087_s8 + $0x1668] sm:$0xff]  ;;  %2162 = vmatpush.msrb.mxu0 %v815_v17  ;;  %v1873_v17 = vadd.f32 %v1872_v15, %v1853_v12  ;;  %v392_v61 = vld [vmem:[%s3087_s8 + $0x4f0] sm:$0xff] }
 0x236   : > { %v1063_v19 = vld [vmem:[%s3087_s8 + $0x19e8] sm:$0xff]  ;;  %2181 = vmatpush.msrb.mxu1 %v951_v18  ;;  %v1892_v18 = vpop.f32.mrf.mxu2  ;;  %v248_v4 = vld [vmem:[%s3087_s8 + $0x70] sm:$0xff] }
 0x237   : > { %v1199_v36 = vld [vmem:[%s3087_s8 + $0x1e28] sm:$0xff]  ;;  %2203 = vmatpush.msrb.mxu2 %v1063_v19  ;;  %v728_v19 = vld [vmem:[%s3087_s8 + $0xf70] sm:$0xff] }
 0x238   : > { %v807_v20 = vld [vmem:[%s3087_s8 + $0x11e8] sm:$0xff]  ;;  %2222 = vmatpush.msrb.mxu3 %v1199_v36  ;;  %v336_v36 = vld [vmem:[%s3087_s8 + $0x330] sm:$0xff] }
 0x239   : > { %v943_v23 = vld [vmem:[%s3087_s8 + $0x1628] sm:$0xff]  ;;  %2163 = vmatpush.msrb.mxu0 %v807_v20  ;;  %v1893_v20 = vadd.f32 %v1892_v18, %v1873_v17  ;;  %v632_v9 = vld [vmem:[%s3087_s8 + $0xc70] sm:$0xff] }
 0x23a   : > { %v1055_v24 = vld [vmem:[%s3087_s8 + $0x19a8] sm:$0xff]  ;;  %2182 = vmatpush.msrb.mxu1 %v943_v23  ;;  %v472_v23 = vld [vmem:[%s3087_s8 + $0x770] sm:$0xff] }
 0x23b   : > { %v1191_v39 = vld [vmem:[%s3087_s8 + $0x1de8] sm:$0xff]  ;;  %2204 = vmatpush.msrb.mxu2 %v1055_v24  ;;  %v584_v24 = vld [vmem:[%s3087_s8 + $0xaf0] sm:$0xff] }
 0x23c   : > { %v799_v25 = vld [vmem:[%s3087_s8 + $0x11a8] sm:$0xff]  ;;  %2223 = vmatpush.msrb.mxu3 %v1191_v39  ;;  %v1912_v39 = vpop.f32.mrf.mxu3  ;;  %v376_v12 = vld [vmem:[%s3087_s8 + $0x470] sm:$0xff] }
 0x23d   : > { %v935_v28 = vld [vmem:[%s3087_s8 + $0x15e8] sm:$0xff]  ;;  %2164 = vmatpush.msrb.mxu0 %v799_v25  ;;  %v1913_v25 = vadd.f32 %v1912_v39, %v1893_v20  ;;  %v1256_v15 = vld [vmem:[%s3087_s8 + $0x1ff0] sm:$0xff] }
 0x23e   : > { %v1047_v60 = vld [vmem:[%s3087_s8 + $0x1968] sm:$0xff]  ;;  %2183 = vmatpush.msrb.mxu1 %v935_v28  ;;  %v328_v28 = vld [vmem:[%s3087_s8 + $0x2f0] sm:$0xff] }
 0x23f   : > { %v1183_v29 = vld [vmem:[%s3087_s8 + $0x1da8] sm:$0xff]  ;;  %2205 = vmatpush.msrb.mxu2 %v1047_v60  ;;  %v464_v60 = vld [vmem:[%s3087_s8 + $0x730] sm:$0xff]  ;;  %2558 = vst [vmem:[%s3555_s4 + $0x18] sm:$0xff] %v1913_v25 }
 0x240   : > { %v791_v30 = vld [vmem:[%s3087_s8 + $0x1168] sm:$0xff]  ;;  %2224 = vmatpush.msrb.mxu3 %v1183_v29  ;;  %v576_v29 = vld [vmem:[%s3087_s8 + $0xab0] sm:$0xff] }
 0x241   : > { %v927_v45 = vld [vmem:[%s3087_s8 + $0x15a8] sm:$0xff]  ;;  %2165 = vmatpush.msrb.mxu0 %v791_v30  ;;  %v712_v30 = vld [vmem:[%s3087_s8 + $0xef0] sm:$0xff] }
 0x242   : > { %v1039_v32 = vld [vmem:[%s3087_s8 + $0x1928] sm:$0xff]  ;;  %2184 = vmatpush.msrb.mxu1 %v927_v45  ;;  %v456_v45 = vld [vmem:[%s3087_s8 + $0x6f0] sm:$0xff] }
 0x243   : > { %v1175_v2 = vld [vmem:[%s3087_s8 + $0x1d68] sm:$0xff]  ;;  %2206 = vmatpush.msrb.mxu2 %v1039_v32  ;;  %v568_v32 = vld [vmem:[%s3087_s8 + $0xa70] sm:$0xff] }
 0x244   : > { %v783_v55 = vld [vmem:[%s3087_s8 + $0x1128] sm:$0xff]  ;;  %2225 = vmatpush.msrb.mxu3 %v1175_v2  ;;  %v704_v2 = vld [vmem:[%s3087_s8 + $0xeb0] sm:$0xff] }
 0x245   : > { %v919_v35 = vld [vmem:[%s3087_s8 + $0x1568] sm:$0xff]  ;;  %2166 = vmatpush.msrb.mxu0 %v783_v55  ;;  %v696_v55 = vld [vmem:[%s3087_s8 + $0xe70] sm:$0xff] }
 0x246   : > { %v1031_v8 = vld [vmem:[%s3087_s8 + $0x18e8] sm:$0xff]  ;;  %2185 = vmatpush.msrb.mxu1 %v919_v35  ;;  %v304_v35 = vld [vmem:[%s3087_s8 + $0x230] sm:$0xff] }
 0x247   : > { %v1167_v37 = vld [vmem:[%s3087_s8 + $0x1d28] sm:$0xff]  ;;  %2207 = vmatpush.msrb.mxu2 %v1031_v8  ;;  %v440_v8 = vld [vmem:[%s3087_s8 + $0x670] sm:$0xff] }
 0x248   : > { %v775_v59 = vld [vmem:[%s3087_s8 + $0x10e8] sm:$0xff]  ;;  %2226 = vmatpush.msrb.mxu3 %v1167_v37  ;;  %v552_v37 = vld [vmem:[%s3087_s8 + $0x9f0] sm:$0xff] }
 0x249   : > { %v911_v38 = vld [vmem:[%s3087_s8 + $0x1528] sm:$0xff]  ;;  %2167 = vmatpush.msrb.mxu0 %v775_v59  ;;  %v296_v59 = vld [vmem:[%s3087_s8 + $0x1f0] sm:$0xff] }
 0x24a   : > { %v1023_v52 = vld [vmem:[%s3087_s8 + $0x18a8] sm:$0xff]  ;;  %2186 = vmatpush.msrb.mxu1 %v911_v38  ;;  %v432_v38 = vld [vmem:[%s3087_s8 + $0x630] sm:$0xff] }
 0x24b   : > { %v1159_v16 = vld [vmem:[%s3087_s8 + $0x1ce8] sm:$0xff]  ;;  %2208 = vmatpush.msrb.mxu2 %v1023_v52  ;;  %v680_v52 = vld [vmem:[%s3087_s8 + $0xdf0] sm:$0xff] }
 0x24c   : > { %v767_v42 = vld [vmem:[%s3087_s8 + $0x10a8] sm:$0xff]  ;;  %2227 = vmatpush.msrb.mxu3 %v1159_v16  ;;  %v288_v16 = vld [vmem:[%s3087_s8 + $0x1b0] sm:$0xff] }
 0x24d   : > { %v903_v5 = vld [vmem:[%s3087_s8 + $0x14e8] sm:$0xff]  ;;  %2168 = vmatpush.msrb.mxu0 %v767_v42  ;;  %v536_v42 = vld [vmem:[%s3087_s8 + $0x970] sm:$0xff] }
 0x24e   : > { %v1015_v21 = vld [vmem:[%s3087_s8 + $0x1868] sm:$0xff]  ;;  %2187 = vmatpush.msrb.mxu1 %v903_v5  ;;  %v672_v5 = vld [vmem:[%s3087_s8 + $0xdb0] sm:$0xff] }
 0x24f   : > { %v1151_v43 = vld [vmem:[%s3087_s8 + $0x1ca8] sm:$0xff]  ;;  %2209 = vmatpush.msrb.mxu2 %v1015_v21  ;;  %v280_v21 = vld [vmem:[%s3087_s8 + $0x170] sm:$0xff] }
 0x250   : > { %v759_v22 = vld [vmem:[%s3087_s8 + $0x1068] sm:$0xff]  ;;  %2228 = vmatpush.msrb.mxu3 %v1151_v43  ;;  %v416_v43 = vld [vmem:[%s3087_s8 + $0x5b0] sm:$0xff] }
 0x251   : > { %v895_v54 = vld [vmem:[%s3087_s8 + $0x14a8] sm:$0xff]  ;;  %2169 = vmatpush.msrb.mxu0 %v759_v22  ;;  %v528_v22 = vld [vmem:[%s3087_s8 + $0x930] sm:$0xff] }
 0x252   : > { %v1007_v27 = vld [vmem:[%s3087_s8 + $0x1828] sm:$0xff]  ;;  %2188 = vmatpush.msrb.mxu1 %v895_v54  ;;  %v664_v54 = vld [vmem:[%s3087_s8 + $0xd70] sm:$0xff] }
 0x253   : > { %v1143_v48 = vld [vmem:[%s3087_s8 + $0x1c68] sm:$0xff]  ;;  %2210 = vmatpush.msrb.mxu2 %v1007_v27  ;;  %v520_v27 = vld [vmem:[%s3087_s8 + $0x8f0] sm:$0xff] }
 0x254   : > { %v751_v51 = vld [vmem:[%s3087_s8 + $0x1028] sm:$0xff]  ;;  %2229 = vmatpush.msrb.mxu3 %v1143_v48  ;;  %2211 = vmatmul.f32.vlgmr.msrb.gmra.mxu2 %v3846_v47  ;;  %v320_v47 = vld [vmem:[%s3087_s8 + $0x2b0] sm:$0xff] }
 0x255   : > { %v887_v57 = vld [vmem:[%s3087_s8 + $0x1468] sm:$0xff]  ;;  %2170 = vmatpush.msrb.mxu0 %v751_v51  ;;  %2275 = vmatpush.msra.mxu2 %v616_v56  ;;  %v656_v48 = vld [vmem:[%s3087_s8 + $0xd30] sm:$0xff] }
 0x256   : > { %v1135_v0 = vld [vmem:[%s3087_s8 + $0x1c28] sm:$0xff]  ;;  %2189 = vmatpush.msrb.mxu1 %v887_v57  ;;  %2171 = vmatmul.f32.vlgmr.msrb.gmra.mxu0 %v3853_v50  ;;  %v312_v50 = vld [vmem:[%s3087_s8 + $0x270] sm:$0xff] }
 0x257   : > { %2230 = vmatpush.msrb.mxu3 %v1135_v0  ;;  %v879_v10 = vld [vmem:[%s3087_s8 + $0x1428] sm:$0xff]  ;;  %2235 = vmatpush.msra.mxu0 %v360_v3  ;;  %v400_v51 = vld [vmem:[%s3087_s8 + $0x530] sm:$0xff] }
 0x258   : > { %2276 = vmatpush.msra.mxu2 %v608_v6  ;;  %2190 = vmatpush.msrb.mxu1 %v879_v10  ;;  %v512_v56 = vld [vmem:[%s3087_s8 + $0x8b0] sm:$0xff] }
 0x259   : > { %2295 = vmatpush.msra.mxu3 %v744_v7  ;;  %2236 = vmatpush.msra.mxu0 %v352_v11  ;;  %v648_v57 = vld [vmem:[%s3087_s8 + $0xcf0] sm:$0xff] }
 0x25a   : > { %2277 = vmatpush.msra.mxu2 %v600_v26  ;;  %2255 = vmatpush.msra.mxu1 %v488_v13  ;;  %v504_v0 = vld [vmem:[%s3087_s8 + $0x870] sm:$0xff] }
 0x25b   : > { %2296 = vmatpush.msra.mxu3 %v736_v14  ;;  %2237 = vmatpush.msra.mxu0 %v344_v31  ;;  %v640_v3 = vld [vmem:[%s3087_s8 + $0xcb0] sm:$0xff] }
 0x25c   : > { %2278 = vmatpush.msra.mxu2 %v592_v1  ;;  %2256 = vmatpush.msra.mxu1 %v480_v34  ;;  %v384_v6 = vld [vmem:[%s3087_s8 + $0x4b0] sm:$0xff] }
 0x25d   : > { %2297 = vmatpush.msra.mxu3 %v728_v19  ;;  %2238 = vmatpush.msra.mxu0 %v336_v36  ;;  %v496_v7 = vld [vmem:[%s3087_s8 + $0x830] sm:$0xff] }
 0x25e   : > { %2257 = vmatpush.msra.mxu1 %v472_v23  ;;  %2279 = vmatpush.msra.mxu2 %v584_v24  ;;  %v1128_v10 = vld [vmem:[%s3087_s8 + $0x1bf0] sm:$0xff] }
 0x25f   : > { %2298 = vmatpush.msra.mxu3 %v720_v40  ;;  %2239 = vmatpush.msra.mxu0 %v328_v28  ;;  %v240_v11 = vld [vmem:[%s3087_s8 + $0x30] sm:$0xff] }
 0x260   : > { %2231 = vmatmul.f32.vlgmr.msrb.gmra.mxu3 %v3857_v53  ;;  %2258 = vmatpush.msra.mxu1 %v464_v60  ;;  %v560_v53 = vld [vmem:[%s3087_s8 + $0xa30] sm:$0xff] }
 0x261   : > { %2280 = vmatpush.msra.mxu2 %v576_v29  ;;  %2299 = vmatpush.msra.mxu3 %v712_v30  ;;  %v624_v26 = vld [vmem:[%s3087_s8 + $0xc30] sm:$0xff] }
 0x262   : > { %2191 = vmatmul.f32.vlgmr.msrb.gmra.mxu1 %v3864_v63  ;;  %2240 = vmatpush.msra.mxu0 %v320_v47  ;;  %v688_v63 = vld [vmem:[%s3087_s8 + $0xe30] sm:$0xff] }
 0x263   : > { %2259 = vmatpush.msra.mxu1 %v456_v45  ;;  %2281 = vmatpush.msra.mxu2 %v568_v32  ;;  %v872_v13 = vld [vmem:[%s3087_s8 + $0x13f0] sm:$0xff] }
 0x264   : > { %2300 = vmatpush.msra.mxu3 %v704_v2  ;;  %2241 = vmatpush.msra.mxu0 %v312_v50  ;;  %v1120_v14 = vld [vmem:[%s3087_s8 + $0x1bb0] sm:$0xff] }
 0x265   : > { %2260 = vmatpush.msra.mxu1 %v448_v33  ;;  %2282 = vmatpush.msra.mxu2 %v560_v53  ;;  %v368_v31 = vld [vmem:[%s3087_s8 + $0x430] sm:$0xff] }
 0x266   : > { %2301 = vmatpush.msra.mxu3 %v696_v55  ;;  %2242 = vmatpush.msra.mxu0 %v304_v35  ;;  %v864_v1 = vld [vmem:[%s3087_s8 + $0x13b0] sm:$0xff] }
 0x267   : > { %2261 = vmatpush.msra.mxu1 %v440_v8  ;;  %2283 = vmatpush.msra.mxu2 %v552_v37  ;;  %v1000_v17 = vld [vmem:[%s3087_s8 + $0x17f0] sm:$0xff] }
 0x268   : > { %2302 = vmatpush.msra.mxu3 %v688_v63  ;;  %2243 = vmatpush.msra.mxu0 %v296_v59  ;;  %v1112_v18 = vld [vmem:[%s3087_s8 + $0x1b70] sm:$0xff] }
 0x269   : > { %2262 = vmatpush.msra.mxu1 %v432_v38  ;;  %2284 = vmatpush.msra.mxu2 %v544_v62  ;;  %v1248_v34 = vld [vmem:[%s3087_s8 + $0x1fb0] sm:$0xff] }
 0x26a   : > { %2303 = vmatpush.msra.mxu3 %v680_v52  ;;  %2244 = vmatpush.msra.mxu0 %v288_v16  ;;  %v856_v19 = vld [vmem:[%s3087_s8 + $0x1370] sm:$0xff] }
 0x26b   : > { %2263 = vmatpush.msra.mxu1 %v424_v41  ;;  %2285 = vmatpush.msra.mxu2 %v536_v42  ;;  %v992_v36 = vld [vmem:[%s3087_s8 + $0x17b0] sm:$0xff] }
 0x26c   : > { %2304 = vmatpush.msra.mxu3 %v672_v5  ;;  %2245 = vmatpush.msra.mxu0 %v280_v21  ;;  %v1104_v20 = vld [vmem:[%s3087_s8 + $0x1b30] sm:$0xff] }
 0x26d   : > { %2264 = vmatpush.msra.mxu1 %v416_v43  ;;  %2286 = vmatpush.msra.mxu2 %v528_v22  ;;  %v1240_v23 = vld [vmem:[%s3087_s8 + $0x1f70] sm:$0xff] }
 0x26e   : > { %2305 = vmatpush.msra.mxu3 %v664_v54  ;;  %2246 = vmatpush.msra.mxu0 %v272_v44  ;;  %v848_v24 = vld [vmem:[%s3087_s8 + $0x1330] sm:$0xff]  ;;  %v4090_v44 = vld [vmem:[%s3488_s5] sm:$0xff] }
 0x26f   : > { %2265 = vmatpush.msra.mxu1 %v408_v46  ;;  %2287 = vmatpush.msra.mxu2 %v520_v27  ;;  %v984_v39 = vld [vmem:[%s3087_s8 + $0x1770] sm:$0xff]  ;;  %v1263_v46 = vperm.slane %v4090_v44, 4 }
 0x270   : > { %2306 = vmatpush.msra.mxu3 %v656_v48  ;;  %2247 = vmatpush.msra.mxu0 %v264_v49  ;;  %v1096_v40 = vld [vmem:[%s3087_s8 + $0x1af0] sm:$0xff] }
 0x271   : > { %2266 = vmatpush.msra.mxu1 %v400_v51  ;;  %2288 = vmatpush.msra.mxu2 %v512_v56  ;;  %v1232_v25 = vld [vmem:[%s3087_s8 + $0x1f30] sm:$0xff] }
 0x272   : > { %2307 = vmatpush.msra.mxu3 %v648_v57  ;;  %2248 = vmatpush.msra.mxu0 %v256_v58  ;;  %v840_v28 = vld [vmem:[%s3087_s8 + $0x12f0] sm:$0xff] }
 0x273   : > { %2267 = vmatpush.msra.mxu1 %v392_v61  ;;  %2289 = vmatpush.msra.mxu2 %v504_v0  ;;  %v976_v60 = vld [vmem:[%s3087_s8 + $0x1730] sm:$0xff] }
 0x274   : > { %2308 = vmatpush.msra.mxu3 %v640_v3  ;;  %2249 = vmatpush.msra.mxu0 %v248_v4  ;;  %v1088_v29 = vld [vmem:[%s3087_s8 + $0x1ab0] sm:$0xff] }
 0x275   : > { %2268 = vmatpush.msra.mxu1 %v384_v6  ;;  %2290 = vmatpush.msra.mxu2 %v496_v7  ;;  %v1224_v30 = vld [vmem:[%s3087_s8 + $0x1ef0] sm:$0xff] }
 0x276   : > { %2309 = vmatpush.msra.mxu3 %v632_v9  ;;  %2250 = vmatpush.msra.mxu0 %v240_v11  ;;  %v832_v47 = vld [vmem:[%s3087_s8 + $0x12b0] sm:$0xff] }
 0x277   : > { %2355 = vmatpush.msrb.mxu2 %v1128_v10  ;;  %2269 = vmatpush.msra.mxu1 %v376_v12  ;;  %v968_v45 = vld [vmem:[%s3087_s8 + $0x16f0] sm:$0xff]  ;;  %v1952_v12 = vpop.f32.mrf.mxu1 }
 0x278   : > { %2310 = vmatpush.msra.mxu3 %v624_v26  ;;  %2315 = vmatpush.msrb.mxu0 %v872_v13  ;;  %v1080_v32 = vld [vmem:[%s3087_s8 + $0x1a70] sm:$0xff]  ;;  %v1972_v26 = vpop.f32.mrf.mxu2 }
 0x279   : > { %2356 = vmatpush.msrb.mxu2 %v1120_v14  ;;  %2270 = vmatpush.msra.mxu1 %v368_v31  ;;  %v1216_v2 = vld [vmem:[%s3087_s8 + $0x1eb0] sm:$0xff] }
 0x27a   : > { %2375 = vmatpush.msrb.mxu3 %v1256_v15  ;;  %2316 = vmatpush.msrb.mxu0 %v864_v1  ;;  %v824_v50 = vld [vmem:[%s3087_s8 + $0x1270] sm:$0xff]  ;;  %v617_v1 = vld [vmem:[%s3087_s8 + $0xbf8] sm:$0xff] }
 0x27b   : > { %2335 = vmatpush.msrb.mxu1 %v1000_v17  ;;  %2357 = vmatpush.msrb.mxu2 %v1112_v18  ;;  %v960_v33 = vld [vmem:[%s3087_s8 + $0x16b0] sm:$0xff]  ;;  %v1932_v58 = vpop.f32.mrf.mxu0 }
 0x27c   : > { %2376 = vmatpush.msrb.mxu3 %v1248_v34  ;;  %2317 = vmatpush.msrb.mxu0 %v856_v19  ;;  %v1072_v53 = vld [vmem:[%s3087_s8 + $0x1a30] sm:$0xff]  ;;  %v1933_v3 = vadd.f32 %v1932_v58, %v1263_v46  ;;  %v1992_v34 = vpop.f32.mrf.mxu3  ;;  %v4152_v46 = vld [vmem:[#allocation2 + $0x38] sm:$0xff] }
 0x27d   : > { %2336 = vmatpush.msrb.mxu1 %v992_v36  ;;  %2358 = vmatpush.msrb.mxu2 %v1104_v20  ;;  %v1208_v55 = vld [vmem:[%s3087_s8 + $0x1e70] sm:$0xff]  ;;  %v361_v20 = vld [vmem:[%s3087_s8 + $0x3f8] sm:$0xff] }
 0x27e   : > { %2377 = vmatpush.msrb.mxu3 %v1240_v23  ;;  %2318 = vmatpush.msrb.mxu0 %v848_v24  ;;  %v816_v35 = vld [vmem:[%s3087_s8 + $0x1230] sm:$0xff]  ;;  %v1953_v15 = vadd.f32 %v1952_v12, %v1933_v3  ;;  %v609_v24 = vld [vmem:[%s3087_s8 + $0xbb8] sm:$0xff] }
 0x27f   : > { %2337 = vmatpush.msrb.mxu1 %v984_v39  ;;  %2359 = vmatpush.msrb.mxu2 %v1096_v40  ;;  %v952_v8 = vld [vmem:[%s3087_s8 + $0x1670] sm:$0xff]  ;;  %v745_v39 = vld [vmem:[%s3087_s8 + $0xff8] sm:$0xff] }
 0x280   : > { %2378 = vmatpush.msrb.mxu3 %v1232_v25  ;;  %2319 = vmatpush.msrb.mxu0 %v840_v28  ;;  %v1064_v37 = vld [vmem:[%s3087_s8 + $0x19f0] sm:$0xff]  ;;  %v1973_v18 = vadd.f32 %v1972_v26, %v1953_v15  ;;  %v4119_v25 = vld [vmem:[#allocation2] sm:$0xff]  ;;  %v449_v58 = vld [vmem:[%s3087_s8 + $0x6b8] sm:$0xff] }
 0x281   : > { %2338 = vmatpush.msrb.mxu1 %v976_v60  ;;  %2360 = vmatpush.msrb.mxu2 %v1088_v29  ;;  %v1200_v63 = vld [vmem:[%s3087_s8 + $0x1e30] sm:$0xff]  ;;  %v353_v60 = vld [vmem:[%s3087_s8 + $0x3b8] sm:$0xff] }
 0x282   : > { %2379 = vmatpush.msrb.mxu3 %v1224_v30  ;;  %2320 = vmatpush.msrb.mxu0 %v832_v47  ;;  %v808_v59 = vld [vmem:[%s3087_s8 + $0x11f0] sm:$0xff]  ;;  %v1993_v23 = vadd.f32 %v1992_v34, %v1973_v18  ;;  %v4124_v30 = vld [vmem:[#allocation2 + $0x18] sm:$0xff] }
 0x283   : > { %2339 = vmatpush.msrb.mxu1 %v968_v45  ;;  %2361 = vmatpush.msrb.mxu2 %v1080_v32  ;;  %v944_v38 = vld [vmem:[%s3087_s8 + $0x1630] sm:$0xff]  ;;  %v2012_v40 = vpop.f32.mrf.mxu0  ;;  %v601_v47 = vld [vmem:[%s3087_s8 + $0xb78] sm:$0xff] }
 0x284   : > { %2380 = vmatpush.msrb.mxu3 %v1216_v2  ;;  %2321 = vmatpush.msrb.mxu0 %v824_v50  ;;  %v1056_v62 = vld [vmem:[%s3087_s8 + $0x19b0] sm:$0xff]  ;;  %v2013_v29 = vadd.f32 %v2012_v40, %v1993_v23  ;;  %v489_v45 = vld [vmem:[%s3087_s8 + $0x7f8] sm:$0xff] }
 0x285   : > { %2340 = vmatpush.msrb.mxu1 %v960_v33  ;;  %2362 = vmatpush.msrb.mxu2 %v1072_v53  ;;  %v1192_v52 = vld [vmem:[%s3087_s8 + $0x1df0] sm:$0xff]  ;;  %v737_v32 = vld [vmem:[%s3087_s8 + $0xfb8] sm:$0xff] }
 0x286   : > { %2381 = vmatpush.msrb.mxu3 %v1208_v55  ;;  %2322 = vmatpush.msrb.mxu0 %v816_v35  ;;  %v800_v16 = vld [vmem:[%s3087_s8 + $0x11b0] sm:$0xff]  ;;  %v2032_v2 = vpop.f32.mrf.mxu1  ;;  %v345_v50 = vld [vmem:[%s3087_s8 + $0x378] sm:$0xff]  ;;  %v2052_v55 = vpop.f32.mrf.mxu2  ;;  %v4132_v35 = vld [vmem:[#allocation2 + $0x8] sm:$0xff] }
 0x287   : > { %2341 = vmatpush.msrb.mxu1 %v952_v8  ;;  %2363 = vmatpush.msrb.mxu2 %v1064_v37  ;;  %v936_v41 = vld [vmem:[%s3087_s8 + $0x15f0] sm:$0xff]  ;;  %v593_v33 = vld [vmem:[%s3087_s8 + $0xb38] sm:$0xff]  ;;  %v2033_v53 = vadd.f32 %v2032_v2, %v2013_v29 }
 0x288   : > { %2382 = vmatpush.msrb.mxu3 %v1200_v63  ;;  %2323 = vmatpush.msrb.mxu0 %v808_v59  ;;  %v1048_v42 = vld [vmem:[%s3087_s8 + $0x1970] sm:$0xff]  ;;  %v481_v8 = vld [vmem:[%s3087_s8 + $0x7b8] sm:$0xff] }
 0x289   : > { %2342 = vmatpush.msrb.mxu1 %v944_v38  ;;  %v1184_v5 = vld [vmem:[%s3087_s8 + $0x1db0] sm:$0xff]  ;;  %2364 = vmatpush.msrb.mxu2 %v1056_v62  ;;  %v729_v37 = vld [vmem:[%s3087_s8 + $0xf78] sm:$0xff]  ;;  %v2053_v59 = vadd.f32 %v2052_v55, %v2033_v53 }
 0x28a   : > { %2383 = vmatpush.msrb.mxu3 %v1192_v52  ;;  %v792_v21 = vld [vmem:[%s3087_s8 + $0x1170] sm:$0xff]  ;;  %2324 = vmatpush.msrb.mxu0 %v800_v16  ;;  %v337_v63 = vld [vmem:[%s3087_s8 + $0x338] sm:$0xff]  ;;  %v2072_v52 = vpop.f32.mrf.mxu3 }
 0x28b   : > { %v928_v43 = vld [vmem:[%s3087_s8 + $0x15b0] sm:$0xff]  ;;  %2343 = vmatpush.msrb.mxu1 %v936_v41  ;;  %2365 = vmatpush.msrb.mxu2 %v1048_v42  ;;  %v473_v38 = vld [vmem:[%s3087_s8 + $0x778] sm:$0xff]  ;;  %v2073_v41 = vadd.f32 %v2072_v52, %v2053_v59 }
 0x28c   : > { %v1040_v22 = vld [vmem:[%s3087_s8 + $0x1930] sm:$0xff]  ;;  %2384 = vmatpush.msrb.mxu3 %v1184_v5  ;;  %2325 = vmatpush.msrb.mxu0 %v792_v21  ;;  %v585_v62 = vld [vmem:[%s3087_s8 + $0xaf8] sm:$0xff] }
 0x28d   : > { %v1176_v54 = vld [vmem:[%s3087_s8 + $0x1d70] sm:$0xff]  ;;  %2344 = vmatpush.msrb.mxu1 %v928_v43  ;;  %2366 = vmatpush.msrb.mxu2 %v1040_v22  ;;  %v721_v16 = vld [vmem:[%s3087_s8 + $0xf38] sm:$0xff]  ;;  %2559 = vst [vmem:[%s3555_s4 + $0x20] sm:$0xff] %v2073_v41  ;;  %v4148_v22 = vld [vmem:[#allocation2 + $0x20] sm:$0xff] }
 0x28e   : > { %v784_v27 = vld [vmem:[%s3087_s8 + $0x1130] sm:$0xff]  ;;  %2385 = vmatpush.msrb.mxu3 %v1176_v54  ;;  %2251 = vmatmul.f32.vlgmr.msra.gmra.mxu0 %v4119_v25  ;;  %v329_v5 = vld [vmem:[%s3087_s8 + $0x2f8] sm:$0xff] }
 0x28f   : > { %v920_v48 = vld [vmem:[%s3087_s8 + $0x1570] sm:$0xff]  ;;  %2326 = vmatpush.msrb.mxu0 %v784_v27  ;;  %2311 = vmatmul.f32.vlgmr.msra.gmra.mxu3 %v4124_v30  ;;  %v465_v21 = vld [vmem:[%s3087_s8 + $0x738] sm:$0xff] }
 0x290   : > { %v1032_v49 = vld [vmem:[%s3087_s8 + $0x18f0] sm:$0xff]  ;;  %2345 = vmatpush.msrb.mxu1 %v920_v48  ;;  %v577_v43 = vld [vmem:[%s3087_s8 + $0xab8] sm:$0xff] }
 0x291   : > { %v1168_v51 = vld [vmem:[%s3087_s8 + $0x1d30] sm:$0xff]  ;;  %2367 = vmatpush.msrb.mxu2 %v1032_v49  ;;  %2271 = vmatmul.f32.vlgmr.msra.gmra.mxu1 %v4132_v35  ;;  %v713_v54 = vld [vmem:[%s3087_s8 + $0xef8] sm:$0xff] }
 0x292   : > { %v776_v56 = vld [vmem:[%s3087_s8 + $0x10f0] sm:$0xff]  ;;  %2386 = vmatpush.msrb.mxu3 %v1168_v51  ;;  %v321_v27 = vld [vmem:[%s3087_s8 + $0x2b8] sm:$0xff] }
 0x293   : > { %v912_v57 = vld [vmem:[%s3087_s8 + $0x1530] sm:$0xff]  ;;  %2327 = vmatpush.msrb.mxu0 %v776_v56  ;;  %v457_v48 = vld [vmem:[%s3087_s8 + $0x6f8] sm:$0xff]  ;;  %v4159_v56 = vld [vmem:[#allocation2 + $0x28] sm:$0xff] }
 0x294   : > { %v1024_v61 = vld [vmem:[%s3087_s8 + $0x18b0] sm:$0xff]  ;;  %2346 = vmatpush.msrb.mxu1 %v912_v57  ;;  %v569_v49 = vld [vmem:[%s3087_s8 + $0xa78] sm:$0xff] }
 0x295   : > { %v1160_v0 = vld [vmem:[%s3087_s8 + $0x1cf0] sm:$0xff]  ;;  %2368 = vmatpush.msrb.mxu2 %v1024_v61  ;;  %v705_v51 = vld [vmem:[%s3087_s8 + $0xeb8] sm:$0xff] }
 0x296   : > { %v768_v4 = vld [vmem:[%s3087_s8 + $0x10b0] sm:$0xff]  ;;  %2387 = vmatpush.msrb.mxu3 %v1160_v0  ;;  %v313_v57 = vld [vmem:[%s3087_s8 + $0x278] sm:$0xff] }
 0x297   : > { %v904_v6 = vld [vmem:[%s3087_s8 + $0x14f0] sm:$0xff]  ;;  %2328 = vmatpush.msrb.mxu0 %v768_v4  ;;  %v561_v61 = vld [vmem:[%s3087_s8 + $0xa38] sm:$0xff] }
 0x298   : > { %v1016_v7 = vld [vmem:[%s3087_s8 + $0x1870] sm:$0xff]  ;;  %2347 = vmatpush.msrb.mxu1 %v904_v6  ;;  %v697_v0 = vld [vmem:[%s3087_s8 + $0xe78] sm:$0xff] }
 0x299   : > { %v1152_v9 = vld [vmem:[%s3087_s8 + $0x1cb0] sm:$0xff]  ;;  %2369 = vmatpush.msrb.mxu2 %v1016_v7  ;;  %v305_v3 = vld [vmem:[%s3087_s8 + $0x238] sm:$0xff] }
 0x29a   : > { %v760_v10 = vld [vmem:[%s3087_s8 + $0x1070] sm:$0xff]  ;;  %2388 = vmatpush.msrb.mxu3 %v1152_v9  ;;  %v441_v4 = vld [vmem:[%s3087_s8 + $0x678] sm:$0xff] }
 0x29b   : > { %v896_v11 = vld [vmem:[%s3087_s8 + $0x14b0] sm:$0xff]  ;;  %2329 = vmatpush.msrb.mxu0 %v760_v10  ;;  %v553_v6 = vld [vmem:[%s3087_s8 + $0x9f8] sm:$0xff] }
 0x29c   : > { %v1008_v13 = vld [vmem:[%s3087_s8 + $0x1830] sm:$0xff]  ;;  %2348 = vmatpush.msrb.mxu1 %v896_v11  ;;  %v689_v7 = vld [vmem:[%s3087_s8 + $0xe38] sm:$0xff] }
 0x29d   : > { %v1144_v14 = vld [vmem:[%s3087_s8 + $0x1c70] sm:$0xff]  ;;  %2370 = vmatpush.msrb.mxu2 %v1008_v13  ;;  %v297_v9 = vld [vmem:[%s3087_s8 + $0x1f8] sm:$0xff] }
 0x29e   : > { %v752_v31 = vld [vmem:[%s3087_s8 + $0x1030] sm:$0xff]  ;;  %2389 = vmatpush.msrb.mxu3 %v1144_v14  ;;  %v433_v10 = vld [vmem:[%s3087_s8 + $0x638] sm:$0xff] }
 0x29f   : > { %v888_v17 = vld [vmem:[%s3087_s8 + $0x1470] sm:$0xff]  ;;  %2330 = vmatpush.msrb.mxu0 %v752_v31  ;;  %v545_v11 = vld [vmem:[%s3087_s8 + $0x9b8] sm:$0xff] }
 0x2a0   : > { %v1136_v19 = vld [vmem:[%s3087_s8 + $0x1c30] sm:$0xff]  ;;  %2349 = vmatpush.msrb.mxu1 %v888_v17  ;;  %2331 = vmatmul.f32.vlgmr.msrb.gmra.mxu0 %v4148_v22  ;;  %v681_v12 = vld [vmem:[%s3087_s8 + $0xdf8] sm:$0xff] }
 0x2a1   : > { %v4113_v36 = vld [vmem:[#allocation2 + $0x10] sm:$0xff]  ;;  %2390 = vmatpush.msrb.mxu3 %v1136_v19  ;;  %2395 = vmatpush.msra.mxu0 %v361_v20  ;;  %v289_v26 = vld [vmem:[%s3087_s8 + $0x1b8] sm:$0xff] }
 0x2a2   : > { %2291 = vmatmul.f32.vlgmr.msra.gmra.mxu2 %v4113_v36  ;;  %v880_v28 = vld [vmem:[%s3087_s8 + $0x1430] sm:$0xff]  ;;  %2391 = vmatmul.f32.vlgmr.msrb.gmra.mxu3 %v4152_v46  ;;  %v425_v13 = vld [vmem:[%s3087_s8 + $0x5f8] sm:$0xff] }
 0x2a3   : > { %2435 = vmatpush.msra.mxu2 %v617_v1  ;;  %2455 = vmatpush.msra.mxu3 %v745_v39  ;;  %v4141_v42 = vld [vmem:[#allocation2 + $0x30] sm:$0xff]  ;;  %v537_v14 = vld [vmem:[%s3087_s8 + $0x978] sm:$0xff] }
 0x2a4   : > { %2350 = vmatpush.msrb.mxu1 %v880_v28  ;;  %2396 = vmatpush.msra.mxu0 %v353_v60  ;;  %v673_v15 = vld [vmem:[%s3087_s8 + $0xdb8] sm:$0xff] }
 0x2a5   : > { %2436 = vmatpush.msra.mxu2 %v609_v24  ;;  %2456 = vmatpush.msra.mxu3 %v737_v32  ;;  %v281_v31 = vld [vmem:[%s3087_s8 + $0x178] sm:$0xff] }
 0x2a6   : > { %2415 = vmatpush.msra.mxu1 %v489_v45  ;;  %2397 = vmatpush.msra.mxu0 %v345_v50  ;;  %v417_v1 = vld [vmem:[%s3087_s8 + $0x5b8] sm:$0xff] }
 0x2a7   : > { %2437 = vmatpush.msra.mxu2 %v601_v47  ;;  %2457 = vmatpush.msra.mxu3 %v729_v37  ;;  %v529_v17 = vld [vmem:[%s3087_s8 + $0x938] sm:$0xff] }
 0x2a8   : > { %2416 = vmatpush.msra.mxu1 %v481_v8  ;;  %2398 = vmatpush.msra.mxu0 %v337_v63  ;;  %v665_v18 = vld [vmem:[%s3087_s8 + $0xd78] sm:$0xff] }
 0x2a9   : > { %2438 = vmatpush.msra.mxu2 %v593_v33  ;;  %2458 = vmatpush.msra.mxu3 %v721_v16  ;;  %v273_v34 = vld [vmem:[%s3087_s8 + $0x138] sm:$0xff] }
 0x2aa   : > { %2371 = vmatmul.f32.vlgmr.msrb.gmra.mxu2 %v4141_v42  ;;  %2417 = vmatpush.msra.mxu1 %v473_v38  ;;  %v409_v19 = vld [vmem:[%s3087_s8 + $0x578] sm:$0xff] }
 0x2ab   : > { %2439 = vmatpush.msra.mxu2 %v585_v62  ;;  %2399 = vmatpush.msra.mxu0 %v329_v5  ;;  %v521_v20 = vld [vmem:[%s3087_s8 + $0x8f8] sm:$0xff] }
 0x2ac   : > { %2418 = vmatpush.msra.mxu1 %v465_v21  ;;  %2459 = vmatpush.msra.mxu3 %v713_v54  ;;  %v657_v23 = vld [vmem:[%s3087_s8 + $0xd38] sm:$0xff] }
 0x2ad   : > { %2440 = vmatpush.msra.mxu2 %v577_v43  ;;  %2351 = vmatmul.f32.vlgmr.msrb.gmra.mxu1 %v4159_v56  ;;  %v265_v24 = vld [vmem:[%s3087_s8 + $0xf8] sm:$0xff] }
 0x2ae   : > { %2400 = vmatpush.msra.mxu0 %v321_v27  ;;  %2419 = vmatpush.msra.mxu1 %v457_v48  ;;  %v401_v39 = vld [vmem:[%s3087_s8 + $0x538] sm:$0xff] }
 0x2af   : > { %2441 = vmatpush.msra.mxu2 %v569_v49  ;;  %2460 = vmatpush.msra.mxu3 %v705_v51  ;;  %v513_v40 = vld [vmem:[%s3087_s8 + $0x8b8] sm:$0xff] }
 0x2b0   : > { %2401 = vmatpush.msra.mxu0 %v313_v57  ;;  %2420 = vmatpush.msra.mxu1 %v449_v58  ;;  %v649_v28 = vld [vmem:[%s3087_s8 + $0xcf8] sm:$0xff] }
 0x2b1   : > { %2442 = vmatpush.msra.mxu2 %v561_v61  ;;  %2461 = vmatpush.msra.mxu3 %v697_v0  ;;  %v257_v60 = vld [vmem:[%s3087_s8 + $0xb8] sm:$0xff] }
 0x2b2   : > { %2402 = vmatpush.msra.mxu0 %v305_v3  ;;  %2421 = vmatpush.msra.mxu1 %v441_v4  ;;  %v393_v29 = vld [vmem:[%s3087_s8 + $0x4f8] sm:$0xff] }
 0x2b3   : > { %2443 = vmatpush.msra.mxu2 %v553_v6  ;;  %2462 = vmatpush.msra.mxu3 %v689_v7  ;;  %v505_v47 = vld [vmem:[%s3087_s8 + $0x878] sm:$0xff] }
 0x2b4   : > { %2403 = vmatpush.msra.mxu0 %v297_v9  ;;  %2422 = vmatpush.msra.mxu1 %v433_v10  ;;  %v641_v45 = vld [vmem:[%s3087_s8 + $0xcb8] sm:$0xff] }
 0x2b5   : > { %2444 = vmatpush.msra.mxu2 %v545_v11  ;;  %2463 = vmatpush.msra.mxu3 %v681_v12  ;;  %v249_v32 = vld [vmem:[%s3087_s8 + $0x78] sm:$0xff] }
 0x2b6   : > { %2404 = vmatpush.msra.mxu0 %v289_v26  ;;  %2423 = vmatpush.msra.mxu1 %v425_v13  ;;  %v385_v2 = vld [vmem:[%s3087_s8 + $0x4b8] sm:$0xff] }
 0x2b7   : > { %2445 = vmatpush.msra.mxu2 %v537_v14  ;;  %2464 = vmatpush.msra.mxu3 %v673_v15  ;;  %v497_v50 = vld [vmem:[%s3087_s8 + $0x838] sm:$0xff] }
 0x2b8   : > { %2405 = vmatpush.msra.mxu0 %v281_v31  ;;  %2424 = vmatpush.msra.mxu1 %v417_v1  ;;  %v633_v33 = vld [vmem:[%s3087_s8 + $0xc78] sm:$0xff] }
 0x2b9   : > { %2446 = vmatpush.msra.mxu2 %v529_v17  ;;  %2465 = vmatpush.msra.mxu3 %v665_v18  ;;  %v1129_v53 = vld [vmem:[%s3087_s8 + $0x1bf8] sm:$0xff] }
 0x2ba   : > { %2406 = vmatpush.msra.mxu0 %v273_v34  ;;  %2425 = vmatpush.msra.mxu1 %v409_v19  ;;  %v241_v55 = vld [vmem:[%s3087_s8 + $0x38] sm:$0xff] }
 0x2bb   : > { %2447 = vmatpush.msra.mxu2 %v521_v20  ;;  %2466 = vmatpush.msra.mxu3 %v657_v23  ;;  %v377_v8 = vld [vmem:[%s3087_s8 + $0x478] sm:$0xff] }
 0x2bc   : > { %2407 = vmatpush.msra.mxu0 %v265_v24  ;;  %2426 = vmatpush.msra.mxu1 %v401_v39  ;;  %v625_v37 = vld [vmem:[%s3087_s8 + $0xc38] sm:$0xff] }
 0x2bd   : > { %2448 = vmatpush.msra.mxu2 %v513_v40  ;;  %2467 = vmatpush.msra.mxu3 %v649_v28  ;;  %v873_v63 = vld [vmem:[%s3087_s8 + $0x13f8] sm:$0xff] }
 0x2be   : > { %2408 = vmatpush.msra.mxu0 %v257_v60  ;;  %2427 = vmatpush.msra.mxu1 %v393_v29  ;;  %v1121_v59 = vld [vmem:[%s3087_s8 + $0x1bb8] sm:$0xff]  ;;  %v1264_v29 = vperm.slane %v4090_v44, 5 }
 0x2bf   : > { %2449 = vmatpush.msra.mxu2 %v505_v47  ;;  %2468 = vmatpush.msra.mxu3 %v641_v45  ;;  %v1257_v38 = vld [vmem:[%s3087_s8 + $0x1ff8] sm:$0xff] }
 0x2c0   : > { %2409 = vmatpush.msra.mxu0 %v249_v32  ;;  %2428 = vmatpush.msra.mxu1 %v385_v2  ;;  %v369_v62 = vld [vmem:[%s3087_s8 + $0x438] sm:$0xff] }
 0x2c1   : > { %2450 = vmatpush.msra.mxu2 %v497_v50  ;;  %2469 = vmatpush.msra.mxu3 %v633_v33  ;;  %v865_v52 = vld [vmem:[%s3087_s8 + $0x13b8] sm:$0xff]  ;;  %v2092_v50 = vpop.f32.mrf.mxu0 }
 0x2c2   : > { %2410 = vmatpush.msra.mxu0 %v241_v55  ;;  %2429 = vmatpush.msra.mxu1 %v377_v8  ;;  %v1001_v16 = vld [vmem:[%s3087_s8 + $0x17f8] sm:$0xff] }
 0x2c3   : > { %2515 = vmatpush.msrb.mxu2 %v1129_v53  ;;  %2470 = vmatpush.msra.mxu3 %v625_v37  ;;  %v1113_v41 = vld [vmem:[%s3087_s8 + $0x1b78] sm:$0xff]  ;;  %v2093_v53 = vadd.f32 %v2092_v50, %v1264_v29 }
 0x2c4   : > { %2475 = vmatpush.msrb.mxu0 %v873_v63  ;;  %v1249_v5 = vld [vmem:[%s3087_s8 + $0x1fb8] sm:$0xff]  ;;  %2430 = vmatpush.msra.mxu1 %v369_v62 }
 0x2c5   : > { %2516 = vmatpush.msrb.mxu2 %v1121_v59  ;;  %2535 = vmatpush.msrb.mxu3 %v1257_v38  ;;  %v857_v21 = vld [vmem:[%s3087_s8 + $0x1378] sm:$0xff]  ;;  %v2112_v59 = vpop.f32.mrf.mxu1  ;;  %v2132_v38 = vpop.f32.mrf.mxu2 }
 0x2c6   : > { %v993_v43 = vld [vmem:[%s3087_s8 + $0x17b8] sm:$0xff]  ;;  %2476 = vmatpush.msrb.mxu0 %v865_v52  ;;  %2495 = vmatpush.msrb.mxu1 %v1001_v16  ;;  %v2113_v16 = vadd.f32 %v2112_v59, %v2093_v53 }
 0x2c7   : > { %v1105_v54 = vld [vmem:[%s3087_s8 + $0x1b38] sm:$0xff]  ;;  %2517 = vmatpush.msrb.mxu2 %v1113_v41  ;;  %2536 = vmatpush.msrb.mxu3 %v1249_v5 }
 0x2c8   : > { %v1241_v27 = vld [vmem:[%s3087_s8 + $0x1f78] sm:$0xff]  ;;  %2477 = vmatpush.msrb.mxu0 %v857_v21  ;;  %2496 = vmatpush.msrb.mxu1 %v993_v43  ;;  %v2133_v21 = vadd.f32 %v2132_v38, %v2113_v16  ;;  %v2152_v43 = vpop.f32.mrf.mxu3 }
 0x2c9   : > { %v849_v48 = vld [vmem:[%s3087_s8 + $0x1338] sm:$0xff]  ;;  %2518 = vmatpush.msrb.mxu2 %v1105_v54  ;;  %2537 = vmatpush.msrb.mxu3 %v1241_v27 }
 0x2ca   : > { %v985_v49 = vld [vmem:[%s3087_s8 + $0x1778] sm:$0xff]  ;;  %2478 = vmatpush.msrb.mxu0 %v849_v48  ;;  %2451 = vmatmul.f32.vlgmr.msra.gmra.mxu2 %v4113_v36 }
 0x2cb   : > { %v1097_v51 = vld [vmem:[%s3087_s8 + $0x1af8] sm:$0xff]  ;;  %2497 = vmatpush.msrb.mxu1 %v985_v49  ;;  %2411 = vmatmul.f32.vlgmr.msra.gmra.mxu0 %v4119_v25  ;;  %v2153_v49 = vadd.f32 %v2152_v43, %v2133_v21 }
 0x2cc   : > { %v1233_v57 = vld [vmem:[%s3087_s8 + $0x1f38] sm:$0xff]  ;;  %2519 = vmatpush.msrb.mxu2 %v1097_v51  ;;  %2471 = vmatmul.f32.vlgmr.msra.gmra.mxu3 %v4124_v30 }
 0x2cd   : > { %v841_v58 = vld [vmem:[%s3087_s8 + $0x12f8] sm:$0xff]  ;;  %2538 = vmatpush.msrb.mxu3 %v1233_v57  ;;  %2431 = vmatmul.f32.vlgmr.msra.gmra.mxu1 %v4132_v35 }
 0x2ce   : > { %v977_v61 = vld [vmem:[%s3087_s8 + $0x1738] sm:$0xff]  ;;  %2479 = vmatpush.msrb.mxu0 %v841_v58 }
 0x2cf   : > { %v1089_v0 = vld [vmem:[%s3087_s8 + $0x1ab8] sm:$0xff]  ;;  %2498 = vmatpush.msrb.mxu1 %v977_v61 }
 0x2d0   : > { %v1225_v3 = vld [vmem:[%s3087_s8 + $0x1ef8] sm:$0xff]  ;;  %2520 = vmatpush.msrb.mxu2 %v1089_v0 }
 0x2d1   : > { %v833_v4 = vld [vmem:[%s3087_s8 + $0x12b8] sm:$0xff]  ;;  %2539 = vmatpush.msrb.mxu3 %v1225_v3 }
 0x2d2   : > { %v969_v6 = vld [vmem:[%s3087_s8 + $0x16f8] sm:$0xff]  ;;  %2480 = vmatpush.msrb.mxu0 %v833_v4 }
 0x2d3   : > { %v1081_v7 = vld [vmem:[%s3087_s8 + $0x1a78] sm:$0xff]  ;;  %2499 = vmatpush.msrb.mxu1 %v969_v6  ;;  %v2172_v35 = vpop.f32.mrf.mxu0 }
 0x2d4   : > { %v1217_v9 = vld [vmem:[%s3087_s8 + $0x1eb8] sm:$0xff]  ;;  %2521 = vmatpush.msrb.mxu2 %v1081_v7  ;;  %v2173_v57 = vadd.f32 %v2172_v35, %v2153_v49 }
 0x2d5   : > { %v825_v10 = vld [vmem:[%s3087_s8 + $0x1278] sm:$0xff]  ;;  %2540 = vmatpush.msrb.mxu3 %v1217_v9 }
 0x2d6   : > { %v961_v11 = vld [vmem:[%s3087_s8 + $0x16b8] sm:$0xff]  ;;  %2481 = vmatpush.msrb.mxu0 %v825_v10 }
 0x2d7   : > { %v1073_v12 = vld [vmem:[%s3087_s8 + $0x1a38] sm:$0xff]  ;;  %2500 = vmatpush.msrb.mxu1 %v961_v11  ;;  %v2212_v0 = vpop.f32.mrf.mxu2 }
 0x2d8   : > { %v1209_v26 = vld [vmem:[%s3087_s8 + $0x1e78] sm:$0xff]  ;;  %2522 = vmatpush.msrb.mxu2 %v1073_v12 }
 0x2d9   : > { %v817_v13 = vld [vmem:[%s3087_s8 + $0x1238] sm:$0xff]  ;;  %2541 = vmatpush.msrb.mxu3 %v1209_v26 }
 0x2da   : > { %v953_v14 = vld [vmem:[%s3087_s8 + $0x1678] sm:$0xff]  ;;  %2482 = vmatpush.msrb.mxu0 %v817_v13 }
 0x2db   : > { %v1065_v15 = vld [vmem:[%s3087_s8 + $0x19f8] sm:$0xff]  ;;  %2501 = vmatpush.msrb.mxu1 %v953_v14 }
 0x2dc   : > { %v1201_v31 = vld [vmem:[%s3087_s8 + $0x1e38] sm:$0xff]  ;;  %2523 = vmatpush.msrb.mxu2 %v1065_v15 }
 0x2dd   : > { %v809_v1 = vld [vmem:[%s3087_s8 + $0x11f8] sm:$0xff]  ;;  %2542 = vmatpush.msrb.mxu3 %v1201_v31 }
 0x2de   : > { %v945_v17 = vld [vmem:[%s3087_s8 + $0x1638] sm:$0xff]  ;;  %2483 = vmatpush.msrb.mxu0 %v809_v1 }
 0x2df   : > { %v1057_v18 = vld [vmem:[%s3087_s8 + $0x19b8] sm:$0xff]  ;;  %2502 = vmatpush.msrb.mxu1 %v945_v17  ;;  %v2192_v58 = vpop.f32.mrf.mxu1 }
 0x2e0   : > { %v1193_v34 = vld [vmem:[%s3087_s8 + $0x1df8] sm:$0xff]  ;;  %2524 = vmatpush.msrb.mxu2 %v1057_v18  ;;  %v2193_v61 = vadd.f32 %v2192_v58, %v2173_v57 }
 0x2e1   : > { %v801_v19 = vld [vmem:[%s3087_s8 + $0x11b8] sm:$0xff]  ;;  %2543 = vmatpush.msrb.mxu3 %v1193_v34  ;;  %v1266_v34 = vperm.slane %v4090_v44, 7 }
 0x2e2   : > { %v937_v20 = vld [vmem:[%s3087_s8 + $0x15f8] sm:$0xff]  ;;  %2484 = vmatpush.msrb.mxu0 %v801_v19  ;;  %v2213_v3 = vadd.f32 %v2212_v0, %v2193_v61 }
 0x2e3   : > { %v1049_v23 = vld [vmem:[%s3087_s8 + $0x1978] sm:$0xff]  ;;  %2503 = vmatpush.msrb.mxu1 %v937_v20  ;;  %v2232_v4 = vpop.f32.mrf.mxu3 }
 0x2e4   : > { %v1185_v24 = vld [vmem:[%s3087_s8 + $0x1db8] sm:$0xff]  ;;  %2525 = vmatpush.msrb.mxu2 %v1049_v23  ;;  %v2233_v6 = vadd.f32 %v2232_v4, %v2213_v3 }
 0x2e5   : > { %v793_v39 = vld [vmem:[%s3087_s8 + $0x1178] sm:$0xff]  ;;  %2544 = vmatpush.msrb.mxu3 %v1185_v24 }
 0x2e6   : > { %v929_v40 = vld [vmem:[%s3087_s8 + $0x15b8] sm:$0xff]  ;;  %2485 = vmatpush.msrb.mxu0 %v793_v39  ;;  %2560 = vst [vmem:[%s3555_s4 + $0x28] sm:$0xff] %v2233_v6 }
 0x2e7   : > { %v1041_v28 = vld [vmem:[%s3087_s8 + $0x1938] sm:$0xff]  ;;  %2504 = vmatpush.msrb.mxu1 %v929_v40 }
 0x2e8   : > { %v1177_v60 = vld [vmem:[%s3087_s8 + $0x1d78] sm:$0xff]  ;;  %2526 = vmatpush.msrb.mxu2 %v1041_v28 }
 0x2e9   : > { %v785_v47 = vld [vmem:[%s3087_s8 + $0x1138] sm:$0xff]  ;;  %2545 = vmatpush.msrb.mxu3 %v1177_v60 }
 0x2ea   : > { %v921_v45 = vld [vmem:[%s3087_s8 + $0x1578] sm:$0xff]  ;;  %2486 = vmatpush.msrb.mxu0 %v785_v47 }
 0x2eb   : > { %v1033_v32 = vld [vmem:[%s3087_s8 + $0x18f8] sm:$0xff]  ;;  %2505 = vmatpush.msrb.mxu1 %v921_v45 }
 0x2ec   : > { %v1169_v2 = vld [vmem:[%s3087_s8 + $0x1d38] sm:$0xff]  ;;  %2527 = vmatpush.msrb.mxu2 %v1033_v32 }
 0x2ed   : > { %v777_v33 = vld [vmem:[%s3087_s8 + $0x10f8] sm:$0xff]  ;;  %2546 = vmatpush.msrb.mxu3 %v1169_v2 }
 0x2ee   : > { %v913_v55 = vld [vmem:[%s3087_s8 + $0x1538] sm:$0xff]  ;;  %2487 = vmatpush.msrb.mxu0 %v777_v33 }
 0x2ef   : > { %v1025_v8 = vld [vmem:[%s3087_s8 + $0x18b8] sm:$0xff]  ;;  %2506 = vmatpush.msrb.mxu1 %v913_v55 }
 0x2f0   : > { %v1161_v37 = vld [vmem:[%s3087_s8 + $0x1cf8] sm:$0xff]  ;;  %2528 = vmatpush.msrb.mxu2 %v1025_v8 }
 0x2f1   : > { %v769_v36 = vld [vmem:[%s3087_s8 + $0x10b8] sm:$0xff]  ;;  %2547 = vmatpush.msrb.mxu3 %v1161_v37 }
 0x2f2   : > { %v905_v63 = vld [vmem:[%s3087_s8 + $0x14f8] sm:$0xff]  ;;  %2488 = vmatpush.msrb.mxu0 %v769_v36 }
 0x2f3   : > { %v1017_v62 = vld [vmem:[%s3087_s8 + $0x1878] sm:$0xff]  ;;  %2507 = vmatpush.msrb.mxu1 %v905_v63 }
 0x2f4   : > { %v1153_v52 = vld [vmem:[%s3087_s8 + $0x1cb8] sm:$0xff]  ;;  %2529 = vmatpush.msrb.mxu2 %v1017_v62 }
 0x2f5   : > { %v761_v25 = vld [vmem:[%s3087_s8 + $0x1078] sm:$0xff]  ;;  %2548 = vmatpush.msrb.mxu3 %v1153_v52 }
 0x2f6   : > { %v897_v30 = vld [vmem:[%s3087_s8 + $0x14b8] sm:$0xff]  ;;  %2489 = vmatpush.msrb.mxu0 %v761_v25 }
 0x2f7   : > { %v1009_v41 = vld [vmem:[%s3087_s8 + $0x1838] sm:$0xff]  ;;  %2508 = vmatpush.msrb.mxu1 %v897_v30 }
 0x2f8   : > { %v1145_v5 = vld [vmem:[%s3087_s8 + $0x1c78] sm:$0xff]  ;;  %2530 = vmatpush.msrb.mxu2 %v1009_v41 }
 0x2f9   : > { %v753_v54 = vld [vmem:[%s3087_s8 + $0x1038] sm:$0xff]  ;;  %2549 = vmatpush.msrb.mxu3 %v1145_v5  ;;  %2531 = vmatmul.f32.vlgmr.msrb.gmra.mxu2 %v4141_v42  ;;  %v1265_v42 = vperm.slane %v4090_v44, 6 }
 0x2fa   : > { %v889_v27 = vld [vmem:[%s3087_s8 + $0x1478] sm:$0xff]  ;;  %2490 = vmatpush.msrb.mxu0 %v753_v54 }
 0x2fb   : > { %v1137_v48 = vld [vmem:[%s3087_s8 + $0x1c38] sm:$0xff]  ;;  %2509 = vmatpush.msrb.mxu1 %v889_v27  ;;  %2491 = vmatmul.f32.vlgmr.msrb.gmra.mxu0 %v4148_v22 }
 0x2fc   : > { %v881_v51 = vld [vmem:[%s3087_s8 + $0x1438] sm:$0xff]  ;;  %2550 = vmatpush.msrb.mxu3 %v1137_v48 }
 0x2fd   : > { %2551 = vmatmul.f32.vlgmr.msrb.gmra.mxu3 %v4152_v46  ;;  %2510 = vmatpush.msrb.mxu1 %v881_v51 }
 0x2fe   : > { %2511 = vmatmul.f32.vlgmr.msrb.gmra.mxu1 %v4159_v56 }
 0x30b   : > { %v2252_v7 = vpop.f32.mrf.mxu0 }
 0x30c   : > { %v2253_v9 = vadd.f32 %v2252_v7, %v1265_v42 }
 0x30e   : > { %v2272_v10 = vpop.f32.mrf.mxu1 }
 0x30f   : > { %v2273_v22 = vadd.f32 %v2272_v10, %v2253_v9 }
 0x312   : > { %v2312_v46 = vpop.f32.mrf.mxu3 }
 0x31d   : > { %v2332_v13 = vpop.f32.mrf.mxu0 }
 0x325   : > { %v2292_v11 = vpop.f32.mrf.mxu2  ;;  %v2392_v17 = vpop.f32.mrf.mxu3 }
 0x326   : > { %v2293_v12 = vadd.f32 %v2292_v11, %v2273_v22 }
 0x328   : > { %v2313_v26 = vadd.f32 %v2312_v46, %v2293_v12 }
 0x32a   : > { %v2333_v14 = vadd.f32 %v2332_v13, %v2313_v26  ;;  %v2352_v15 = vpop.f32.mrf.mxu1 }
 0x32c   : > { %v2353_v56 = vadd.f32 %v2352_v15, %v2333_v14 }
 0x32d   : > { %v2372_v31 = vpop.f32.mrf.mxu2 }
 0x32e   : > { %v2373_v1 = vadd.f32 %v2372_v31, %v2353_v56 }
 0x330   : > { %v2393_v18 = vadd.f32 %v2392_v17, %v2373_v1 }
 0x332   : > { %2561 = vst [vmem:[%s3555_s4 + $0x30] sm:$0xff] %v2393_v18 }
 0x348   : > { %v2412_v19 = vpop.f32.mrf.mxu0 }
 0x349   : > { %v2413_v20 = vadd.f32 %v2412_v19, %v1266_v34 }
 0x34a   : > { %v2432_v23 = vpop.f32.mrf.mxu1 }
 0x34b   : > { %v2433_v24 = vadd.f32 %v2432_v23, %v2413_v20 }
 0x34d   : > { %v2452_v39 = vpop.f32.mrf.mxu2 }
 0x34e   : > { %v2453_v40 = vadd.f32 %v2452_v39, %v2433_v24 }
 0x34f   : > { %v2472_v28 = vpop.f32.mrf.mxu3 }
 0x350   : > { %v2473_v60 = vadd.f32 %v2472_v28, %v2453_v40 }
 0x378   : > { %v2492_v29 = vpop.f32.mrf.mxu0 }
 0x379   : > { %v2493_v47 = vadd.f32 %v2492_v29, %v2473_v60 }
 0x37b   : > { %v2512_v45 = vpop.f32.mrf.mxu1 }
 0x37c   : > { %v2513_v44 = vadd.f32 %v2512_v45, %v2493_v47  ;;  %v2532_v32 = vpop.f32.mrf.mxu2 }
 0x37e   : > { %v2533_v2 = vadd.f32 %v2532_v32, %v2513_v44 }
 0x380   : > { %v2552_v50 = vpop.f32.mrf.mxu3 }
 0x381   : > { %v2553_v33 = vadd.f32 %v2552_v50, %v2533_v2 }
 0x383   : > { %2562 = vst [vmem:[%s3555_s4 + $0x38] sm:$0xff] %v2553_v33 }
 0x384   : > { %2905 = shalt.err (!%p2902_p8)
}
 0x385   : > { %2703 = dma.vmem_to_hbm [thread:$0]  (%p3030_p11), %s2578_s27, 1024, %s2580_s20, %s2564_s11  }
 0x386 PF: > { %s2591_s30 = sand.u32 1, %s2940_s12   ;;  %p4324_p9 = scmp.ge.s32.totalorder %s2952_s15, 2 }
 0x387   : > { %s2592_s26 = scalar_lea.sflag [#allocation4], %s2591_s30 }
 0x388   : > { %p2717_p10 = pnand %p4324_p9, %p3034_p12 }
 0x38a   : > { %p2718_p1 = pneg %p2717_p10 }
 0x38c   : > { %2935 = dma.done.wait (%p2718_p1), %s2592_s26, 1024  }
 0x38d   : > { %2937 = vsyncadd (%p2718_p1), %s2592_s26, 4294966272  ;;  %p17_p2 = scmp.ge.s32.totalorder %s3003_s18, 4   ;;  %s4325_s12 = smov %s2944_s13 }
 0x38e   : > { %s4326_s13 = smov %s2948_s14  ;;  %s4327_s14 = smov %s3015_s21 }
 0x38f   : > { %s4328_s15 = smov %s3003_s18  ;;  %19 = sbr.rel (!%p17_p2) target bundleno = 6 (0x6), region = 87 }
 0x394   :  { %2598 = vsyncpa [#allocation3], 1 }
 0x395   :  { %2600 = vsyncpa [#allocation3 + $0x1], 1 }
 0x396   :  { %2601 = vsyncpa [#allocation6], 1 }
 0x397   :  { %2603 = vsyncpa [#allocation6 + $0x1], 1 }
 0x398   :  { %2604 = vsyncpa [#allocation4], 1 }
 0x399   :  { %2606 = vsyncpa [#allocation4 + $0x1], 1 }

</bundles_post_ra>
